<compile_context>
chip_gen: v5e
topology: v5e:2x2
jax: 0.10.0
libtpu: 0.0.40
codegen_flags: <defaults>
</compile_context>

<pallas_src>
import numpy as np
import jax
import jax.numpy as jnp
from jax.experimental import pallas as pl
from jax.experimental.pallas import tpu as pltpu


def neighbourhood_filters(neighbourhood_size):
    """Deterministic parameter init mirroring the PyTorch __init__:
    a bank of kh*kw unit-impulse filters of shape (kh, kw)."""
    kh, kw = neighbourhood_size
    filters = np.zeros((kh * kw, kh, kw), dtype=np.float32)
    for i in range(kh):
        for j in range(kw):
            filters[i * kw + j, i, j] = 1.0
    return jnp.asarray(filters)


def _make_localize_kernel(tb, height, width, kh, kw, d):
    # PyTorch Conv2d(padding='same'), stride=1, dilation=1:
    #   top/left pad = (k-1)//2, bottom/right pad = (k-1) - (k-1)//2
    # (conv2d is correlation, no filter flip), valid for odd AND even k.
    pad_t = (kh - 1) // 2
    pad_b = (kh - 1) - pad_t
    pad_l = (kw - 1) // 2
    pad_r = (kw - 1) - pad_l
    hp = height + kh - 1
    wp = width + kw - 1
    offsets = [(fi, fj) for fi in range(kh) for fj in range(kw)]

    def kernel(x_ref, o_ref, xp_ref):
        # Stage the tile into the persistent padded scratch.  Only the thin
        # halo strips need zeroing each step (interior is fully overwritten).
        zdt = x_ref.dtype
        if pad_t:
            xp_ref[:, 0:pad_t, :, :] = jnp.zeros((tb, pad_t, wp, d), zdt)
        if pad_b:
            xp_ref[:, hp - pad_b:hp, :, :] = jnp.zeros((tb, pad_b, wp, d), zdt)
        if pad_l:
            xp_ref[:, :, 0:pad_l, :] = jnp.zeros((tb, hp, pad_l, d), zdt)
        if pad_r:
            xp_ref[:, :, wp - pad_r:wp, :] = jnp.zeros((tb, hp, pad_r, d), zdt)
        xp_ref[:, pad_t:pad_t + height, pad_l:pad_l + width, :] = x_ref[...]

        # Each impulse filter output is a static shifted slice of the padded
        # scratch; store it straight into its d-wide lane slot of the output.
        # TODO(synk): offsets[(pad_t, pad_l)] is the identity (== x); could be
        # aliased/skipped if the consumer contract allowed it.
        for f, (fi, fj) in enumerate(offsets):
            o_ref[:, :, :, f * d:(f + 1) * d] = \
                xp_ref[:, fi:fi + height, fj:fj + width, :]

    return kernel


def _tpu_vmem_plan():
    """Per-generation VMEM plan -> (vmem_limit_bytes, tiling_budget_bytes, multi_tc)."""
    vmem_cap = 64 << 20  # conservative default (v7x: 64 MiB per TensorCore)
    try:
        info = pltpu.get_tpu_info()
        cap = getattr(info, "vmem_capacity_bytes", None)
        if cap:
            vmem_cap = int(cap)
    except Exception:
        pass
    multi_tc = False
    try:
        kind = jax.devices()[0].device_kind.lower()
        # v4 and v7x have 2 TensorCores sharing the ("parallel",) grid axis.
        multi_tc = ("7" in kind) or ("v4" in kind)
    except Exception:
        pass
    # Leave headroom below physical capacity for Mosaic internal scratch,
    # then size the tiling budget a bit below the compiler limit.
    vmem_limit = max(32 << 20, min(vmem_cap - (16 << 20), 104 << 20))
    budget = max(16 << 20, vmem_limit - (6 << 20))
    return vmem_limit, budget, multi_tc


def _choose_block_bh(bh, height, width, d, filter_n, kh, kw, itemsize,
                     vmem_budget_bytes, multi_tc):
    """Largest bh-tile whose PHYSICAL (lane/sublane padded) double-buffered
    footprint fits the budget.  On multi-TC chips keep >= 2 grid steps and
    prefer an even step count so both TensorCores get equal work."""
    lane = 128
    sub = {4: 8, 2: 16, 1: 32}.get(itemsize, 8)

    def rup(v, m):
        return ((v + m - 1) // m) * m

    in_phys = height * rup(width, sub) * rup(d, lane) * itemsize
    out_phys = height * rup(width, sub) * rup(filter_n * d, lane) * itemsize
    pad_phys = (height + kh - 1) * rup(width + kw - 1, sub) * rup(d, lane) * itemsize
    # double-buffered in/out pipeline tiles + persistent scratch + temp headroom
    per_map = 2 * (in_phys + out_phys) + pad_phys + in_phys
    max_tb = max(1, vmem_budget_bytes // per_map)

    min_steps = 2 if (multi_tc and bh >= 2) else 1
    for steps in range(min_steps, bh + 1):
        tb = -(-bh // steps)  # cdiv
        if tb > max_tb:
            continue
        actual = -(-bh // tb)
        if multi_tc and actual > 1 and actual % 2 == 1:
            continue  # prefer an even split across the two TensorCores
        return tb
    return max(1, min(bh, max_tb))


def localize_attention(x, height, width, neighbourhood_size=(3, 3)):
    """x: (b, heads, height*width, d)  ->  (b, heads, height*width, filter_n, d)"""
    b, h, n, d = x.shape
    assert n == height * width
    kh, kw = neighbourhood_size
    filter_n = kh * kw
    bh = b * h

    x_k = x.reshape(bh, height, width, d)

    vmem_limit, vmem_budget, multi_tc = _tpu_vmem_plan()
    tb = _choose_block_bh(bh, height, width, d, filter_n, kh, kw,
                          x.dtype.itemsize, vmem_budget, multi_tc)
    grid = pl.cdiv(bh, tb)
    kernel = _make_localize_kernel(tb, height, width, kh, kw, d)

    out = pl.pallas_call(
        kernel,
        out_shape=jax.ShapeDtypeStruct((bh, height, width, filter_n * d), x.dtype),
        grid=(grid,),
        in_specs=[pl.BlockSpec((tb, height, width, d), lambda i: (i, 0, 0, 0))],
        out_specs=pl.BlockSpec((tb, height, width, filter_n * d),
                               lambda i: (i, 0, 0, 0)),
        scratch_shapes=[pltpu.VMEM((tb, height + kh - 1, width + kw - 1, d),
                                   x.dtype)],
        compiler_params=pltpu.CompilerParams(
            dimension_semantics=("parallel",),
            vmem_limit_bytes=int(vmem_limit),
        ),
    )(x_k)

    return out.reshape(b, h, height * width, filter_n, d)


def localize_attention_ref(x, height, width, neighbourhood_size=(3, 3)):
    """Pure-JAX reference (same shift semantics as the impulse conv)."""
    b, h, n, d = x.shape
    kh, kw = neighbourhood_size
    pad_h = (kh - 1) // 2
    pad_w = (kw - 1) // 2
    xs = x.reshape(b, h, height, width, d)
    xp = jnp.pad(xs, ((0, 0), (0, 0),
                      (pad_h, kh - 1 - pad_h),
                      (pad_w, kw - 1 - pad_w),
                      (0, 0)))
    outs = []
    for fi in range(kh):
        for fj in range(kw):
            outs.append(xp[:, :, fi:fi + height, fj:fj + width, :])
    out = jnp.stack(outs, axis=-2)  # (b, h, H, W, filter_n, d)
    return out.reshape(b, h, height * width, kh * kw, d)


if __name__ == "__main__":
    key = jax.random.PRNGKey(0)

    # Case 1: batch=2, heads=4, spatial 8x8 (seq=64), d=32, 3x3 neighbourhood.
    b, heads, height, width, d = 2, 4, 8, 8, 32
    neighbourhood = (3, 3)
    attn_filters = neighbourhood_filters(neighbourhood)  # parameters of __init__
    assert attn_filters.shape == (neighbourhood[0] * neighbourhood[1],) + neighbourhood

    k1, k2 = jax.random.split(key)
    x = jax.random.normal(k1, (b, heads, height * width, d), dtype=jnp.float32)
    out = jax.block_until_ready(localize_attention(x, height, width, neighbourhood))
    ref = localize_attention_ref(x, height, width, neighbourhood)
    np.testing.assert_allclose(np.asarray(out), np.asarray(ref), rtol=0, atol=0)

    # Case 2: lane-dense d=128, even 2x2 neighbourhood (asymmetric 'same' pad).
    b2, heads2, h2, w2, d2 = 1, 2, 8, 16, 128
    nb2 = (2, 2)
    x2 = jax.random.normal(k2, (b2, heads2, h2 * w2, d2), dtype=jnp.float32)
    out2 = jax.block_until_ready(localize_attention(x2, h2, w2, nb2))
    ref2 = localize_attention_ref(x2, h2, w2, nb2)
    np.testing.assert_allclose(np.asarray(out2), np.asarray(ref2), rtol=0, atol=0)

    print("KERNEL_OK")
</pallas_src>

<mosaic_0001>
module attributes {stable_mosaic.version = 11 : i64} {
  func.func @kernel(%arg0: i32, %arg1: memref<8x8x8x32xf32, #tpu.memory_space<vmem>>, %arg2: memref<8x8x8x288xf32, #tpu.memory_space<vmem>>, %arg3: memref<8x10x10x32xf32, #tpu.memory_space<vmem>>) attributes {dimension_semantics = [#tpu.dimension_semantics<parallel>], iteration_bounds = array<i64: 1>, scalar_prefetch = 0 : i64, scratch_operands = 1 : i64, tpu.core_type = #tpu.core_type<tc>, window_params = [{transform_indices = @transform_0, window_bounds = array<i64: 8, 8, 8, 32>}, {transform_indices = @transform_1, window_bounds = array<i64: 8, 8, 8, 288>}]} {
    %cst = arith.constant 0.000000e+00 : f32
    %0 = vector.broadcast %cst : f32 to vector<8x1x10x32xf32>
    %c0 = arith.constant 0 : index
    %c0_0 = arith.constant 0 : index
    %c0_1 = arith.constant 0 : index
    %c0_2 = arith.constant 0 : index
    %1 = vector.load %arg3[%c0, %c0_0, %c0_1, %c0_2] : memref<8x10x10x32xf32, #tpu.memory_space<vmem>>, vector<8x1x10x32xf32>
    tpu.vector_store %arg3[%c0, %c0_0, %c0_1, %c0_2], %0 {strides = array<i32>} : memref<8x10x10x32xf32, #tpu.memory_space<vmem>>, vector<8x1x10x32xf32>,
    %cst_3 = arith.constant 0.000000e+00 : f32
    %2 = vector.broadcast %cst_3 : f32 to vector<8x1x10x32xf32>
    %c0_4 = arith.constant 0 : index
    %c9 = arith.constant 9 : index
    %c0_5 = arith.constant 0 : index
    %c0_6 = arith.constant 0 : index
    %3 = vector.load %arg3[%c0_4, %c9, %c0_5, %c0_6] : memref<8x10x10x32xf32, #tpu.memory_space<vmem>>, vector<8x1x10x32xf32>
    tpu.vector_store %arg3[%c0_4, %c9, %c0_5, %c0_6], %2 {strides = array<i32>} : memref<8x10x10x32xf32, #tpu.memory_space<vmem>>, vector<8x1x10x32xf32>,
    %cst_7 = arith.constant 0.000000e+00 : f32
    %4 = vector.broadcast %cst_7 : f32 to vector<8x10x1x32xf32>
    %c0_8 = arith.constant 0 : index
    %c0_9 = arith.constant 0 : index
    %c0_10 = arith.constant 0 : index
    %c0_11 = arith.constant 0 : index
    %5 = vector.load %arg3[%c0_8, %c0_9, %c0_10, %c0_11] : memref<8x10x10x32xf32, #tpu.memory_space<vmem>>, vector<8x10x1x32xf32>
    tpu.vector_store %arg3[%c0_8, %c0_9, %c0_10, %c0_11], %4 {strides = array<i32>} : memref<8x10x10x32xf32, #tpu.memory_space<vmem>>, vector<8x10x1x32xf32>,
    %cst_12 = arith.constant 0.000000e+00 : f32
    %6 = vector.broadcast %cst_12 : f32 to vector<8x10x1x32xf32>
    %c0_13 = arith.constant 0 : index
    %c0_14 = arith.constant 0 : index
    %c9_15 = arith.constant 9 : index
    %c0_16 = arith.constant 0 : index
    %7 = vector.load %arg3[%c0_13, %c0_14, %c9_15, %c0_16] : memref<8x10x10x32xf32, #tpu.memory_space<vmem>>, vector<8x10x1x32xf32>
    tpu.vector_store %arg3[%c0_13, %c0_14, %c9_15, %c0_16], %6 {strides = array<i32>} : memref<8x10x10x32xf32, #tpu.memory_space<vmem>>, vector<8x10x1x32xf32>,
    %c0_17 = arith.constant 0 : index
    %c0_18 = arith.constant 0 : index
    %c0_19 = arith.constant 0 : index
    %c0_20 = arith.constant 0 : index
    %8 = vector.load %arg1[%c0_17, %c0_18, %c0_19, %c0_20] : memref<8x8x8x32xf32, #tpu.memory_space<vmem>>, vector<8x8x8x32xf32>
    %c0_21 = arith.constant 0 : index
    %c1 = arith.constant 1 : index
    %c1_22 = arith.constant 1 : index
    %c0_23 = arith.constant 0 : index
    %9 = vector.load %arg3[%c0_21, %c1, %c1_22, %c0_23] : memref<8x10x10x32xf32, #tpu.memory_space<vmem>>, vector<8x8x8x32xf32>
    tpu.vector_store %arg3[%c0_21, %c1, %c1_22, %c0_23], %8 {strides = array<i32>} : memref<8x10x10x32xf32, #tpu.memory_space<vmem>>, vector<8x8x8x32xf32>,
    %c0_24 = arith.constant 0 : index
    %c0_25 = arith.constant 0 : index
    %c0_26 = arith.constant 0 : index
    %c0_27 = arith.constant 0 : index
    %10 = vector.load %arg3[%c0_24, %c0_25, %c0_26, %c0_27] : memref<8x10x10x32xf32, #tpu.memory_space<vmem>>, vector<8x8x8x32xf32>
    %c0_28 = arith.constant 0 : index
    %c0_29 = arith.constant 0 : index
    %c0_30 = arith.constant 0 : index
    %c0_31 = arith.constant 0 : index
    %11 = vector.load %arg2[%c0_28, %c0_29, %c0_30, %c0_31] : memref<8x8x8x288xf32, #tpu.memory_space<vmem>>, vector<8x8x8x32xf32>
    tpu.vector_store %arg2[%c0_28, %c0_29, %c0_30, %c0_31], %10 {strides = array<i32>} : memref<8x8x8x288xf32, #tpu.memory_space<vmem>>, vector<8x8x8x32xf32>,
    %c0_32 = arith.constant 0 : index
    %c0_33 = arith.constant 0 : index
    %c1_34 = arith.constant 1 : index
    %c0_35 = arith.constant 0 : index
    %12 = vector.load %arg3[%c0_32, %c0_33, %c1_34, %c0_35] : memref<8x10x10x32xf32, #tpu.memory_space<vmem>>, vector<8x8x8x32xf32>
    %c0_36 = arith.constant 0 : index
    %c0_37 = arith.constant 0 : index
    %c0_38 = arith.constant 0 : index
    %c32 = arith.constant 32 : index
    %13 = vector.load %arg2[%c0_36, %c0_37, %c0_38, %c32] : memref<8x8x8x288xf32, #tpu.memory_space<vmem>>, vector<8x8x8x32xf32>
    tpu.vector_store %arg2[%c0_36, %c0_37, %c0_38, %c32], %12 {strides = array<i32>} : memref<8x8x8x288xf32, #tpu.memory_space<vmem>>, vector<8x8x8x32xf32>,
    %c0_39 = arith.constant 0 : index
    %c0_40 = arith.constant 0 : index
    %c2 = arith.constant 2 : index
    %c0_41 = arith.constant 0 : index
    %14 = vector.load %arg3[%c0_39, %c0_40, %c2, %c0_41] : memref<8x10x10x32xf32, #tpu.memory_space<vmem>>, vector<8x8x8x32xf32>
    %c0_42 = arith.constant 0 : index
    %c0_43 = arith.constant 0 : index
    %c0_44 = arith.constant 0 : index
    %c64 = arith.constant 64 : index
    %15 = vector.load %arg2[%c0_42, %c0_43, %c0_44, %c64] : memref<8x8x8x288xf32, #tpu.memory_space<vmem>>, vector<8x8x8x32xf32>
    tpu.vector_store %arg2[%c0_42, %c0_43, %c0_44, %c64], %14 {strides = array<i32>} : memref<8x8x8x288xf32, #tpu.memory_space<vmem>>, vector<8x8x8x32xf32>,
    %c0_45 = arith.constant 0 : index
    %c1_46 = arith.constant 1 : index
    %c0_47 = arith.constant 0 : index
    %c0_48 = arith.constant 0 : index
    %16 = vector.load %arg3[%c0_45, %c1_46, %c0_47, %c0_48] : memref<8x10x10x32xf32, #tpu.memory_space<vmem>>, vector<8x8x8x32xf32>
    %c0_49 = arith.constant 0 : index
    %c0_50 = arith.constant 0 : index
    %c0_51 = arith.constant 0 : index
    %c96 = arith.constant 96 : index
    %17 = vector.load %arg2[%c0_49, %c0_50, %c0_51, %c96] : memref<8x8x8x288xf32, #tpu.memory_space<vmem>>, vector<8x8x8x32xf32>
    tpu.vector_store %arg2[%c0_49, %c0_50, %c0_51, %c96], %16 {strides = array<i32>} : memref<8x8x8x288xf32, #tpu.memory_space<vmem>>, vector<8x8x8x32xf32>,
    %c0_52 = arith.constant 0 : index
    %c1_53 = arith.constant 1 : index
    %c1_54 = arith.constant 1 : index
    %c0_55 = arith.constant 0 : index
    %18 = vector.load %arg3[%c0_52, %c1_53, %c1_54, %c0_55] : memref<8x10x10x32xf32, #tpu.memory_space<vmem>>, vector<8x8x8x32xf32>
    %c0_56 = arith.constant 0 : index
    %c0_57 = arith.constant 0 : index
    %c0_58 = arith.constant 0 : index
    %c128 = arith.constant 128 : index
    %19 = vector.load %arg2[%c0_56, %c0_57, %c0_58, %c128] : memref<8x8x8x288xf32, #tpu.memory_space<vmem>>, vector<8x8x8x32xf32>
    tpu.vector_store %arg2[%c0_56, %c0_57, %c0_58, %c128], %18 {strides = array<i32>} : memref<8x8x8x288xf32, #tpu.memory_space<vmem>>, vector<8x8x8x32xf32>,
    %c0_59 = arith.constant 0 : index
    %c1_60 = arith.constant 1 : index
    %c2_61 = arith.constant 2 : index
    %c0_62 = arith.constant 0 : index
    %20 = vector.load %arg3[%c0_59, %c1_60, %c2_61, %c0_62] : memref<8x10x10x32xf32, #tpu.memory_space<vmem>>, vector<8x8x8x32xf32>
    %c0_63 = arith.constant 0 : index
    %c0_64 = arith.constant 0 : index
    %c0_65 = arith.constant 0 : index
    %c160 = arith.constant 160 : index
    %21 = vector.load %arg2[%c0_63, %c0_64, %c0_65, %c160] : memref<8x8x8x288xf32, #tpu.memory_space<vmem>>, vector<8x8x8x32xf32>
    tpu.vector_store %arg2[%c0_63, %c0_64, %c0_65, %c160], %20 {strides = array<i32>} : memref<8x8x8x288xf32, #tpu.memory_space<vmem>>, vector<8x8x8x32xf32>,
    %c0_66 = arith.constant 0 : index
    %c2_67 = arith.constant 2 : index
    %c0_68 = arith.constant 0 : index
    %c0_69 = arith.constant 0 : index
    %22 = vector.load %arg3[%c0_66, %c2_67, %c0_68, %c0_69] : memref<8x10x10x32xf32, #tpu.memory_space<vmem>>, vector<8x8x8x32xf32>
    %c0_70 = arith.constant 0 : index
    %c0_71 = arith.constant 0 : index
    %c0_72 = arith.constant 0 : index
    %c192 = arith.constant 192 : index
    %23 = vector.load %arg2[%c0_70, %c0_71, %c0_72, %c192] : memref<8x8x8x288xf32, #tpu.memory_space<vmem>>, vector<8x8x8x32xf32>
    tpu.vector_store %arg2[%c0_70, %c0_71, %c0_72, %c192], %22 {strides = array<i32>} : memref<8x8x8x288xf32, #tpu.memory_space<vmem>>, vector<8x8x8x32xf32>,
    %c0_73 = arith.constant 0 : index
    %c2_74 = arith.constant 2 : index
    %c1_75 = arith.constant 1 : index
    %c0_76 = arith.constant 0 : index
    %24 = vector.load %arg3[%c0_73, %c2_74, %c1_75, %c0_76] : memref<8x10x10x32xf32, #tpu.memory_space<vmem>>, vector<8x8x8x32xf32>
    %c0_77 = arith.constant 0 : index
    %c0_78 = arith.constant 0 : index
    %c0_79 = arith.constant 0 : index
    %c224 = arith.constant 224 : index
    %25 = vector.load %arg2[%c0_77, %c0_78, %c0_79, %c224] : memref<8x8x8x288xf32, #tpu.memory_space<vmem>>, vector<8x8x8x32xf32>
    tpu.vector_store %arg2[%c0_77, %c0_78, %c0_79, %c224], %24 {strides = array<i32>} : memref<8x8x8x288xf32, #tpu.memory_space<vmem>>, vector<8x8x8x32xf32>,
    %c0_80 = arith.constant 0 : index
    %c2_81 = arith.constant 2 : index
    %c2_82 = arith.constant 2 : index
    %c0_83 = arith.constant 0 : index
    %26 = vector.load %arg3[%c0_80, %c2_81, %c2_82, %c0_83] : memref<8x10x10x32xf32, #tpu.memory_space<vmem>>, vector<8x8x8x32xf32>
    %c0_84 = arith.constant 0 : index
    %c0_85 = arith.constant 0 : index
    %c0_86 = arith.constant 0 : index
    %c256 = arith.constant 256 : index
    %27 = vector.load %arg2[%c0_84, %c0_85, %c0_86, %c256] : memref<8x8x8x288xf32, #tpu.memory_space<vmem>>, vector<8x8x8x32xf32>
    tpu.vector_store %arg2[%c0_84, %c0_85, %c0_86, %c256], %26 {strides = array<i32>} : memref<8x8x8x288xf32, #tpu.memory_space<vmem>>, vector<8x8x8x32xf32>,
    return
  }
  func.func @transform_0(%arg0: i32) -> (i32, i32, i32, i32) {
    %c0_i32 = arith.constant 0 : i32
    %c0_i32_0 = arith.constant 0 : i32
    %c0_i32_1 = arith.constant 0 : i32
    %c0_i32_2 = arith.constant 0 : i32
    return %arg0, %c0_i32, %c0_i32_0, %c0_i32_1 : i32, i32, i32, i32
  }
  func.func @transform_1(%arg0: i32) -> (i32, i32, i32, i32) {
    %c0_i32 = arith.constant 0 : i32
    %c0_i32_0 = arith.constant 0 : i32
    %c0_i32_1 = arith.constant 0 : i32
    %c0_i32_2 = arith.constant 0 : i32
    return %arg0, %c0_i32, %c0_i32_0, %c0_i32_1 : i32, i32, i32, i32
  }
}

</mosaic_0001>

<bundles_post_ra>
// kernel: tpu_custom_call.1
= control target key start
LH: loop header
LB: loop body
LE: loop exit
PB: predicated region body
PF: predicated region fallthrough
CT: control target
= control target key end

     0   :  { %6 = vsyncpa [#allocation4], 0  ;;  %s4953_s0 = inlined_call_operand.hbm [shape: f32[8,8,8,32], index: 0, kind: input, shape index: {}]   ;;  %s4954_s1 = inlined_call_operand.hbm [shape: f32[8,8,8,288], index: 1, kind: output, shape index: {}]  }
   0x1   :  { %7 = vsyncpa [#allocation5], 0  ;;  %s12_s8 = sshll.u32 %s4953_s0, 4  ;;  %s3123_s9 = smov [#allocation3]   ;;  %s13_s8 = int_to_ptr.hbm [resolvable:$true] %s12_s8 }
   0x2   :  { %s14_s10 = sshll.u32 %s3123_s9, 4  ;;  %s3124_s11 = smov 128   ;;  %s15_s10 = int_to_ptr.vmem [resolvable:$true] %s14_s10 }
   0x3   :  { %s3125_s12 = smov 8  }
   0x4   :  { %20 = dma.hbm_to_vmem [thread:$0]  %s13_s8, 8192, %s15_s10, [#allocation4], %s3124_s11, %s3124_s11, %s3125_s12  }
   0x5   :  { %3119 = dma.done.wait [#allocation4], 8192  }
   0x6   :  { %3120 = vsyncadd [#allocation4], 4294959104  ;;  %vm25_vm0 = vcmask 261120   ;;  %vm27_vm1 = vcmask 254976   ;;  %v3126_v0 = vmov 0.0   ;;  %vm60_vm2 = vcmask 253952  }
   0x7   :  { %26 = vst.msk [vmem:[#allocation2] sm:$0xff] %vm25_vm0, %v3126_v0  ;;  %v222_v1 = vld [vmem:[#allocation3 + $0x8] sm:$0xff]  ;;  %s3127_s0 = smov 32   ;;  %v223_v4 = vld [vmem:[#allocation3 + $0x10] sm:$0xff]  ;;  %v221_v7 = vld [vmem:[#allocation3] sm:$0xff]  ;;  %vm798_vm3 = vcmask 523520  }
   0x8   :  { %28 = vst.msk [vmem:[#allocation2 + $0x8] sm:$0x3] %vm27_vm1, %v3126_v0  ;;  %v227_v8 = vld [vmem:[#allocation3 + $0x30] sm:$0xff]  ;;  %v226_v9 = vld [vmem:[#allocation3 + $0x28] sm:$0xff]  ;;  %v229_v11 = vld [vmem:[#allocation3 + $0x40] sm:$0xff]  ;;  %s3128_s13 = smov 64  }
   0x9   :  { %61 = vst.msk [vmem:[#allocation2] sm:$0x1] %vm60_vm2, %v3126_v0  ;;  %v230_v10 = vld [vmem:[#allocation3 + $0x48] sm:$0xff]  ;;  %v233_v12 = vld [vmem:[#allocation3 + $0x60] sm:$0xff]  ;;  %v224_v13 = vld [vmem:[#allocation3 + $0x18] sm:$0xff]  ;;  %vm1183_vm4 = vcmask 785920  }
   0xa   :  { %29 = vst.msk [vmem:[#allocation2 + $0xa0] sm:$0xff] %vm25_vm0, %v3126_v0  ;;  %v232_v14 = vld [vmem:[#allocation3 + $0x58] sm:$0xff]  ;;  %v225_v15 = vld [vmem:[#allocation3 + $0x20] sm:$0xff]  ;;  %v235_v16 = vld [vmem:[#allocation3 + $0x70] sm:$0xff]  ;;  %s3129_s14 = smov 96   ;;  %vm1568_vm5 = vcmask 1048320  }
   0xb   :  { %30 = vst.msk [vmem:[#allocation2 + $0xa8] sm:$0x3] %vm27_vm1, %v3126_v0  ;;  %v239_v18 = vld [vmem:[#allocation3 + $0x90] sm:$0xff]  ;;  %v238_v21 = vld [vmem:[#allocation3 + $0x88] sm:$0xff]  ;;  %v241_v27 = vld [vmem:[#allocation3 + $0xa0] sm:$0xff]  ;;  %s3130_s15 = smov [#allocation6]  }
   0xc   :  { %31 = vst.msk [vmem:[#allocation2 + $0x140] sm:$0xff] %vm25_vm0, %v3126_v0  ;;  %v231_v20 = vld [vmem:[#allocation3 + $0x50] sm:$0xff]  ;;  %v242_v25 = vld [vmem:[#allocation3 + $0xa8] sm:$0xff]  ;;  %v245_v31 = vld [vmem:[#allocation3 + $0xc0] sm:$0xff]  ;;  %s3046_s16 = sshll.u32 %s3130_s15, 4  ;;  %s3048_s19 = sshll.u32 %s4954_s1, 4  ;;  %s3047_s16 = int_to_ptr.vmem [resolvable:$true] %s3046_s16  ;;  %s3049_s19 = int_to_ptr.hbm [resolvable:$true] %s3048_s19 }
   0xd   :  { %32 = vst.msk [vmem:[#allocation2 + $0x148] sm:$0x3] %vm27_vm1, %v3126_v0  ;;  %v234_v26 = vld [vmem:[#allocation3 + $0x68] sm:$0xff]  ;;  %v237_v32 = vld [vmem:[#allocation3 + $0x80] sm:$0xff]  ;;  %v248_v36 = vld [vmem:[#allocation3 + $0xd8] sm:$0xff]  ;;  %s3131_s20 = smov 384  }
   0xe   :  { %287 = vst.msk [vmem:[#allocation2 + $0x21] sm:$0xff] %vm25_vm0, %v222_v1  ;;  %v240_v37 = vld [vmem:[#allocation3 + $0x98] sm:$0xff]  ;;  %v247_v38 = vld [vmem:[#allocation3 + $0xd0] sm:$0xff]  ;;  %v250_v44 = vld [vmem:[#allocation3 + $0xe8] sm:$0xff]  ;;  %s3132_s21 = smov 24  }
   0xf   :  { %v478_v2 = vld [vmem:[#allocation2 + $0x1] sm:$0xff]  ;;  %33 = vst.msk [vmem:[#allocation2 + $0x1e0] sm:$0xff] %vm25_vm0, %v3126_v0  ;;  %v251_v42 = vld [vmem:[#allocation3 + $0xf0] sm:$0xff]  ;;  %v256_v56 = vld [vmem:[#allocation3 + $0x118] sm:$0xff] }
  0x10   :  { %606 = vrot.lane.b32.xlu0 %v478_v2, %s3127_s0  ;;  %34 = vst.msk [vmem:[#allocation2 + $0x1e8] sm:$0x3] %vm27_vm1, %v3126_v0  ;;  %v243_v43 = vld [vmem:[#allocation3 + $0xb0] sm:$0xff]  ;;  %v254_v48 = vld [vmem:[#allocation3 + $0x108] sm:$0xff]  ;;  %v253_v50 = vld [vmem:[#allocation3 + $0x100] sm:$0xff] }
  0x11   :  { %35 = vst.msk [vmem:[#allocation2 + $0x280] sm:$0xff] %vm25_vm0, %v3126_v0  ;;  %v246_v49 = vld [vmem:[#allocation3 + $0xc8] sm:$0xff]  ;;  %v257_v54 = vld [vmem:[#allocation3 + $0x120] sm:$0xff]  ;;  %v259_v60 = vld [vmem:[#allocation3 + $0x130] sm:$0xff] }
  0x12   :  { %36 = vst.msk [vmem:[#allocation2 + $0x288] sm:$0x3] %vm27_vm1, %v3126_v0  ;;  %v486_v6 = vld [vmem:[#allocation2 + $0xa1] sm:$0xff]  ;;  %v255_v1 = vld [vmem:[#allocation3 + $0x110] sm:$0xff] }
  0x13   :  { %37 = vst.msk [vmem:[#allocation2 + $0x320] sm:$0xff] %vm25_vm0, %v3126_v0  ;;  %622 = vrot.lane.b32.xlu2 %v486_v6, %s3127_s0  ;;  %v249_v55 = vld [vmem:[#allocation3 + $0xe0] sm:$0xff]  ;;  %v262_v2 = vld [vmem:[#allocation3 + $0x148] sm:$0xff] }
  0x14   :  { %38 = vst.msk [vmem:[#allocation2 + $0x328] sm:$0x3] %vm27_vm1, %v3126_v0  ;;  %v494_v35 = vld [vmem:[#allocation2 + $0x141] sm:$0xff] }
  0x15   :  { %v480_v3 = vld [vmem:[#allocation2 + $0x21] sm:$0xff]  ;;  %39 = vst.msk [vmem:[#allocation2 + $0x3c0] sm:$0xff] %vm25_vm0, %v3126_v0 }
  0x16   :  { %610 = vrot.lane.b32.xlu1 %v480_v3, %s3127_s0  ;;  %40 = vst.msk [vmem:[#allocation2 + $0x3c8] sm:$0x3] %vm27_vm1, %v3126_v0  ;;  %v266_v6 = vld [vmem:[#allocation3 + $0x168] sm:$0xff] }
  0x17   :  { %41 = vst.msk [vmem:[#allocation2 + $0x460] sm:$0xff] %vm25_vm0, %v3126_v0  ;;  %v502_v58 = vld [vmem:[#allocation2 + $0x1e1] sm:$0xff] }
  0x18   :  { %42 = vst.msk [vmem:[#allocation2 + $0x468] sm:$0x3] %vm27_vm1, %v3126_v0 }
  0x19   :  { %44 = vst.msk [vmem:[#allocation2 + $0x90] sm:$0xff] %vm25_vm0, %v3126_v0 }
  0x1a   :  { %45 = vst.msk [vmem:[#allocation2 + $0x98] sm:$0x3] %vm27_vm1, %v3126_v0 }
  0x1b   :  { %46 = vst.msk [vmem:[#allocation2 + $0x130] sm:$0xff] %vm25_vm0, %v3126_v0 }
  0x1c   :  { %47 = vst.msk [vmem:[#allocation2 + $0x138] sm:$0x3] %vm27_vm1, %v3126_v0 }
  0x1d   :  { %48 = vst.msk [vmem:[#allocation2 + $0x1d0] sm:$0xff] %vm25_vm0, %v3126_v0 }
  0x1e   :  { %49 = vst.msk [vmem:[#allocation2 + $0x1d8] sm:$0x3] %vm27_vm1, %v3126_v0 }
  0x1f   :  { %50 = vst.msk [vmem:[#allocation2 + $0x270] sm:$0xff] %vm25_vm0, %v3126_v0 }
  0x20   :  { %51 = vst.msk [vmem:[#allocation2 + $0x278] sm:$0x3] %vm27_vm1, %v3126_v0 }
  0x21   :  { %52 = vst.msk [vmem:[#allocation2 + $0x310] sm:$0xff] %vm25_vm0, %v3126_v0 }
  0x22   :  { %53 = vst.msk [vmem:[#allocation2 + $0x318] sm:$0x3] %vm27_vm1, %v3126_v0 }
  0x23   :  { %54 = vst.msk [vmem:[#allocation2 + $0x3b0] sm:$0xff] %vm25_vm0, %v3126_v0 }
  0x24   :  { %55 = vst.msk [vmem:[#allocation2 + $0x3b8] sm:$0x3] %vm27_vm1, %v3126_v0 }
  0x25   :  { %56 = vst.msk [vmem:[#allocation2 + $0x450] sm:$0xff] %vm25_vm0, %v3126_v0 }
  0x26   :  { %57 = vst.msk [vmem:[#allocation2 + $0x458] sm:$0x3] %vm27_vm1, %v3126_v0 }
  0x27   :  { %58 = vst.msk [vmem:[#allocation2 + $0x4f0] sm:$0xff] %vm25_vm0, %v3126_v0 }
  0x28   :  { %59 = vst.msk [vmem:[#allocation2 + $0x4f8] sm:$0x3] %vm27_vm1, %v3126_v0 }
  0x29   :  { %62 = vst.msk [vmem:[#allocation2 + $0x10] sm:$0x1] %vm60_vm2, %v3126_v0 }
  0x2a   :  { %63 = vst.msk [vmem:[#allocation2 + $0x20] sm:$0x1] %vm60_vm2, %v3126_v0 }
  0x2b   :  { %64 = vst.msk [vmem:[#allocation2 + $0x30] sm:$0x1] %vm60_vm2, %v3126_v0 }
  0x2c   :  { %65 = vst.msk [vmem:[#allocation2 + $0x40] sm:$0x1] %vm60_vm2, %v3126_v0 }
  0x2d   :  { %66 = vst.msk [vmem:[#allocation2 + $0x50] sm:$0x1] %vm60_vm2, %v3126_v0 }
  0x2e   :  { %67 = vst.msk [vmem:[#allocation2 + $0x60] sm:$0x1] %vm60_vm2, %v3126_v0 }
  0x2f   :  { %68 = vst.msk [vmem:[#allocation2 + $0x70] sm:$0x1] %vm60_vm2, %v3126_v0 }
  0x30   :  { %69 = vst.msk [vmem:[#allocation2 + $0x80] sm:$0x1] %vm60_vm2, %v3126_v0 }
  0x31   :  { %72 = vst.msk [vmem:[#allocation2 + $0xb0] sm:$0x1] %vm60_vm2, %v3126_v0 }
  0x32   :  { %73 = vst.msk [vmem:[#allocation2 + $0xc0] sm:$0x1] %vm60_vm2, %v3126_v0 }
  0x33   :  { %74 = vst.msk [vmem:[#allocation2 + $0xd0] sm:$0x1] %vm60_vm2, %v3126_v0 }
  0x34   :  { %75 = vst.msk [vmem:[#allocation2 + $0xe0] sm:$0x1] %vm60_vm2, %v3126_v0 }
  0x35   :  { %76 = vst.msk [vmem:[#allocation2 + $0xf0] sm:$0x1] %vm60_vm2, %v3126_v0 }
  0x36   :  { %77 = vst.msk [vmem:[#allocation2 + $0x100] sm:$0x1] %vm60_vm2, %v3126_v0 }
  0x37   :  { %78 = vst.msk [vmem:[#allocation2 + $0x110] sm:$0x1] %vm60_vm2, %v3126_v0 }
  0x38   :  { %79 = vst.msk [vmem:[#allocation2 + $0x120] sm:$0x1] %vm60_vm2, %v3126_v0 }
  0x39   :  { %82 = vst.msk [vmem:[#allocation2 + $0x150] sm:$0x1] %vm60_vm2, %v3126_v0 }
  0x3a   :  { %83 = vst.msk [vmem:[#allocation2 + $0x160] sm:$0x1] %vm60_vm2, %v3126_v0 }
  0x3b   :  { %84 = vst.msk [vmem:[#allocation2 + $0x170] sm:$0x1] %vm60_vm2, %v3126_v0 }
  0x3c   :  { %85 = vst.msk [vmem:[#allocation2 + $0x180] sm:$0x1] %vm60_vm2, %v3126_v0 }
  0x3d   :  { %86 = vst.msk [vmem:[#allocation2 + $0x190] sm:$0x1] %vm60_vm2, %v3126_v0 }
  0x3e   :  { %87 = vst.msk [vmem:[#allocation2 + $0x1a0] sm:$0x1] %vm60_vm2, %v3126_v0 }
  0x3f   :  { %88 = vst.msk [vmem:[#allocation2 + $0x1b0] sm:$0x1] %vm60_vm2, %v3126_v0 }
  0x40   :  { %89 = vst.msk [vmem:[#allocation2 + $0x1c0] sm:$0x1] %vm60_vm2, %v3126_v0 }
  0x41   :  { %92 = vst.msk [vmem:[#allocation2 + $0x1f0] sm:$0x1] %vm60_vm2, %v3126_v0 }
  0x42   :  { %93 = vst.msk [vmem:[#allocation2 + $0x200] sm:$0x1] %vm60_vm2, %v3126_v0 }
  0x43   :  { %94 = vst.msk [vmem:[#allocation2 + $0x210] sm:$0x1] %vm60_vm2, %v3126_v0 }
  0x44   :  { %95 = vst.msk [vmem:[#allocation2 + $0x220] sm:$0x1] %vm60_vm2, %v3126_v0 }
  0x45   :  { %96 = vst.msk [vmem:[#allocation2 + $0x230] sm:$0x1] %vm60_vm2, %v3126_v0 }
  0x46   :  { %97 = vst.msk [vmem:[#allocation2 + $0x240] sm:$0x1] %vm60_vm2, %v3126_v0 }
  0x47   :  { %98 = vst.msk [vmem:[#allocation2 + $0x250] sm:$0x1] %vm60_vm2, %v3126_v0 }
  0x48   :  { %99 = vst.msk [vmem:[#allocation2 + $0x260] sm:$0x1] %vm60_vm2, %v3126_v0 }
  0x49   :  { %102 = vst.msk [vmem:[#allocation2 + $0x290] sm:$0x1] %vm60_vm2, %v3126_v0 }
  0x4a   :  { %103 = vst.msk [vmem:[#allocation2 + $0x2a0] sm:$0x1] %vm60_vm2, %v3126_v0 }
  0x4b   :  { %104 = vst.msk [vmem:[#allocation2 + $0x2b0] sm:$0x1] %vm60_vm2, %v3126_v0 }
  0x4c   :  { %105 = vst.msk [vmem:[#allocation2 + $0x2c0] sm:$0x1] %vm60_vm2, %v3126_v0 }
  0x4d   :  { %106 = vst.msk [vmem:[#allocation2 + $0x2d0] sm:$0x1] %vm60_vm2, %v3126_v0 }
  0x4e   :  { %107 = vst.msk [vmem:[#allocation2 + $0x2e0] sm:$0x1] %vm60_vm2, %v3126_v0 }
  0x4f   :  { %108 = vst.msk [vmem:[#allocation2 + $0x2f0] sm:$0x1] %vm60_vm2, %v3126_v0 }
  0x50   :  { %109 = vst.msk [vmem:[#allocation2 + $0x300] sm:$0x1] %vm60_vm2, %v3126_v0 }
  0x51   :  { %112 = vst.msk [vmem:[#allocation2 + $0x330] sm:$0x1] %vm60_vm2, %v3126_v0 }
  0x52   :  { %113 = vst.msk [vmem:[#allocation2 + $0x340] sm:$0x1] %vm60_vm2, %v3126_v0 }
  0x53   :  { %114 = vst.msk [vmem:[#allocation2 + $0x350] sm:$0x1] %vm60_vm2, %v3126_v0 }
  0x54   :  { %115 = vst.msk [vmem:[#allocation2 + $0x360] sm:$0x1] %vm60_vm2, %v3126_v0 }
  0x55   :  { %116 = vst.msk [vmem:[#allocation2 + $0x370] sm:$0x1] %vm60_vm2, %v3126_v0 }
  0x56   :  { %117 = vst.msk [vmem:[#allocation2 + $0x380] sm:$0x1] %vm60_vm2, %v3126_v0 }
  0x57   :  { %118 = vst.msk [vmem:[#allocation2 + $0x390] sm:$0x1] %vm60_vm2, %v3126_v0 }
  0x58   :  { %119 = vst.msk [vmem:[#allocation2 + $0x3a0] sm:$0x1] %vm60_vm2, %v3126_v0 }
  0x59   :  { %122 = vst.msk [vmem:[#allocation2 + $0x3d0] sm:$0x1] %vm60_vm2, %v3126_v0 }
  0x5a   :  { %123 = vst.msk [vmem:[#allocation2 + $0x3e0] sm:$0x1] %vm60_vm2, %v3126_v0 }
  0x5b   :  { %124 = vst.msk [vmem:[#allocation2 + $0x3f0] sm:$0x1] %vm60_vm2, %v3126_v0 }
  0x5c   :  { %125 = vst.msk [vmem:[#allocation2 + $0x400] sm:$0x1] %vm60_vm2, %v3126_v0 }
  0x5d   :  { %126 = vst.msk [vmem:[#allocation2 + $0x410] sm:$0x1] %vm60_vm2, %v3126_v0 }
  0x5e   :  { %127 = vst.msk [vmem:[#allocation2 + $0x420] sm:$0x1] %vm60_vm2, %v3126_v0 }
  0x5f   :  { %128 = vst.msk [vmem:[#allocation2 + $0x430] sm:$0x1] %vm60_vm2, %v3126_v0 }
  0x60   :  { %129 = vst.msk [vmem:[#allocation2 + $0x440] sm:$0x1] %vm60_vm2, %v3126_v0 }
  0x61   :  { %132 = vst.msk [vmem:[#allocation2 + $0x470] sm:$0x1] %vm60_vm2, %v3126_v0 }
  0x62   :  { %133 = vst.msk [vmem:[#allocation2 + $0x480] sm:$0x1] %vm60_vm2, %v3126_v0 }
  0x63   :  { %134 = vst.msk [vmem:[#allocation2 + $0x490] sm:$0x1] %vm60_vm2, %v3126_v0 }
  0x64   :  { %135 = vst.msk [vmem:[#allocation2 + $0x4a0] sm:$0x1] %vm60_vm2, %v3126_v0 }
  0x65   :  { %136 = vst.msk [vmem:[#allocation2 + $0x4b0] sm:$0x1] %vm60_vm2, %v3126_v0 }
  0x66   :  { %137 = vst.msk [vmem:[#allocation2 + $0x4c0] sm:$0x1] %vm60_vm2, %v3126_v0 }
  0x67   :  { %138 = vst.msk [vmem:[#allocation2 + $0x4d0] sm:$0x1] %vm60_vm2, %v3126_v0 }
  0x68   :  { %139 = vst.msk [vmem:[#allocation2 + $0x4e0] sm:$0x1] %vm60_vm2, %v3126_v0 }
  0x69   :  { %141 = vst.msk [vmem:[#allocation2 + $0x9] sm:$0x1] %vm60_vm2, %v3126_v0 }
  0x6a   :  { %142 = vst.msk [vmem:[#allocation2 + $0x19] sm:$0x1] %vm60_vm2, %v3126_v0 }
  0x6b   :  { %143 = vst.msk [vmem:[#allocation2 + $0x29] sm:$0x1] %vm60_vm2, %v3126_v0 }
  0x6c   :  { %144 = vst.msk [vmem:[#allocation2 + $0x39] sm:$0x1] %vm60_vm2, %v3126_v0 }
  0x6d   :  { %145 = vst.msk [vmem:[#allocation2 + $0x49] sm:$0x1] %vm60_vm2, %v3126_v0 }
  0x6e   :  { %146 = vst.msk [vmem:[#allocation2 + $0x59] sm:$0x1] %vm60_vm2, %v3126_v0 }
  0x6f   :  { %147 = vst.msk [vmem:[#allocation2 + $0x69] sm:$0x1] %vm60_vm2, %v3126_v0 }
  0x70   :  { %148 = vst.msk [vmem:[#allocation2 + $0x79] sm:$0x1] %vm60_vm2, %v3126_v0 }
  0x71   :  { %149 = vst.msk [vmem:[#allocation2 + $0x89] sm:$0x1] %vm60_vm2, %v3126_v0 }
  0x72   :  { %152 = vst.msk [vmem:[#allocation2 + $0xb9] sm:$0x1] %vm60_vm2, %v3126_v0 }
  0x73   :  { %153 = vst.msk [vmem:[#allocation2 + $0xc9] sm:$0x1] %vm60_vm2, %v3126_v0 }
  0x74   :  { %154 = vst.msk [vmem:[#allocation2 + $0xd9] sm:$0x1] %vm60_vm2, %v3126_v0 }
  0x75   :  { %155 = vst.msk [vmem:[#allocation2 + $0xe9] sm:$0x1] %vm60_vm2, %v3126_v0 }
  0x76   :  { %156 = vst.msk [vmem:[#allocation2 + $0xf9] sm:$0x1] %vm60_vm2, %v3126_v0 }
  0x77   :  { %157 = vst.msk [vmem:[#allocation2 + $0x109] sm:$0x1] %vm60_vm2, %v3126_v0 }
  0x78   :  { %158 = vst.msk [vmem:[#allocation2 + $0x119] sm:$0x1] %vm60_vm2, %v3126_v0 }
  0x79   :  { %159 = vst.msk [vmem:[#allocation2 + $0x129] sm:$0x1] %vm60_vm2, %v3126_v0 }
  0x7a   :  { %162 = vst.msk [vmem:[#allocation2 + $0x159] sm:$0x1] %vm60_vm2, %v3126_v0 }
  0x7b   :  { %163 = vst.msk [vmem:[#allocation2 + $0x169] sm:$0x1] %vm60_vm2, %v3126_v0 }
  0x7c   :  { %164 = vst.msk [vmem:[#allocation2 + $0x179] sm:$0x1] %vm60_vm2, %v3126_v0 }
  0x7d   :  { %165 = vst.msk [vmem:[#allocation2 + $0x189] sm:$0x1] %vm60_vm2, %v3126_v0 }
  0x7e   :  { %166 = vst.msk [vmem:[#allocation2 + $0x199] sm:$0x1] %vm60_vm2, %v3126_v0 }
  0x7f   :  { %167 = vst.msk [vmem:[#allocation2 + $0x1a9] sm:$0x1] %vm60_vm2, %v3126_v0 }
  0x80   :  { %168 = vst.msk [vmem:[#allocation2 + $0x1b9] sm:$0x1] %vm60_vm2, %v3126_v0 }
  0x81   :  { %169 = vst.msk [vmem:[#allocation2 + $0x1c9] sm:$0x1] %vm60_vm2, %v3126_v0 }
  0x82   :  { %172 = vst.msk [vmem:[#allocation2 + $0x1f9] sm:$0x1] %vm60_vm2, %v3126_v0 }
  0x83   :  { %173 = vst.msk [vmem:[#allocation2 + $0x209] sm:$0x1] %vm60_vm2, %v3126_v0 }
  0x84   :  { %174 = vst.msk [vmem:[#allocation2 + $0x219] sm:$0x1] %vm60_vm2, %v3126_v0 }
  0x85   :  { %175 = vst.msk [vmem:[#allocation2 + $0x229] sm:$0x1] %vm60_vm2, %v3126_v0 }
  0x86   :  { %176 = vst.msk [vmem:[#allocation2 + $0x239] sm:$0x1] %vm60_vm2, %v3126_v0 }
  0x87   :  { %177 = vst.msk [vmem:[#allocation2 + $0x249] sm:$0x1] %vm60_vm2, %v3126_v0 }
  0x88   :  { %178 = vst.msk [vmem:[#allocation2 + $0x259] sm:$0x1] %vm60_vm2, %v3126_v0 }
  0x89   :  { %179 = vst.msk [vmem:[#allocation2 + $0x269] sm:$0x1] %vm60_vm2, %v3126_v0 }
  0x8a   :  { %182 = vst.msk [vmem:[#allocation2 + $0x299] sm:$0x1] %vm60_vm2, %v3126_v0 }
  0x8b   :  { %183 = vst.msk [vmem:[#allocation2 + $0x2a9] sm:$0x1] %vm60_vm2, %v3126_v0 }
  0x8c   :  { %184 = vst.msk [vmem:[#allocation2 + $0x2b9] sm:$0x1] %vm60_vm2, %v3126_v0 }
  0x8d   :  { %185 = vst.msk [vmem:[#allocation2 + $0x2c9] sm:$0x1] %vm60_vm2, %v3126_v0 }
  0x8e   :  { %186 = vst.msk [vmem:[#allocation2 + $0x2d9] sm:$0x1] %vm60_vm2, %v3126_v0 }
  0x8f   :  { %187 = vst.msk [vmem:[#allocation2 + $0x2e9] sm:$0x1] %vm60_vm2, %v3126_v0 }
  0x90   :  { %188 = vst.msk [vmem:[#allocation2 + $0x2f9] sm:$0x1] %vm60_vm2, %v3126_v0 }
  0x91   :  { %189 = vst.msk [vmem:[#allocation2 + $0x309] sm:$0x1] %vm60_vm2, %v3126_v0 }
  0x92   :  { %192 = vst.msk [vmem:[#allocation2 + $0x339] sm:$0x1] %vm60_vm2, %v3126_v0 }
  0x93   :  { %193 = vst.msk [vmem:[#allocation2 + $0x349] sm:$0x1] %vm60_vm2, %v3126_v0 }
  0x94   :  { %194 = vst.msk [vmem:[#allocation2 + $0x359] sm:$0x1] %vm60_vm2, %v3126_v0 }
  0x95   :  { %195 = vst.msk [vmem:[#allocation2 + $0x369] sm:$0x1] %vm60_vm2, %v3126_v0 }
  0x96   :  { %196 = vst.msk [vmem:[#allocation2 + $0x379] sm:$0x1] %vm60_vm2, %v3126_v0 }
  0x97   :  { %197 = vst.msk [vmem:[#allocation2 + $0x389] sm:$0x1] %vm60_vm2, %v3126_v0 }
  0x98   :  { %198 = vst.msk [vmem:[#allocation2 + $0x399] sm:$0x1] %vm60_vm2, %v3126_v0 }
  0x99   :  { %199 = vst.msk [vmem:[#allocation2 + $0x3a9] sm:$0x1] %vm60_vm2, %v3126_v0 }
  0x9a   :  { %202 = vst.msk [vmem:[#allocation2 + $0x3d9] sm:$0x1] %vm60_vm2, %v3126_v0 }
  0x9b   :  { %203 = vst.msk [vmem:[#allocation2 + $0x3e9] sm:$0x1] %vm60_vm2, %v3126_v0 }
  0x9c   :  { %204 = vst.msk [vmem:[#allocation2 + $0x3f9] sm:$0x1] %vm60_vm2, %v3126_v0 }
  0x9d   :  { %205 = vst.msk [vmem:[#allocation2 + $0x409] sm:$0x1] %vm60_vm2, %v3126_v0 }
  0x9e   :  { %206 = vst.msk [vmem:[#allocation2 + $0x419] sm:$0x1] %vm60_vm2, %v3126_v0 }
  0x9f   :  { %207 = vst.msk [vmem:[#allocation2 + $0x429] sm:$0x1] %vm60_vm2, %v3126_v0 }
  0xa0   :  { %208 = vst.msk [vmem:[#allocation2 + $0x439] sm:$0x1] %vm60_vm2, %v3126_v0 }
  0xa1   :  { %209 = vst.msk [vmem:[#allocation2 + $0x449] sm:$0x1] %vm60_vm2, %v3126_v0 }
  0xa2   :  { %212 = vst.msk [vmem:[#allocation2 + $0x479] sm:$0x1] %vm60_vm2, %v3126_v0 }
  0xa3   :  { %213 = vst.msk [vmem:[#allocation2 + $0x489] sm:$0x1] %vm60_vm2, %v3126_v0 }
  0xa4   :  { %214 = vst.msk [vmem:[#allocation2 + $0x499] sm:$0x1] %vm60_vm2, %v3126_v0 }
  0xa5   :  { %215 = vst.msk [vmem:[#allocation2 + $0x4a9] sm:$0x1] %vm60_vm2, %v3126_v0 }
  0xa6   :  { %216 = vst.msk [vmem:[#allocation2 + $0x4b9] sm:$0x1] %vm60_vm2, %v3126_v0 }
  0xa7   :  { %217 = vst.msk [vmem:[#allocation2 + $0x4c9] sm:$0x1] %vm60_vm2, %v3126_v0 }
  0xa8   :  { %218 = vst.msk [vmem:[#allocation2 + $0x4d9] sm:$0x1] %vm60_vm2, %v3126_v0 }
  0xa9   :  { %219 = vst.msk [vmem:[#allocation2 + $0x4e9] sm:$0x1] %vm60_vm2, %v3126_v0 }
  0xaa   :  { %288 = vst.msk [vmem:[#allocation2 + $0x31] sm:$0xff] %vm25_vm0, %v223_v4 }
  0xab   :  { %70 = vst.msk [vmem:[#allocation2 + $0x90] sm:$0x1] %vm60_vm2, %v3126_v0 }
  0xac   :  { %71 = vst.msk [vmem:[#allocation2 + $0xa0] sm:$0x1] %vm60_vm2, %v3126_v0 }
  0xad   :  { %80 = vst.msk [vmem:[#allocation2 + $0x130] sm:$0x1] %vm60_vm2, %v3126_v0 }
  0xae   :  { %81 = vst.msk [vmem:[#allocation2 + $0x140] sm:$0x1] %vm60_vm2, %v3126_v0 }
  0xaf   :  { %90 = vst.msk [vmem:[#allocation2 + $0x1d0] sm:$0x1] %vm60_vm2, %v3126_v0 }
  0xb0   :  { %91 = vst.msk [vmem:[#allocation2 + $0x1e0] sm:$0x1] %vm60_vm2, %v3126_v0 }
  0xb1   :  { %v481_v5 = vld [vmem:[#allocation2 + $0x31] sm:$0xff]  ;;  %100 = vst.msk [vmem:[#allocation2 + $0x270] sm:$0x1] %vm60_vm2, %v3126_v0 }
  0xb2   :  { %612 = vrot.lane.b32.xlu1 %v481_v5, %s3127_s0  ;;  %101 = vst.msk [vmem:[#allocation2 + $0x280] sm:$0x1] %vm60_vm2, %v3126_v0 }
  0xb3   :  { %110 = vst.msk [vmem:[#allocation2 + $0x310] sm:$0x1] %vm60_vm2, %v3126_v0 }
  0xb4   :  { %111 = vst.msk [vmem:[#allocation2 + $0x320] sm:$0x1] %vm60_vm2, %v3126_v0 }
  0xb5   :  { %120 = vst.msk [vmem:[#allocation2 + $0x3b0] sm:$0x1] %vm60_vm2, %v3126_v0 }
  0xb6   :  { %121 = vst.msk [vmem:[#allocation2 + $0x3c0] sm:$0x1] %vm60_vm2, %v3126_v0 }
  0xb7   :  { %130 = vst.msk [vmem:[#allocation2 + $0x450] sm:$0x1] %vm60_vm2, %v3126_v0 }
  0xb8   :  { %131 = vst.msk [vmem:[#allocation2 + $0x460] sm:$0x1] %vm60_vm2, %v3126_v0 }
  0xb9   :  { %140 = vst.msk [vmem:[#allocation2 + $0x4f0] sm:$0x1] %vm60_vm2, %v3126_v0 }
  0xba   :  { %150 = vst.msk [vmem:[#allocation2 + $0x99] sm:$0x1] %vm60_vm2, %v3126_v0 }
  0xbb   :  { %151 = vst.msk [vmem:[#allocation2 + $0xa9] sm:$0x1] %vm60_vm2, %v3126_v0 }
  0xbc   :  { %160 = vst.msk [vmem:[#allocation2 + $0x139] sm:$0x1] %vm60_vm2, %v3126_v0 }
  0xbd   :  { %161 = vst.msk [vmem:[#allocation2 + $0x149] sm:$0x1] %vm60_vm2, %v3126_v0 }
  0xbe   :  { %170 = vst.msk [vmem:[#allocation2 + $0x1d9] sm:$0x1] %vm60_vm2, %v3126_v0 }
  0xbf   :  { %171 = vst.msk [vmem:[#allocation2 + $0x1e9] sm:$0x1] %vm60_vm2, %v3126_v0 }
  0xc0   :  { %180 = vst.msk [vmem:[#allocation2 + $0x279] sm:$0x1] %vm60_vm2, %v3126_v0 }
  0xc1   :  { %181 = vst.msk [vmem:[#allocation2 + $0x289] sm:$0x1] %vm60_vm2, %v3126_v0 }
  0xc2   :  { %190 = vst.msk [vmem:[#allocation2 + $0x319] sm:$0x1] %vm60_vm2, %v3126_v0 }
  0xc3   :  { %191 = vst.msk [vmem:[#allocation2 + $0x329] sm:$0x1] %vm60_vm2, %v3126_v0 }
  0xc4   :  { %200 = vst.msk [vmem:[#allocation2 + $0x3b9] sm:$0x1] %vm60_vm2, %v3126_v0 }
  0xc5   :  { %201 = vst.msk [vmem:[#allocation2 + $0x3c9] sm:$0x1] %vm60_vm2, %v3126_v0 }
  0xc6   :  { %210 = vst.msk [vmem:[#allocation2 + $0x459] sm:$0x1] %vm60_vm2, %v3126_v0 }
  0xc7   :  { %211 = vst.msk [vmem:[#allocation2 + $0x469] sm:$0x1] %vm60_vm2, %v3126_v0 }
  0xc8   :  { %220 = vst.msk [vmem:[#allocation2 + $0x4f9] sm:$0x1] %vm60_vm2, %v3126_v0  ;;  %v263_v0 = vld [vmem:[#allocation3 + $0x150] sm:$0xff] }
  0xc9   :  { %286 = vst.msk [vmem:[#allocation2 + $0x11] sm:$0xff] %vm25_vm0, %v221_v7  ;;  %v611_v7 = vpop.permute.xlu1 %610 }
  0xca   :  { %292 = vst.msk [vmem:[#allocation2 + $0x71] sm:$0xff] %vm25_vm0, %v227_v8  ;;  %v352_v8 = vld [vmem:[#allocation2 + $0x20] sm:$0xff] }
  0xcb   :  { %291 = vst.msk [vmem:[#allocation2 + $0x61] sm:$0xff] %vm25_vm0, %v226_v9  ;;  %v358_v9 = vld [vmem:[#allocation2 + $0xa0] sm:$0xff] }
  0xcc   :  { %295 = vst.msk [vmem:[#allocation2 + $0xc1] sm:$0xff] %vm25_vm0, %v230_v10  ;;  %v623_v10 = vpop.permute.xlu2 %622 }
  0xcd   :  { %294 = vst.msk [vmem:[#allocation2 + $0xb1] sm:$0xff] %vm25_vm0, %v229_v11  ;;  %v350_v11 = vld [vmem:[#allocation2] sm:$0xff] }
  0xce   :  { %298 = vst.msk [vmem:[#allocation2 + $0xf1] sm:$0xff] %vm25_vm0, %v233_v12  ;;  %v510_v12 = vld [vmem:[#allocation2 + $0x281] sm:$0xff] }
  0xcf   :  { %289 = vst.msk [vmem:[#allocation2 + $0x41] sm:$0xff] %vm25_vm0, %v224_v13  ;;  %v607_v13 = vpop.permute.xlu0 %606 }
  0xd0   :  { %v479_v17 = vld [vmem:[#allocation2 + $0x11] sm:$0xff]  ;;  %297 = vst.msk [vmem:[#allocation2 + $0xe1] sm:$0xff] %vm25_vm0, %v232_v14  ;;  %v258_v14 = vld [vmem:[#allocation3 + $0x128] sm:$0xff] }
  0xd1   :  { %608 = vrot.lane.b32.xlu0 %v479_v17, %s3127_s0  ;;  %v485_v19 = vld [vmem:[#allocation2 + $0x71] sm:$0xff]  ;;  %290 = vst.msk [vmem:[#allocation2 + $0x51] sm:$0xff] %vm25_vm0, %v225_v15 }
  0xd2   :  { %620 = vrot.lane.b32.xlu1 %v485_v19, %s3127_s0  ;;  %300 = vst.msk [vmem:[#allocation2 + $0x111] sm:$0xff] %vm25_vm0, %v235_v16  ;;  %v484_v22 = vld [vmem:[#allocation2 + $0x61] sm:$0xff] }
  0xd3   :  { %304 = vst.msk [vmem:[#allocation2 + $0x171] sm:$0xff] %vm25_vm0, %v239_v18  ;;  %v488_v24 = vld [vmem:[#allocation2 + $0xc1] sm:$0xff]  ;;  %v353_v18 = vld [vmem:[#allocation2 + $0x30] sm:$0xff] }
  0xd4   :  { %296 = vst.msk [vmem:[#allocation2 + $0xd1] sm:$0xff] %vm25_vm0, %v231_v20  ;;  %v487_v29 = vld [vmem:[#allocation2 + $0xb1] sm:$0xff]  ;;  %v265_v16 = vld [vmem:[#allocation3 + $0x160] sm:$0xff] }
  0xd5   :  { %303 = vst.msk [vmem:[#allocation2 + $0x161] sm:$0xff] %vm25_vm0, %v238_v21  ;;  %v491_v30 = vld [vmem:[#allocation2 + $0xf1] sm:$0xff]  ;;  %v269_v21 = vld [vmem:[#allocation3 + $0x180] sm:$0xff] }
  0xd6   :  { %v482_v23 = vld [vmem:[#allocation2 + $0x41] sm:$0xff]  ;;  %307 = vst.msk [vmem:[#allocation2 + $0x1a1] sm:$0xff] %vm25_vm0, %v242_v25  ;;  %v351_v20 = vld [vmem:[#allocation2 + $0x10] sm:$0xff] }
  0xd7   :  { %614 = vrot.lane.b32.xlu2 %v482_v23, %s3127_s0  ;;  %299 = vst.msk [vmem:[#allocation2 + $0x101] sm:$0xff] %vm25_vm0, %v234_v26  ;;  %v490_v34 = vld [vmem:[#allocation2 + $0xe1] sm:$0xff] }
  0xd8   :  { %306 = vst.msk [vmem:[#allocation2 + $0x191] sm:$0xff] %vm25_vm0, %v241_v27  ;;  %v483_v28 = vld [vmem:[#allocation2 + $0x51] sm:$0xff]  ;;  %v354_v19 = vld [vmem:[#allocation2 + $0x40] sm:$0xff] }
  0xd9   :  { %618 = vrot.lane.b32.xlu0 %v484_v22, %s3127_s0  ;;  %310 = vst.msk [vmem:[#allocation2 + $0x1f1] sm:$0xff] %vm25_vm0, %v245_v31  ;;  %v493_v40 = vld [vmem:[#allocation2 + $0x111] sm:$0xff]  ;;  %v518_v26 = vld [vmem:[#allocation2 + $0x321] sm:$0xff] }
  0xda   :  { %626 = vrot.lane.b32.xlu1 %v488_v24, %s3127_s0  ;;  %302 = vst.msk [vmem:[#allocation2 + $0x151] sm:$0xff] %vm25_vm0, %v237_v32  ;;  %v497_v41 = vld [vmem:[#allocation2 + $0x171] sm:$0xff]  ;;  %v261_v24 = vld [vmem:[#allocation3 + $0x140] sm:$0xff] }
  0xdb   :  { %v489_v33 = vld [vmem:[#allocation2 + $0xd1] sm:$0xff]  ;;  %313 = vst.msk [vmem:[#allocation2 + $0x221] sm:$0xff] %vm25_vm0, %v248_v36 }
  0xdc   :  { %305 = vst.msk [vmem:[#allocation2 + $0x181] sm:$0xff] %vm25_vm0, %v240_v37  ;;  %v496_v46 = vld [vmem:[#allocation2 + $0x161] sm:$0xff]  ;;  %v272_v27 = vld [vmem:[#allocation3 + $0x198] sm:$0xff]  ;;  %v271_v32 = vld [vmem:[#allocation3 + $0x190] sm:$0xff] }
  0xdd   :  { %312 = vst.msk [vmem:[#allocation2 + $0x211] sm:$0xff] %vm25_vm0, %v247_v38  ;;  %v500_v47 = vld [vmem:[#allocation2 + $0x1a1] sm:$0xff]  ;;  %v264_v31 = vld [vmem:[#allocation3 + $0x158] sm:$0xff]  ;;  %v275_v36 = vld [vmem:[#allocation3 + $0x1b0] sm:$0xff] }
  0xde   :  { %v492_v39 = vld [vmem:[#allocation2 + $0x101] sm:$0xff]  ;;  %316 = vst.msk [vmem:[#allocation2 + $0x251] sm:$0xff] %vm25_vm0, %v251_v42 }
  0xdf   :  { %616 = vrot.lane.b32.xlu2 %v483_v28, %s3127_s0  ;;  %308 = vst.msk [vmem:[#allocation2 + $0x1b1] sm:$0xff] %vm25_vm0, %v243_v43  ;;  %v499_v52 = vld [vmem:[#allocation2 + $0x191] sm:$0xff]  ;;  %v360_v38 = vld [vmem:[#allocation2 + $0xc0] sm:$0xff]  ;;  %v274_v43 = vld [vmem:[#allocation3 + $0x1a8] sm:$0xff] }
  0xe0   :  { %315 = vst.msk [vmem:[#allocation2 + $0x241] sm:$0xff] %vm25_vm0, %v250_v44  ;;  %v503_v53 = vld [vmem:[#allocation2 + $0x1f1] sm:$0xff] }
  0xe1   :  { %624 = vrot.lane.b32.xlu0 %v487_v29, %s3127_s0  ;;  %v495_v45 = vld [vmem:[#allocation2 + $0x151] sm:$0xff]  ;;  %319 = vst.msk [vmem:[#allocation2 + $0x2a1] sm:$0xff] %vm25_vm0, %v254_v48 }
  0xe2   :  { %632 = vrot.lane.b32.xlu1 %v491_v30, %s3127_s0  ;;  %311 = vst.msk [vmem:[#allocation2 + $0x201] sm:$0xff] %vm25_vm0, %v246_v49  ;;  %v506_v59 = vld [vmem:[#allocation2 + $0x221] sm:$0xff]  ;;  %v357_v28 = vld [vmem:[#allocation2 + $0x70] sm:$0xff] }
  0xe3   :  { %318 = vst.msk [vmem:[#allocation2 + $0x291] sm:$0xff] %vm25_vm0, %v253_v50  ;;  %v498_v51 = vld [vmem:[#allocation2 + $0x181] sm:$0xff]  ;;  %v355_v29 = vld [vmem:[#allocation2 + $0x50] sm:$0xff] }
  0xe4   :  { %322 = vst.msk [vmem:[#allocation2 + $0x2d1] sm:$0xff] %vm25_vm0, %v257_v54  ;;  %v505_v62 = vld [vmem:[#allocation2 + $0x211] sm:$0xff]  ;;  %v356_v30 = vld [vmem:[#allocation2 + $0x60] sm:$0xff] }
  0xe5   :  { %314 = vst.msk [vmem:[#allocation2 + $0x231] sm:$0xff] %vm25_vm0, %v249_v55  ;;  %v509_v63 = vld [vmem:[#allocation2 + $0x251] sm:$0xff]  ;;  %v364_v49 = vld [vmem:[#allocation2 + $0x100] sm:$0xff] }
  0xe6   :  { %321 = vst.msk [vmem:[#allocation2 + $0x2c1] sm:$0xff] %vm25_vm0, %v256_v56  ;;  %v501_v57 = vld [vmem:[#allocation2 + $0x1b1] sm:$0xff]  ;;  %v362_v50 = vld [vmem:[#allocation2 + $0xe0] sm:$0xff] }
  0xe7   :  { %628 = vrot.lane.b32.xlu2 %v489_v33, %s3127_s0  ;;  %324 = vst.msk [vmem:[#allocation2 + $0x2f1] sm:$0xff] %vm25_vm0, %v259_v60  ;;  %v508_v4 = vld [vmem:[#allocation2 + $0x241] sm:$0xff]  ;;  %v363_v48 = vld [vmem:[#allocation2 + $0xf0] sm:$0xff] }
  0xe8   :  { %328 = vst.msk [vmem:[#allocation2 + $0x351] sm:$0xff] %vm25_vm0, %v263_v0  ;;  %v512_v5 = vld [vmem:[#allocation2 + $0x2a1] sm:$0xff]  ;;  %v367_v60 = vld [vmem:[#allocation2 + $0x150] sm:$0xff] }
  0xe9   :  { %630 = vrot.lane.b32.xlu0 %v490_v34, %s3127_s0  ;;  %v504_v61 = vld [vmem:[#allocation2 + $0x201] sm:$0xff]  ;;  %320 = vst.msk [vmem:[#allocation2 + $0x2b1] sm:$0xff] %vm25_vm0, %v255_v1 }
  0xea   :  { %638 = vrot.lane.b32.xlu1 %v494_v35, %s3127_s0  ;;  %327 = vst.msk [vmem:[#allocation2 + $0x341] sm:$0xff] %vm25_vm0, %v262_v2  ;;  %v511_v15 = vld [vmem:[#allocation2 + $0x291] sm:$0xff]  ;;  %v281_v56 = vld [vmem:[#allocation3 + $0x1e0] sm:$0xff] }
  0xeb   :  { %331 = vst.msk [vmem:[#allocation2 + $0x381] sm:$0xff] %vm25_vm0, %v266_v6  ;;  %v515_v17 = vld [vmem:[#allocation2 + $0x2d1] sm:$0xff]  ;;  %v273_v0 = vld [vmem:[#allocation3 + $0x1a0] sm:$0xff] }
  0xec   :  { %v507_v3 = vld [vmem:[#allocation2 + $0x231] sm:$0xff]  ;;  %416 = vst.msk [vmem:[#allocation6 + $0x30] sm:$0xff] %vm25_vm0, %v352_v8  ;;  %v526_v1 = vld [vmem:[#allocation2 + $0x3c1] sm:$0xff] }
  0xed   :  { %801 = vst.msk [vmem:[#allocation6 + $0x30] sm:$0xff] %vm798_vm3, %v611_v7  ;;  %v514_v25 = vld [vmem:[#allocation2 + $0x2c1] sm:$0xff]  ;;  %v280_v2 = vld [vmem:[#allocation3 + $0x1d8] sm:$0xff] }
  0xee   :  { %422 = vst.msk [vmem:[#allocation6 + $0xc0] sm:$0xff] %vm25_vm0, %v358_v9  ;;  %v517_v34 = vld [vmem:[#allocation2 + $0x2f1] sm:$0xff]  ;;  %v370_v7 = vld [vmem:[#allocation2 + $0x180] sm:$0xff] }
  0xef   :  { %634 = vrot.lane.b32.xlu2 %v492_v39, %s3127_s0  ;;  %807 = vst.msk [vmem:[#allocation6 + $0xc0] sm:$0xff] %vm798_vm3, %v623_v10  ;;  %v521_v35 = vld [vmem:[#allocation2 + $0x351] sm:$0xff]  ;;  %v368_v10 = vld [vmem:[#allocation2 + $0x160] sm:$0xff] }
  0xf0   :  { %414 = vst.msk [vmem:[#allocation6] sm:$0xff] %vm25_vm0, %v350_v11  ;;  %v513_v22 = vld [vmem:[#allocation2 + $0x2b1] sm:$0xff] }
  0xf1   :  { %636 = vrot.lane.b32.xlu0 %v493_v40, %s3127_s0  ;;  %799 = vst.msk [vmem:[#allocation6] sm:$0xff] %vm798_vm3, %v607_v13  ;;  %v361_v39 = vld [vmem:[#allocation2 + $0xd0] sm:$0xff]  ;;  %v520_v44 = vld [vmem:[#allocation2 + $0x341] sm:$0xff] }
  0xf2   :  { %644 = vrot.lane.b32.xlu1 %v497_v41, %s3127_s0  ;;  %323 = vst.msk [vmem:[#allocation2 + $0x2e1] sm:$0xff] %vm25_vm0, %v258_v14  ;;  %v359_v40 = vld [vmem:[#allocation2 + $0xb0] sm:$0xff] }
  0xf3   :  { %330 = vst.msk [vmem:[#allocation2 + $0x371] sm:$0xff] %vm25_vm0, %v265_v16  ;;  %v267_v41 = vld [vmem:[#allocation3 + $0x170] sm:$0xff]  ;;  %v372_v16 = vld [vmem:[#allocation2 + $0x1a0] sm:$0xff] }
  0xf4   :  { %417 = vst.msk [vmem:[#allocation6 + $0x48] sm:$0xff] %vm25_vm0, %v353_v18  ;;  %v283_v11 = vld [vmem:[#allocation3 + $0x1f0] sm:$0xff] }
  0xf5   :  { %418 = vst.msk [vmem:[#allocation6 + $0x60] sm:$0xff] %vm25_vm0, %v354_v19  ;;  %v279_v14 = vld [vmem:[#allocation3 + $0x1d0] sm:$0xff] }
  0xf6   :  { %415 = vst.msk [vmem:[#allocation6 + $0x18] sm:$0xff] %vm25_vm0, %v351_v20  ;;  %v373_v18 = vld [vmem:[#allocation2 + $0x1b0] sm:$0xff] }
  0xf7   :  { %640 = vrot.lane.b32.xlu2 %v495_v45, %s3127_s0  ;;  %334 = vst.msk [vmem:[#allocation2 + $0x3d1] sm:$0xff] %vm25_vm0, %v269_v21  ;;  %v524_v45 = vld [vmem:[#allocation2 + $0x381] sm:$0xff]  ;;  %v371_v21 = vld [vmem:[#allocation2 + $0x190] sm:$0xff] }
  0xf8   :  { %326 = vst.msk [vmem:[#allocation2 + $0x331] sm:$0xff] %vm25_vm0, %v261_v24  ;;  %v3679_v24 = vld [vmem:[#allocation2 + $0x32] sm:$0xff] }
  0xf9   :  { %642 = vrot.lane.b32.xlu0 %v496_v46, %s3127_s0  ;;  %337 = vst.msk [vmem:[#allocation2 + $0x401] sm:$0xff] %vm25_vm0, %v272_v27  ;;  %v516_v33 = vld [vmem:[#allocation2 + $0x2e1] sm:$0xff]  ;;  %v375_v27 = vld [vmem:[#allocation2 + $0x1f0] sm:$0xff] }
  0xfa   :  { %650 = vrot.lane.b32.xlu1 %v500_v47, %s3127_s0  ;;  %421 = vst.msk [vmem:[#allocation6 + $0xa8] sm:$0xff] %vm25_vm0, %v357_v28  ;;  %v278_v46 = vld [vmem:[#allocation3 + $0x1c8] sm:$0xff]  ;;  %v523_v54 = vld [vmem:[#allocation2 + $0x371] sm:$0xff] }
  0xfb   :  { %419 = vst.msk [vmem:[#allocation6 + $0x78] sm:$0xff] %vm25_vm0, %v355_v29  ;;  %v376_v29 = vld [vmem:[#allocation2 + $0x200] sm:$0xff] }
  0xfc   :  { %420 = vst.msk [vmem:[#allocation6 + $0x90] sm:$0xff] %vm25_vm0, %v356_v30 }
  0xfd   :  { %329 = vst.msk [vmem:[#allocation2 + $0x361] sm:$0xff] %vm25_vm0, %v264_v31  ;;  %v534_v31 = vld [vmem:[#allocation2 + $0x461] sm:$0xff] }
  0xfe   :  { %336 = vst.msk [vmem:[#allocation2 + $0x3f1] sm:$0xff] %vm25_vm0, %v271_v32  ;;  %v527_v55 = vld [vmem:[#allocation2 + $0x3d1] sm:$0xff]  ;;  %v374_v32 = vld [vmem:[#allocation2 + $0x1e0] sm:$0xff] }
  0xff   :  { %646 = vrot.lane.b32.xlu2 %v498_v51, %s3127_s0  ;;  %340 = vst.msk [vmem:[#allocation2 + $0x431] sm:$0xff] %vm25_vm0, %v275_v36  ;;  %v519_v42 = vld [vmem:[#allocation2 + $0x331] sm:$0xff]  ;;  %v270_v51 = vld [vmem:[#allocation3 + $0x188] sm:$0xff] }
 0x100   :  { %424 = vst.msk [vmem:[#allocation6 + $0xf0] sm:$0xff] %vm25_vm0, %v360_v38  ;;  %v3697_v36 = vld [vmem:[#allocation2 + $0x62] sm:$0xff]  ;;  %v3704_v38 = vld [vmem:[#allocation2 + $0x52] sm:$0xff] }
 0x101   :  { %648 = vrot.lane.b32.xlu0 %v499_v52, %s3127_s0  ;;  %425 = vst.msk [vmem:[#allocation6 + $0x108] sm:$0xff] %vm25_vm0, %v361_v39 }
 0x102   :  { %656 = vrot.lane.b32.xlu1 %v503_v53, %s3127_s0  ;;  %423 = vst.msk [vmem:[#allocation6 + $0xd8] sm:$0xff] %vm25_vm0, %v359_v40  ;;  %v277_v53 = vld [vmem:[#allocation3 + $0x1c0] sm:$0xff] }
 0x103   :  { %332 = vst.msk [vmem:[#allocation2 + $0x391] sm:$0xff] %vm25_vm0, %v267_v41  ;;  %v378_v40 = vld [vmem:[#allocation2 + $0x220] sm:$0xff] }
 0x104   :  { %339 = vst.msk [vmem:[#allocation2 + $0x421] sm:$0xff] %vm25_vm0, %v274_v43  ;;  %v522_v52 = vld [vmem:[#allocation2 + $0x361] sm:$0xff]  ;;  %v3709_v43 = vld [vmem:[#allocation2 + $0x230] sm:$0xff] }
 0x105   :  { %343 = vst.msk [vmem:[#allocation2 + $0x481] sm:$0xff] %vm25_vm0, %v278_v46  ;;  %v863_v46 = vld [vmem:[#allocation2 + $0x2] sm:$0xff] }
 0x106   :  { %427 = vst.msk [vmem:[#allocation6 + $0x138] sm:$0xff] %vm25_vm0, %v363_v48  ;;  %v533_v13 = vld [vmem:[#allocation2 + $0x431] sm:$0xff] }
 0x107   :  { %652 = vrot.lane.b32.xlu2 %v501_v57, %s3127_s0  ;;  %428 = vst.msk [vmem:[#allocation6 + $0x150] sm:$0xff] %vm25_vm0, %v364_v49  ;;  %v381_v48 = vld [vmem:[#allocation2 + $0x250] sm:$0xff] }
 0x108   :  { %426 = vst.msk [vmem:[#allocation6 + $0x120] sm:$0xff] %vm25_vm0, %v362_v50  ;;  %v382_v50 = vld [vmem:[#allocation2 + $0x280] sm:$0xff] }
 0x109   :  { %654 = vrot.lane.b32.xlu0 %v502_v58, %s3127_s0  ;;  %335 = vst.msk [vmem:[#allocation2 + $0x3e1] sm:$0xff] %vm25_vm0, %v270_v51  ;;  %v366_v58 = vld [vmem:[#allocation2 + $0x140] sm:$0xff] }
 0x10a   :  { %662 = vrot.lane.b32.xlu1 %v506_v59, %s3127_s0  ;;  %342 = vst.msk [vmem:[#allocation2 + $0x471] sm:$0xff] %vm25_vm0, %v277_v53  ;;  %v3725_v53 = vld [vmem:[#allocation2 + $0x240] sm:$0xff] }
 0x10b   :  { %346 = vst.msk [vmem:[#allocation2 + $0x4b1] sm:$0xff] %vm25_vm0, %v281_v56  ;;  %v3733_v56 = vld [vmem:[#allocation2 + $0xe2] sm:$0xff] }
 0x10c   :  { %430 = vst.msk [vmem:[#allocation6 + $0x180] sm:$0xff] %vm25_vm0, %v366_v58  ;;  %v3741_v58 = vld [vmem:[#allocation2 + $0xd2] sm:$0xff] }
 0x10d   :  { %431 = vst.msk [vmem:[#allocation6 + $0x198] sm:$0xff] %vm25_vm0, %v367_v60  ;;  %v384_v60 = vld [vmem:[#allocation2 + $0x2a0] sm:$0xff] }
 0x10e   :  { %338 = vst.msk [vmem:[#allocation2 + $0x411] sm:$0xff] %vm25_vm0, %v273_v0  ;;  %v3749_v0 = vld [vmem:[#allocation2 + $0x290] sm:$0xff] }
 0x10f   :  { %658 = vrot.lane.b32.xlu2 %v504_v61, %s3127_s0  ;;  %345 = vst.msk [vmem:[#allocation2 + $0x4a1] sm:$0xff] %vm25_vm0, %v280_v2 }
 0x110   :  { %v528_v9 = vld [vmem:[#allocation2 + $0x3e1] sm:$0xff]  ;;  %434 = vst.msk [vmem:[#allocation6 + $0x1e0] sm:$0xff] %vm25_vm0, %v370_v7 }
 0x111   :  { %660 = vrot.lane.b32.xlu0 %v505_v62, %s3127_s0  ;;  %v525_v62 = vld [vmem:[#allocation2 + $0x391] sm:$0xff]  ;;  %432 = vst.msk [vmem:[#allocation6 + $0x1b0] sm:$0xff] %vm25_vm0, %v368_v10  ;;  %v3768_v7 = vld [vmem:[#allocation2 + $0x102] sm:$0xff] }
 0x112   :  { %668 = vrot.lane.b32.xlu1 %v509_v63, %s3127_s0  ;;  %v365_v63 = vld [vmem:[#allocation2 + $0x110] sm:$0xff]  ;;  %348 = vst.msk [vmem:[#allocation2 + $0x4d1] sm:$0xff] %vm25_vm0, %v283_v11 }
 0x113   :  { %429 = vst.msk [vmem:[#allocation6 + $0x168] sm:$0xff] %vm25_vm0, %v365_v63  ;;  %v3746_v63 = vld [vmem:[#allocation2 + $0x2b0] sm:$0xff] }
 0x114   :  { %344 = vst.msk [vmem:[#allocation2 + $0x491] sm:$0xff] %vm25_vm0, %v279_v14  ;;  %v872_v10 = vld [vmem:[#allocation2 + $0xb2] sm:$0xff] }
 0x115   :  { %436 = vst.msk [vmem:[#allocation6 + $0x210] sm:$0xff] %vm25_vm0, %v372_v16  ;;  %v531_v20 = vld [vmem:[#allocation2 + $0x411] sm:$0xff]  ;;  %v881_v16 = vld [vmem:[#allocation2 + $0x162] sm:$0xff] }
 0x116   :  { %437 = vst.msk [vmem:[#allocation6 + $0x228] sm:$0xff] %vm25_vm0, %v373_v18  ;;  %v871_v18 = vld [vmem:[#allocation2 + $0xa2] sm:$0xff] }
 0x117   :  { %664 = vrot.lane.b32.xlu2 %v507_v3, %s3127_s0  ;;  %v530_v3 = vld [vmem:[#allocation2 + $0x401] sm:$0xff]  ;;  %435 = vst.msk [vmem:[#allocation6 + $0x1f8] sm:$0xff] %vm25_vm0, %v371_v21  ;;  %v876_v21 = vld [vmem:[#allocation2 + $0xf2] sm:$0xff] }
 0x118   :  { %2979 = vst.msk [vmem:[#allocation6 + $0x28] sm:$0xff] %vm25_vm0, %v3679_v24 }
 0x119   :  { %666 = vrot.lane.b32.xlu0 %v508_v4, %s3127_s0  ;;  %439 = vst.msk [vmem:[#allocation6 + $0x258] sm:$0xff] %vm25_vm0, %v375_v27  ;;  %v3813_v27 = vld [vmem:[#allocation2 + $0x360] sm:$0xff] }
 0x11a   :  { %674 = vrot.lane.b32.xlu1 %v512_v5, %s3127_s0  ;;  %v369_v5 = vld [vmem:[#allocation2 + $0x170] sm:$0xff]  ;;  %440 = vst.msk [vmem:[#allocation6 + $0x270] sm:$0xff] %vm25_vm0, %v376_v29 }
 0x11b   :  { %433 = vst.msk [vmem:[#allocation6 + $0x1c8] sm:$0xff] %vm25_vm0, %v369_v5 }
 0x11c   :  { %438 = vst.msk [vmem:[#allocation6 + $0x240] sm:$0xff] %vm25_vm0, %v374_v32  ;;  %v3831_v32 = vld [vmem:[#allocation2 + $0x380] sm:$0xff] }
 0x11d   :  { %2982 = vst.msk [vmem:[#allocation6 + $0x70] sm:$0xff] %vm25_vm0, %v3697_v36 }
 0x11e   :  { %2981 = vst.msk [vmem:[#allocation6 + $0x58] sm:$0xff] %vm25_vm0, %v3704_v38 }
 0x11f   :  { %670 = vrot.lane.b32.xlu2 %v510_v12, %s3127_s0  ;;  %v529_v12 = vld [vmem:[#allocation2 + $0x3f1] sm:$0xff]  ;;  %442 = vst.msk [vmem:[#allocation6 + $0x2a0] sm:$0xff] %vm25_vm0, %v378_v40  ;;  %v879_v40 = vld [vmem:[#allocation2 + $0x142] sm:$0xff] }
 0x120   :  { %443 = vst.msk [vmem:[#allocation6 + $0x2b8] sm:$0xff] %vm25_vm0, %v3709_v43 }
 0x121   :  { %672 = vrot.lane.b32.xlu0 %v511_v15, %s3127_s0  ;;  %445 = vst.msk [vmem:[#allocation6 + $0x2e8] sm:$0xff] %vm25_vm0, %v381_v48  ;;  %v398_v48 = vld [vmem:[#allocation2 + $0x3c0] sm:$0xff] }
 0x122   :  { %680 = vrot.lane.b32.xlu1 %v515_v17, %s3127_s0  ;;  %446 = vst.msk [vmem:[#allocation6 + $0x300] sm:$0xff] %vm25_vm0, %v382_v50 }
 0x123   :  { %444 = vst.msk [vmem:[#allocation6 + $0x2d0] sm:$0xff] %vm25_vm0, %v3725_v53 }
 0x124   :  { %v613_v23 = vpop.permute.xlu1 %612  ;;  %2988 = vst.msk [vmem:[#allocation6 + $0x100] sm:$0xff] %vm25_vm0, %v3733_v56 }
 0x125   :  { %802 = vst.msk [vmem:[#allocation6 + $0x48] sm:$0xff] %vm798_vm3, %v613_v23  ;;  %v536_v23 = vld [vmem:[#allocation2 + $0x481] sm:$0xff] }
 0x126   :  { %2987 = vst.msk [vmem:[#allocation6 + $0xe8] sm:$0xff] %vm25_vm0, %v3741_v58 }
 0x127   :  { %676 = vrot.lane.b32.xlu2 %v513_v22, %s3127_s0  ;;  %v532_v22 = vld [vmem:[#allocation2 + $0x421] sm:$0xff]  ;;  %448 = vst.msk [vmem:[#allocation6 + $0x330] sm:$0xff] %vm25_vm0, %v384_v60 }
 0x128   :  { %449 = vst.msk [vmem:[#allocation6 + $0x348] sm:$0xff] %vm25_vm0, %v3746_v63 }
 0x129   :  { %678 = vrot.lane.b32.xlu0 %v514_v25, %s3127_s0  ;;  %v3683_v25 = vld [vmem:[#allocation2 + $0x22] sm:$0xff]  ;;  %447 = vst.msk [vmem:[#allocation6 + $0x318] sm:$0xff] %vm25_vm0, %v3749_v0 }
 0x12a   :  { %686 = vrot.lane.b32.xlu1 %v518_v26, %s3127_s0  ;;  %2978 = vst.msk [vmem:[#allocation6 + $0x10] sm:$0xff] %vm25_vm0, %v3683_v25 }
 0x12b   :  { %2990 = vst.msk [vmem:[#allocation6 + $0x130] sm:$0xff] %vm25_vm0, %v3768_v7 }
 0x12c   :  { %2994 = vst.msk [vmem:[#allocation6 + $0x190] sm:$0xff] %vm25_vm0, %v881_v16 }
 0x12d   :  { %2989 = vst.msk [vmem:[#allocation6 + $0x118] sm:$0xff] %vm25_vm0, %v876_v21 }
 0x12e   :  { %458 = vst.msk [vmem:[#allocation6 + $0x420] sm:$0xff] %vm25_vm0, %v3813_v27 }
 0x12f   :  { %682 = vrot.lane.b32.xlu2 %v516_v33, %s3127_s0  ;;  %v282_v33 = vld [vmem:[#allocation3 + $0x1e8] sm:$0xff]  ;;  %460 = vst.msk [vmem:[#allocation6 + $0x450] sm:$0xff] %vm25_vm0, %v3831_v32 }
 0x130   :  { %347 = vst.msk [vmem:[#allocation2 + $0x4c1] sm:$0xff] %vm25_vm0, %v282_v33  ;;  %v3834_v33 = vld [vmem:[#allocation2 + $0x1b2] sm:$0xff] }
 0x131   :  { %684 = vrot.lane.b32.xlu0 %v517_v34, %s3127_s0  ;;  %v615_v37 = vpop.permute.xlu2 %614  ;;  %v535_v34 = vld [vmem:[#allocation2 + $0x471] sm:$0xff]  ;;  %2999 = vst.msk [vmem:[#allocation6 + $0x208] sm:$0xff] %vm25_vm0, %v3834_v33 }
 0x132   :  { %692 = vrot.lane.b32.xlu1 %v521_v35, %s3127_s0  ;;  %803 = vst.msk [vmem:[#allocation6 + $0x60] sm:$0xff] %vm798_vm3, %v615_v37  ;;  %v539_v35 = vld [vmem:[#allocation2 + $0x4b1] sm:$0xff] }
 0x133   :  { %462 = vst.msk [vmem:[#allocation6 + $0x480] sm:$0xff] %vm25_vm0, %v398_v48 }
 0x137   :  { %688 = vrot.lane.b32.xlu2 %v519_v42, %s3127_s0  ;;  %v537_v42 = vld [vmem:[#allocation2 + $0x491] sm:$0xff] }
 0x139   :  { %690 = vrot.lane.b32.xlu0 %v520_v44, %s3127_s0  ;;  %v617_v47 = vpop.permute.xlu2 %616  ;;  %v3712_v44 = vld [vmem:[#allocation2 + $0x210] sm:$0xff] }
 0x13a   :  { %698 = vrot.lane.b32.xlu1 %v524_v45, %s3127_s0  ;;  %804 = vst.msk [vmem:[#allocation6 + $0x78] sm:$0xff] %vm798_vm3, %v617_v47  ;;  %v538_v45 = vld [vmem:[#allocation2 + $0x4a1] sm:$0xff] }
 0x13b   :  { %441 = vst.msk [vmem:[#allocation6 + $0x288] sm:$0xff] %vm25_vm0, %v3712_v44 }
 0x13f   :  { %694 = vrot.lane.b32.xlu2 %v522_v52, %s3127_s0  ;;  %v540_v52 = vld [vmem:[#allocation2 + $0x4c1] sm:$0xff] }
 0x141   :  { %696 = vrot.lane.b32.xlu0 %v523_v54, %s3127_s0  ;;  %v629_v57 = vpop.permute.xlu2 %628  ;;  %v541_v54 = vld [vmem:[#allocation2 + $0x4d1] sm:$0xff] }
 0x142   :  { %704 = vrot.lane.b32.xlu1 %v527_v55, %s3127_s0  ;;  %810 = vst.msk [vmem:[#allocation6 + $0x108] sm:$0xff] %vm798_vm3, %v629_v57  ;;  %v867_v55 = vld [vmem:[#allocation2 + $0x42] sm:$0xff] }
 0x143   :  { %v609_v59 = vpop.permute.xlu0 %608  ;;  %2980 = vst.msk [vmem:[#allocation6 + $0x40] sm:$0xff] %vm25_vm0, %v867_v55 }
 0x144   :  { %800 = vst.msk [vmem:[#allocation6 + $0x18] sm:$0xff] %vm798_vm3, %v609_v59  ;;  %v621_v61 = vpop.permute.xlu1 %620 }
 0x145   :  { %806 = vst.msk [vmem:[#allocation6 + $0xa8] sm:$0xff] %vm798_vm3, %v621_v61 }
 0x147   :  { %700 = vrot.lane.b32.xlu2 %v525_v62, %s3127_s0  ;;  %v864_v62 = vld [vmem:[#allocation2 + $0x12] sm:$0xff] }
 0x149   :  { %702 = vrot.lane.b32.xlu0 %v526_v1, %s3127_s0  ;;  %v635_v4 = vpop.permute.xlu2 %634  ;;  %v870_v1 = vld [vmem:[#allocation2 + $0x72] sm:$0xff] }
 0x14a   :  { %710 = vrot.lane.b32.xlu1 %v530_v3, %s3127_s0  ;;  %813 = vst.msk [vmem:[#allocation6 + $0x150] sm:$0xff] %vm798_vm3, %v635_v4  ;;  %v878_v3 = vld [vmem:[#allocation2 + $0x112] sm:$0xff] }
 0x14b   :  { %v619_v6 = vpop.permute.xlu0 %618  ;;  %2983 = vst.msk [vmem:[#allocation6 + $0x88] sm:$0xff] %vm25_vm0, %v870_v1 }
 0x14c   :  { %805 = vst.msk [vmem:[#allocation6 + $0x90] sm:$0xff] %vm798_vm3, %v619_v6  ;;  %v627_v8 = vpop.permute.xlu1 %626  ;;  %v3765_v6 = vld [vmem:[#allocation2 + $0x2d0] sm:$0xff] }
 0x14d   :  { %809 = vst.msk [vmem:[#allocation6 + $0xf0] sm:$0xff] %vm798_vm3, %v627_v8  ;;  %v3770_v8 = vld [vmem:[#allocation2 + $0x2e0] sm:$0xff] }
 0x14e   :  { %2991 = vst.msk [vmem:[#allocation6 + $0x148] sm:$0xff] %vm25_vm0, %v878_v3 }
 0x14f   :  { %706 = vrot.lane.b32.xlu2 %v528_v9, %s3127_s0  ;;  %v3774_v9 = vld [vmem:[#allocation2 + $0x2c0] sm:$0xff]  ;;  %451 = vst.msk [vmem:[#allocation6 + $0x378] sm:$0xff] %vm25_vm0, %v3765_v6 }
 0x150   :  { %452 = vst.msk [vmem:[#allocation6 + $0x390] sm:$0xff] %vm25_vm0, %v3770_v8 }
 0x151   :  { %708 = vrot.lane.b32.xlu0 %v529_v12, %s3127_s0  ;;  %v641_v15 = vpop.permute.xlu2 %640  ;;  %450 = vst.msk [vmem:[#allocation6 + $0x360] sm:$0xff] %vm25_vm0, %v3774_v9  ;;  %v873_v12 = vld [vmem:[#allocation2 + $0xc2] sm:$0xff] }
 0x152   :  { %716 = vrot.lane.b32.xlu1 %v533_v13, %s3127_s0  ;;  %816 = vst.msk [vmem:[#allocation6 + $0x198] sm:$0xff] %vm798_vm3, %v641_v15  ;;  %v390_v15 = vld [vmem:[#allocation2 + $0x320] sm:$0xff] }
 0x153   :  { %v625_v17 = vpop.permute.xlu0 %624  ;;  %2986 = vst.msk [vmem:[#allocation6 + $0xd0] sm:$0xff] %vm25_vm0, %v873_v12 }
 0x154   :  { %808 = vst.msk [vmem:[#allocation6 + $0xd8] sm:$0xff] %vm798_vm3, %v625_v17  ;;  %v633_v19 = vpop.permute.xlu1 %632  ;;  %v3790_v17 = vld [vmem:[#allocation2 + $0x330] sm:$0xff] }
 0x155   :  { %812 = vst.msk [vmem:[#allocation6 + $0x138] sm:$0xff] %vm798_vm3, %v633_v19  ;;  %v3793_v19 = vld [vmem:[#allocation2 + $0x2f0] sm:$0xff] }
 0x156   :  { %454 = vst.msk [vmem:[#allocation6 + $0x3c0] sm:$0xff] %vm25_vm0, %v390_v15  ;;  %v3920_v15 = vld [vmem:[#allocation2 + $0x490] sm:$0xff] }
 0x157   :  { %712 = vrot.lane.b32.xlu2 %v531_v20, %s3127_s0  ;;  %455 = vst.msk [vmem:[#allocation6 + $0x3d8] sm:$0xff] %vm25_vm0, %v3790_v17 }
 0x158   :  { %453 = vst.msk [vmem:[#allocation6 + $0x3a8] sm:$0xff] %vm25_vm0, %v3793_v19 }
 0x159   :  { %714 = vrot.lane.b32.xlu0 %v532_v22, %s3127_s0  ;;  %v647_v26 = vpop.permute.xlu2 %646  ;;  %473 = vst.msk [vmem:[#allocation6 + $0x588] sm:$0xff] %vm25_vm0, %v3920_v15 }
 0x15a   :  { %722 = vrot.lane.b32.xlu1 %v536_v23, %s3127_s0  ;;  %819 = vst.msk [vmem:[#allocation6 + $0x1e0] sm:$0xff] %vm798_vm3, %v647_v26  ;;  %v3811_v26 = vld [vmem:[#allocation2 + $0x182] sm:$0xff] }
 0x15b   :  { %v631_v28 = vpop.permute.xlu0 %630  ;;  %2996 = vst.msk [vmem:[#allocation6 + $0x1c0] sm:$0xff] %vm25_vm0, %v3811_v26 }
 0x15c   :  { %811 = vst.msk [vmem:[#allocation6 + $0x120] sm:$0xff] %vm798_vm3, %v631_v28  ;;  %v639_v30 = vpop.permute.xlu1 %638  ;;  %v3820_v28 = vld [vmem:[#allocation2 + $0x340] sm:$0xff] }
 0x15d   :  { %815 = vst.msk [vmem:[#allocation6 + $0x180] sm:$0xff] %vm798_vm3, %v639_v30 }
 0x15e   :  { %456 = vst.msk [vmem:[#allocation6 + $0x3f0] sm:$0xff] %vm25_vm0, %v3820_v28 }
 0x15f   :  { %718 = vrot.lane.b32.xlu2 %v534_v31, %s3127_s0 }
 0x161   :  { %720 = vrot.lane.b32.xlu0 %v535_v34, %s3127_s0  ;;  %v653_v37 = vpop.permute.xlu2 %652  ;;  %v3836_v34 = vld [vmem:[#allocation2 + $0x390] sm:$0xff] }
 0x162   :  { %728 = vrot.lane.b32.xlu1 %v539_v35, %s3127_s0  ;;  %822 = vst.msk [vmem:[#allocation6 + $0x228] sm:$0xff] %vm798_vm3, %v653_v37  ;;  %v3840_v35 = vld [vmem:[#allocation2 + $0x370] sm:$0xff] }
 0x163   :  { %v637_v39 = vpop.permute.xlu0 %636  ;;  %461 = vst.msk [vmem:[#allocation6 + $0x468] sm:$0xff] %vm25_vm0, %v3836_v34  ;;  %v882_v37 = vld [vmem:[#allocation2 + $0x172] sm:$0xff] }
 0x164   :  { %814 = vst.msk [vmem:[#allocation6 + $0x168] sm:$0xff] %vm798_vm3, %v637_v39  ;;  %v645_v41 = vpop.permute.xlu1 %644 }
 0x165   :  { %818 = vst.msk [vmem:[#allocation6 + $0x1c8] sm:$0xff] %vm798_vm3, %v645_v41  ;;  %v890_v41 = vld [vmem:[#allocation2 + $0x212] sm:$0xff] }
 0x166   :  { %459 = vst.msk [vmem:[#allocation6 + $0x438] sm:$0xff] %vm25_vm0, %v3840_v35 }
 0x167   :  { %724 = vrot.lane.b32.xlu2 %v537_v42, %s3127_s0  ;;  %2995 = vst.msk [vmem:[#allocation6 + $0x1a8] sm:$0xff] %vm25_vm0, %v882_v37  ;;  %v3856_v42 = vld [vmem:[#allocation2 + $0x3d0] sm:$0xff] }
 0x168   :  { %3003 = vst.msk [vmem:[#allocation6 + $0x268] sm:$0xff] %vm25_vm0, %v890_v41 }
 0x169   :  { %726 = vrot.lane.b32.xlu0 %v538_v45, %s3127_s0  ;;  %v659_v47 = vpop.permute.xlu2 %658  ;;  %v880_v45 = vld [vmem:[#allocation2 + $0x152] sm:$0xff]  ;;  %463 = vst.msk [vmem:[#allocation6 + $0x498] sm:$0xff] %vm25_vm0, %v3856_v42 }
 0x16a   :  { %991 = vrot.lane.b32.xlu1 %v863_v46, %s3128_s13  ;;  %825 = vst.msk [vmem:[#allocation6 + $0x270] sm:$0xff] %vm798_vm3, %v659_v47  ;;  %v3859_v46 = vld [vmem:[#allocation2 + $0x202] sm:$0xff] }
 0x16b   :  { %v643_v49 = vpop.permute.xlu0 %642  ;;  %v3861_v47 = vld [vmem:[#allocation2 + $0x3e0] sm:$0xff]  ;;  %3002 = vst.msk [vmem:[#allocation6 + $0x250] sm:$0xff] %vm25_vm0, %v3859_v46 }
 0x16c   :  { %817 = vst.msk [vmem:[#allocation6 + $0x1b0] sm:$0xff] %vm798_vm3, %v643_v49  ;;  %v651_v51 = vpop.permute.xlu1 %650 }
 0x16d   :  { %821 = vst.msk [vmem:[#allocation6 + $0x210] sm:$0xff] %vm798_vm3, %v651_v51 }
 0x16e   :  { %464 = vst.msk [vmem:[#allocation6 + $0x4b0] sm:$0xff] %vm25_vm0, %v3861_v47 }
 0x16f   :  { %730 = vrot.lane.b32.xlu2 %v540_v52, %s3127_s0  ;;  %v885_v52 = vld [vmem:[#allocation2 + $0x1a2] sm:$0xff] }
 0x170   :  { %2998 = vst.msk [vmem:[#allocation6 + $0x1f0] sm:$0xff] %vm25_vm0, %v885_v52 }
 0x171   :  { %732 = vrot.lane.b32.xlu0 %v541_v54, %s3127_s0  ;;  %v665_v57 = vpop.permute.xlu2 %664  ;;  %v893_v54 = vld [vmem:[#allocation2 + $0x242] sm:$0xff] }
 0x172   :  { %997 = vrot.lane.b32.xlu1 %v3679_v24, %s3128_s13  ;;  %828 = vst.msk [vmem:[#allocation6 + $0x2b8] sm:$0xff] %vm798_vm3, %v665_v57  ;;  %v884_v24 = vld [vmem:[#allocation2 + $0x192] sm:$0xff] }
 0x173   :  { %v649_v59 = vpop.permute.xlu0 %648  ;;  %2997 = vst.msk [vmem:[#allocation6 + $0x1d8] sm:$0xff] %vm25_vm0, %v884_v24  ;;  %v892_v57 = vld [vmem:[#allocation2 + $0x232] sm:$0xff] }
 0x174   :  { %820 = vst.msk [vmem:[#allocation6 + $0x1f8] sm:$0xff] %vm798_vm3, %v649_v59  ;;  %v657_v61 = vpop.permute.xlu1 %656 }
 0x175   :  { %824 = vst.msk [vmem:[#allocation6 + $0x258] sm:$0xff] %vm798_vm3, %v657_v61  ;;  %v3892_v61 = vld [vmem:[#allocation2 + $0x3f0] sm:$0xff] }
 0x176   :  { %3006 = vst.msk [vmem:[#allocation6 + $0x2b0] sm:$0xff] %vm25_vm0, %v893_v54 }
 0x177   :  { %993 = vrot.lane.b32.xlu2 %v864_v62, %s3128_s13  ;;  %3005 = vst.msk [vmem:[#allocation6 + $0x298] sm:$0xff] %vm25_vm0, %v892_v57 }
 0x178   :  { %465 = vst.msk [vmem:[#allocation6 + $0x4c8] sm:$0xff] %vm25_vm0, %v3892_v61 }
 0x179   :  { %995 = vrot.lane.b32.xlu0 %v3683_v25, %s3128_s13  ;;  %v671_v2 = vpop.permute.xlu2 %670  ;;  %v3808_v25 = vld [vmem:[#allocation2 + $0x350] sm:$0xff] }
 0x17a   :  { %1003 = vrot.lane.b32.xlu1 %v3697_v36, %s3128_s13  ;;  %831 = vst.msk [vmem:[#allocation6 + $0x300] sm:$0xff] %vm798_vm3, %v671_v2  ;;  %v406_v2 = vld [vmem:[#allocation2 + $0x460] sm:$0xff] }
 0x17b   :  { %v655_v4 = vpop.permute.xlu0 %654  ;;  %457 = vst.msk [vmem:[#allocation6 + $0x408] sm:$0xff] %vm25_vm0, %v3808_v25 }
 0x17c   :  { %823 = vst.msk [vmem:[#allocation6 + $0x240] sm:$0xff] %vm798_vm3, %v655_v4  ;;  %v663_v5 = vpop.permute.xlu1 %662 }
 0x17d   :  { %827 = vst.msk [vmem:[#allocation6 + $0x2a0] sm:$0xff] %vm798_vm3, %v663_v5  ;;  %v891_v5 = vld [vmem:[#allocation2 + $0x222] sm:$0xff] }
 0x17e   :  { %470 = vst.msk [vmem:[#allocation6 + $0x540] sm:$0xff] %vm25_vm0, %v406_v2 }
 0x17f   :  { %999 = vrot.lane.b32.xlu2 %v867_v55, %s3128_s13  ;;  %v3877_v55 = vld [vmem:[#allocation2 + $0x400] sm:$0xff]  ;;  %3004 = vst.msk [vmem:[#allocation6 + $0x280] sm:$0xff] %vm25_vm0, %v891_v5 }
 0x180   :  { %466 = vst.msk [vmem:[#allocation6 + $0x4e0] sm:$0xff] %vm25_vm0, %v3877_v55 }
 0x181   :  { %1001 = vrot.lane.b32.xlu0 %v3704_v38, %s3128_s13  ;;  %v677_v11 = vpop.permute.xlu2 %676 }
 0x182   :  { %1009 = vrot.lane.b32.xlu1 %v872_v10, %s3128_s13  ;;  %834 = vst.msk [vmem:[#allocation6 + $0x348] sm:$0xff] %vm798_vm3, %v677_v11  ;;  %v888_v11 = vld [vmem:[#allocation2 + $0x1f2] sm:$0xff] }
 0x183   :  { %v661_v13 = vpop.permute.xlu0 %660 }
 0x184   :  { %826 = vst.msk [vmem:[#allocation6 + $0x288] sm:$0xff] %vm798_vm3, %v661_v13  ;;  %v669_v14 = vpop.permute.xlu1 %668  ;;  %v3915_v13 = vld [vmem:[#allocation2 + $0x480] sm:$0xff] }
 0x185   :  { %830 = vst.msk [vmem:[#allocation6 + $0x2e8] sm:$0xff] %vm798_vm3, %v669_v14  ;;  %v3918_v14 = vld [vmem:[#allocation2 + $0x2b2] sm:$0xff] }
 0x186   :  { %3011 = vst.msk [vmem:[#allocation6 + $0x328] sm:$0xff] %vm25_vm0, %v3918_v14 }
 0x187   :  { %1005 = vrot.lane.b32.xlu2 %v870_v1, %s3128_s13  ;;  %v3895_v1 = vld [vmem:[#allocation2 + $0x430] sm:$0xff]  ;;  %472 = vst.msk [vmem:[#allocation6 + $0x570] sm:$0xff] %vm25_vm0, %v3915_v13 }
 0x188   :  { %469 = vst.msk [vmem:[#allocation6 + $0x528] sm:$0xff] %vm25_vm0, %v3895_v1 }
 0x189   :  { %1007 = vrot.lane.b32.xlu0 %v871_v18, %s3128_s13  ;;  %v683_v20 = vpop.permute.xlu2 %682 }
 0x18a   :  { %1015 = vrot.lane.b32.xlu1 %v3733_v56, %s3128_s13  ;;  %837 = vst.msk [vmem:[#allocation6 + $0x390] sm:$0xff] %vm798_vm3, %v683_v20  ;;  %v887_v56 = vld [vmem:[#allocation2 + $0x1e2] sm:$0xff] }
 0x18b   :  { %v667_v22 = vpop.permute.xlu0 %666 }
 0x18c   :  { %829 = vst.msk [vmem:[#allocation6 + $0x2d0] sm:$0xff] %vm798_vm3, %v667_v22  ;;  %v675_v23 = vpop.permute.xlu1 %674  ;;  %v894_v22 = vld [vmem:[#allocation2 + $0x252] sm:$0xff] }
 0x18d   :  { %833 = vst.msk [vmem:[#allocation6 + $0x330] sm:$0xff] %vm798_vm3, %v675_v23  ;;  %v902_v23 = vld [vmem:[#allocation2 + $0x2f2] sm:$0xff] }
 0x18e   :  { %3007 = vst.msk [vmem:[#allocation6 + $0x2c8] sm:$0xff] %vm25_vm0, %v894_v22 }
 0x18f   :  { %1011 = vrot.lane.b32.xlu2 %v873_v12, %s3128_s13  ;;  %v899_v12 = vld [vmem:[#allocation2 + $0x2c2] sm:$0xff]  ;;  %3015 = vst.msk [vmem:[#allocation6 + $0x388] sm:$0xff] %vm25_vm0, %v902_v23 }
 0x190   :  { %3012 = vst.msk [vmem:[#allocation6 + $0x340] sm:$0xff] %vm25_vm0, %v899_v12 }
 0x191   :  { %1013 = vrot.lane.b32.xlu0 %v3741_v58, %s3128_s13  ;;  %v689_v29 = vpop.permute.xlu2 %688  ;;  %v3882_v58 = vld [vmem:[#allocation2 + $0x410] sm:$0xff] }
 0x192   :  { %1021 = vrot.lane.b32.xlu1 %v878_v3, %s3128_s13  ;;  %840 = vst.msk [vmem:[#allocation6 + $0x3d8] sm:$0xff] %vm798_vm3, %v689_v29  ;;  %v3900_v3 = vld [vmem:[#allocation2 + $0x420] sm:$0xff] }
 0x193   :  { %v673_v30 = vpop.permute.xlu0 %672  ;;  %467 = vst.msk [vmem:[#allocation6 + $0x4f8] sm:$0xff] %vm25_vm0, %v3882_v58  ;;  %v901_v29 = vld [vmem:[#allocation2 + $0x2e2] sm:$0xff] }
 0x194   :  { %832 = vst.msk [vmem:[#allocation6 + $0x318] sm:$0xff] %vm798_vm3, %v673_v30  ;;  %v681_v31 = vpop.permute.xlu1 %680  ;;  %v3945_v30 = vld [vmem:[#allocation2 + $0x4c0] sm:$0xff] }
 0x195   :  { %836 = vst.msk [vmem:[#allocation6 + $0x378] sm:$0xff] %vm798_vm3, %v681_v31 }
 0x196   :  { %468 = vst.msk [vmem:[#allocation6 + $0x510] sm:$0xff] %vm25_vm0, %v3900_v3 }
 0x197   :  { %1017 = vrot.lane.b32.xlu2 %v876_v21, %s3128_s13  ;;  %3014 = vst.msk [vmem:[#allocation6 + $0x370] sm:$0xff] %vm25_vm0, %v901_v29 }
 0x198   :  { %476 = vst.msk [vmem:[#allocation6 + $0x5d0] sm:$0xff] %vm25_vm0, %v3945_v30 }
 0x199   :  { %1019 = vrot.lane.b32.xlu0 %v3768_v7, %s3128_s13  ;;  %v695_v36 = vpop.permute.xlu2 %694 }
 0x19a   :  { %1027 = vrot.lane.b32.xlu1 %v881_v16, %s3128_s13  ;;  %843 = vst.msk [vmem:[#allocation6 + $0x420] sm:$0xff] %vm798_vm3, %v695_v36  ;;  %v3927_v16 = vld [vmem:[#allocation2 + $0x470] sm:$0xff]  ;;  %v3954_v36 = vld [vmem:[#allocation2 + $0x4a0] sm:$0xff] }
 0x19b   :  { %v679_v38 = vpop.permute.xlu0 %678  ;;  %471 = vst.msk [vmem:[#allocation6 + $0x558] sm:$0xff] %vm25_vm0, %v3927_v16 }
 0x19c   :  { %835 = vst.msk [vmem:[#allocation6 + $0x360] sm:$0xff] %vm798_vm3, %v679_v38  ;;  %v687_v39 = vpop.permute.xlu1 %686  ;;  %v895_v38 = vld [vmem:[#allocation2 + $0x282] sm:$0xff] }
 0x19d   :  { %839 = vst.msk [vmem:[#allocation6 + $0x3c0] sm:$0xff] %vm798_vm3, %v687_v39  ;;  %v897_v39 = vld [vmem:[#allocation2 + $0x2a2] sm:$0xff] }
 0x19e   :  { %474 = vst.msk [vmem:[#allocation6 + $0x5a0] sm:$0xff] %vm25_vm0, %v3954_v36 }
 0x19f   :  { %1023 = vrot.lane.b32.xlu2 %v879_v40, %s3128_s13  ;;  %v3960_v40 = vld [vmem:[#allocation2 + $0x4d0] sm:$0xff]  ;;  %3010 = vst.msk [vmem:[#allocation6 + $0x310] sm:$0xff] %vm25_vm0, %v897_v39 }
 0x1a0   :  { %477 = vst.msk [vmem:[#allocation6 + $0x5e8] sm:$0xff] %vm25_vm0, %v3960_v40 }
 0x1a1   :  { %1025 = vrot.lane.b32.xlu0 %v880_v45, %s3128_s13  ;;  %v701_v49 = vpop.permute.xlu2 %700 }
 0x1a2   :  { %1033 = vrot.lane.b32.xlu1 %v884_v24, %s3128_s13  ;;  %846 = vst.msk [vmem:[#allocation6 + $0x468] sm:$0xff] %vm798_vm3, %v701_v49  ;;  %v3940_v24 = vld [vmem:[#allocation2 + $0x4b0] sm:$0xff] }
 0x1a3   :  { %v685_v50 = vpop.permute.xlu0 %684  ;;  %475 = vst.msk [vmem:[#allocation6 + $0x5b8] sm:$0xff] %vm25_vm0, %v3940_v24 }
 0x1a4   :  { %838 = vst.msk [vmem:[#allocation6 + $0x3a8] sm:$0xff] %vm798_vm3, %v685_v50  ;;  %v693_v51 = vpop.permute.xlu1 %692  ;;  %v908_v50 = vld [vmem:[#allocation2 + $0x372] sm:$0xff] }
 0x1a5   :  { %842 = vst.msk [vmem:[#allocation6 + $0x408] sm:$0xff] %vm798_vm3, %v693_v51  ;;  %v907_v51 = vld [vmem:[#allocation2 + $0x362] sm:$0xff] }
 0x1a6   :  { %3021 = vst.msk [vmem:[#allocation6 + $0x418] sm:$0xff] %vm25_vm0, %v908_v50 }
 0x1a7   :  { %1029 = vrot.lane.b32.xlu2 %v882_v37, %s3128_s13  ;;  %3020 = vst.msk [vmem:[#allocation6 + $0x400] sm:$0xff] %vm25_vm0, %v907_v51 }
 0x1a9   :  { %1031 = vrot.lane.b32.xlu0 %v3811_v26, %s3128_s13  ;;  %v707_v59 = vpop.permute.xlu2 %706  ;;  %v896_v26 = vld [vmem:[#allocation2 + $0x292] sm:$0xff] }
 0x1aa   :  { %1039 = vrot.lane.b32.xlu1 %v887_v56, %s3128_s13  ;;  %849 = vst.msk [vmem:[#allocation6 + $0x4b0] sm:$0xff] %vm798_vm3, %v707_v59  ;;  %v906_v59 = vld [vmem:[#allocation2 + $0x352] sm:$0xff] }
 0x1ab   :  { %v691_v60 = vpop.permute.xlu0 %690  ;;  %3019 = vst.msk [vmem:[#allocation6 + $0x3e8] sm:$0xff] %vm25_vm0, %v906_v59 }
 0x1ac   :  { %841 = vst.msk [vmem:[#allocation6 + $0x3f0] sm:$0xff] %vm798_vm3, %v691_v60  ;;  %v699_v62 = vpop.permute.xlu1 %698  ;;  %v914_v60 = vld [vmem:[#allocation2 + $0x3f2] sm:$0xff] }
 0x1ad   :  { %845 = vst.msk [vmem:[#allocation6 + $0x450] sm:$0xff] %vm798_vm3, %v699_v62  ;;  %v913_v62 = vld [vmem:[#allocation2 + $0x3e2] sm:$0xff] }
 0x1ae   :  { %3027 = vst.msk [vmem:[#allocation6 + $0x4a8] sm:$0xff] %vm25_vm0, %v914_v60 }
 0x1af   :  { %1035 = vrot.lane.b32.xlu2 %v885_v52, %s3128_s13  ;;  %v910_v52 = vld [vmem:[#allocation2 + $0x392] sm:$0xff]  ;;  %3026 = vst.msk [vmem:[#allocation6 + $0x490] sm:$0xff] %vm25_vm0, %v913_v62 }
 0x1b0   :  { %3023 = vst.msk [vmem:[#allocation6 + $0x448] sm:$0xff] %vm25_vm0, %v910_v52 }
 0x1b1   :  { %1037 = vrot.lane.b32.xlu0 %v3834_v33, %s3128_s13  ;;  %v713_v4 = vpop.permute.xlu2 %712 }
 0x1b2   :  { %1045 = vrot.lane.b32.xlu1 %v890_v41, %s3128_s13  ;;  %852 = vst.msk [vmem:[#allocation6 + $0x4f8] sm:$0xff] %vm798_vm3, %v713_v4  ;;  %v905_v41 = vld [vmem:[#allocation2 + $0x342] sm:$0xff] }
 0x1b3   :  { %v697_v7 = vpop.permute.xlu0 %696  ;;  %3018 = vst.msk [vmem:[#allocation6 + $0x3d0] sm:$0xff] %vm25_vm0, %v905_v41 }
 0x1b4   :  { %844 = vst.msk [vmem:[#allocation6 + $0x438] sm:$0xff] %vm798_vm3, %v697_v7  ;;  %v705_v10 = vpop.permute.xlu1 %704  ;;  %v903_v7 = vld [vmem:[#allocation2 + $0x322] sm:$0xff] }
 0x1b5   :  { %848 = vst.msk [vmem:[#allocation6 + $0x498] sm:$0xff] %vm798_vm3, %v705_v10  ;;  %v909_v10 = vld [vmem:[#allocation2 + $0x382] sm:$0xff] }
 0x1b6   :  { %3022 = vst.msk [vmem:[#allocation6 + $0x430] sm:$0xff] %vm25_vm0, %v909_v10 }
 0x1b7   :  { %1041 = vrot.lane.b32.xlu2 %v888_v11, %s3128_s13  ;;  %v904_v11 = vld [vmem:[#allocation2 + $0x332] sm:$0xff] }
 0x1b9   :  { %1043 = vrot.lane.b32.xlu0 %v3859_v46, %s3128_s13  ;;  %v719_v18 = vpop.permute.xlu2 %718  ;;  %v900_v46 = vld [vmem:[#allocation2 + $0x2d2] sm:$0xff] }
 0x1ba   :  { %1051 = vrot.lane.b32.xlu1 %v893_v54, %s3128_s13  ;;  %855 = vst.msk [vmem:[#allocation6 + $0x540] sm:$0xff] %vm798_vm3, %v719_v18 }
 0x1bb   :  { %v703_v20 = vpop.permute.xlu0 %702  ;;  %3013 = vst.msk [vmem:[#allocation6 + $0x358] sm:$0xff] %vm25_vm0, %v900_v46 }
 0x1bc   :  { %847 = vst.msk [vmem:[#allocation6 + $0x480] sm:$0xff] %vm798_vm3, %v703_v20  ;;  %v711_v21 = vpop.permute.xlu1 %710 }
 0x1bd   :  { %851 = vst.msk [vmem:[#allocation6 + $0x4e0] sm:$0xff] %vm798_vm3, %v711_v21 }
 0x1bf   :  { %1047 = vrot.lane.b32.xlu2 %v891_v5, %s3128_s13 }
 0x1c1   :  { %1049 = vrot.lane.b32.xlu0 %v892_v57, %s3128_s13  ;;  %v725_v31 = vpop.permute.xlu2 %724 }
 0x1c2   :  { %1057 = vrot.lane.b32.xlu1 %v896_v26, %s3128_s13  ;;  %858 = vst.msk [vmem:[#allocation6 + $0x588] sm:$0xff] %vm798_vm3, %v725_v31  ;;  %v915_v31 = vld [vmem:[#allocation2 + $0x402] sm:$0xff] }
 0x1c3   :  { %v709_v33 = vpop.permute.xlu0 %708  ;;  %3028 = vst.msk [vmem:[#allocation6 + $0x4c0] sm:$0xff] %vm25_vm0, %v915_v31 }
 0x1c4   :  { %850 = vst.msk [vmem:[#allocation6 + $0x4c8] sm:$0xff] %vm798_vm3, %v709_v33  ;;  %v717_v37 = vpop.permute.xlu1 %716  ;;  %v923_v33 = vld [vmem:[#allocation2 + $0x4a2] sm:$0xff] }
 0x1c5   :  { %854 = vst.msk [vmem:[#allocation6 + $0x528] sm:$0xff] %vm798_vm3, %v717_v37  ;;  %v922_v37 = vld [vmem:[#allocation2 + $0x492] sm:$0xff] }
 0x1c6   :  { %3036 = vst.msk [vmem:[#allocation6 + $0x580] sm:$0xff] %vm25_vm0, %v923_v33 }
 0x1c7   :  { %1053 = vrot.lane.b32.xlu2 %v894_v22, %s3128_s13  ;;  %v911_v22 = vld [vmem:[#allocation2 + $0x3c2] sm:$0xff]  ;;  %3035 = vst.msk [vmem:[#allocation6 + $0x568] sm:$0xff] %vm25_vm0, %v922_v37 }
 0x1c9   :  { %1055 = vrot.lane.b32.xlu0 %v895_v38, %s3128_s13  ;;  %v731_v45 = vpop.permute.xlu2 %730 }
 0x1ca   :  { %1063 = vrot.lane.b32.xlu1 %v899_v12, %s3128_s13  ;;  %861 = vst.msk [vmem:[#allocation6 + $0x5d0] sm:$0xff] %vm798_vm3, %v731_v45  ;;  %v917_v12 = vld [vmem:[#allocation2 + $0x422] sm:$0xff]  ;;  %v912_v45 = vld [vmem:[#allocation2 + $0x3d2] sm:$0xff] }
 0x1cb   :  { %v715_v48 = vpop.permute.xlu0 %714  ;;  %3030 = vst.msk [vmem:[#allocation6 + $0x4f0] sm:$0xff] %vm25_vm0, %v917_v12 }
 0x1cc   :  { %853 = vst.msk [vmem:[#allocation6 + $0x510] sm:$0xff] %vm798_vm3, %v715_v48  ;;  %v723_v49 = vpop.permute.xlu1 %722  ;;  %v926_v48 = vld [vmem:[#allocation2 + $0x4d2] sm:$0xff] }
 0x1cd   :  { %857 = vst.msk [vmem:[#allocation6 + $0x570] sm:$0xff] %vm798_vm3, %v723_v49  ;;  %v925_v49 = vld [vmem:[#allocation2 + $0x4c2] sm:$0xff] }
 0x1ce   :  { %3039 = vst.msk [vmem:[#allocation6 + $0x5c8] sm:$0xff] %vm25_vm0, %v926_v48 }
 0x1cf   :  { %1059 = vrot.lane.b32.xlu2 %v897_v39, %s3128_s13  ;;  %3038 = vst.msk [vmem:[#allocation6 + $0x5b0] sm:$0xff] %vm25_vm0, %v925_v49 }
 0x1d1   :  { %1061 = vrot.lane.b32.xlu0 %v3918_v14, %s3128_s13  ;;  %v994_v54 = vpop.permute.xlu2 %993  ;;  %v916_v14 = vld [vmem:[#allocation2 + $0x412] sm:$0xff] }
 0x1d2   :  { %1069 = vrot.lane.b32.xlu1 %v902_v23, %s3128_s13  ;;  %1185 = vst.msk [vmem:[#allocation6 + $0x18] sm:$0xff] %vm1183_vm4, %v994_v54  ;;  %v921_v54 = vld [vmem:[#allocation2 + $0x482] sm:$0xff] }
 0x1d3   :  { %v721_v56 = vpop.permute.xlu0 %720  ;;  %3029 = vst.msk [vmem:[#allocation6 + $0x4d8] sm:$0xff] %vm25_vm0, %v916_v14 }
 0x1d4   :  { %856 = vst.msk [vmem:[#allocation6 + $0x558] sm:$0xff] %vm798_vm3, %v721_v56  ;;  %v729_v57 = vpop.permute.xlu1 %728  ;;  %v920_v56 = vld [vmem:[#allocation2 + $0x472] sm:$0xff] }
 0x1d5   :  { %860 = vst.msk [vmem:[#allocation6 + $0x5b8] sm:$0xff] %vm798_vm3, %v729_v57 }
 0x1d6   :  { %3034 = vst.msk [vmem:[#allocation6 + $0x550] sm:$0xff] %vm25_vm0, %v921_v54 }
 0x1d7   :  { %1065 = vrot.lane.b32.xlu2 %v900_v46, %s3128_s13  ;;  %v918_v46 = vld [vmem:[#allocation2 + $0x432] sm:$0xff] }
 0x1d8   :  { %3031 = vst.msk [vmem:[#allocation6 + $0x508] sm:$0xff] %vm25_vm0, %v918_v46 }
 0x1d9   :  { %1067 = vrot.lane.b32.xlu0 %v901_v29, %s3128_s13  ;;  %v1000_v2 = vpop.permute.xlu2 %999 }
 0x1da   :  { %1075 = vrot.lane.b32.xlu1 %v905_v41, %s3128_s13  ;;  %1188 = vst.msk [vmem:[#allocation6 + $0x60] sm:$0xff] %vm1183_vm4, %v1000_v2  ;;  %v919_v2 = vld [vmem:[#allocation2 + $0x462] sm:$0xff] }
 0x1db   :  { %v727_v4 = vpop.permute.xlu0 %726 }
 0x1dc   :  { %859 = vst.msk [vmem:[#allocation6 + $0x5a0] sm:$0xff] %vm798_vm3, %v727_v4  ;;  %v992_v5 = vpop.permute.xlu1 %991  ;;  %v228_v4 = vld [vmem:[#allocation3 + $0x38] sm:$0xff] }
 0x1dd   :  { %1184 = vst.msk [vmem:[#allocation6] sm:$0xff] %vm1183_vm4, %v992_v5 }
 0x1de   :  { %293 = vst.msk [vmem:[#allocation2 + $0x81] sm:$0xff] %vm25_vm0, %v228_v4 }
 0x1df   :  { %1071 = vrot.lane.b32.xlu2 %v903_v7, %s3128_s13 }
 0x1e1   :  { %1073 = vrot.lane.b32.xlu0 %v904_v11, %s3128_s13  ;;  %v1006_v18 = vpop.permute.xlu2 %1005 }
 0x1e2   :  { %1081 = vrot.lane.b32.xlu1 %v908_v50, %s3128_s13  ;;  %1191 = vst.msk [vmem:[#allocation6 + $0xa8] sm:$0xff] %vm1183_vm4, %v1006_v18  ;;  %v1250_v18 = vld [vmem:[#allocation2 + $0x30] sm:$0xff] }
 0x1e3   :  { %v733_v20 = vpop.permute.xlu0 %732 }
 0x1e4   :  { %862 = vst.msk [vmem:[#allocation6 + $0x5e8] sm:$0xff] %vm798_vm3, %v733_v20  ;;  %v998_v21 = vpop.permute.xlu1 %997 }
 0x1e5   :  { %1187 = vst.msk [vmem:[#allocation6 + $0x48] sm:$0xff] %vm1183_vm4, %v998_v21 }
 0x1e7   :  { %1077 = vrot.lane.b32.xlu2 %v906_v59, %s3128_s13 }
 0x1e9   :  { %1079 = vrot.lane.b32.xlu0 %v907_v51, %s3128_s13  ;;  %v1012_v23 = vpop.permute.xlu2 %1011 }
 0x1ea   :  { %1087 = vrot.lane.b32.xlu1 %v911_v22, %s3128_s13  ;;  %1194 = vst.msk [vmem:[#allocation6 + $0xf0] sm:$0xff] %vm1183_vm4, %v1012_v23  ;;  %v1248_v23 = vld [vmem:[#allocation2 + $0x10] sm:$0xff] }
 0x1eb   :  { %v996_v26 = vpop.permute.xlu0 %995 }
 0x1ec   :  { %1186 = vst.msk [vmem:[#allocation6 + $0x30] sm:$0xff] %vm1183_vm4, %v996_v26  ;;  %v1004_v29 = vpop.permute.xlu1 %1003  ;;  %v1249_v26 = vld [vmem:[#allocation2 + $0x20] sm:$0xff] }
 0x1ed   :  { %1190 = vst.msk [vmem:[#allocation6 + $0x90] sm:$0xff] %vm1183_vm4, %v1004_v29  ;;  %v1253_v29 = vld [vmem:[#allocation2 + $0x60] sm:$0xff] }
 0x1ef   :  { %1083 = vrot.lane.b32.xlu2 %v909_v10, %s3128_s13 }
 0x1f1   :  { %1085 = vrot.lane.b32.xlu0 %v910_v52, %s3128_s13  ;;  %v1018_v38 = vpop.permute.xlu2 %1017 }
 0x1f2   :  { %1093 = vrot.lane.b32.xlu1 %v914_v60, %s3128_s13  ;;  %1197 = vst.msk [vmem:[#allocation6 + $0x138] sm:$0xff] %vm1183_vm4, %v1018_v38  ;;  %v1251_v38 = vld [vmem:[#allocation2 + $0x40] sm:$0xff] }
 0x1f3   :  { %v1002_v39 = vpop.permute.xlu0 %1001 }
 0x1f4   :  { %1189 = vst.msk [vmem:[#allocation6 + $0x78] sm:$0xff] %vm1183_vm4, %v1002_v39  ;;  %v1010_v41 = vpop.permute.xlu1 %1009  ;;  %v1252_v39 = vld [vmem:[#allocation2 + $0x50] sm:$0xff] }
 0x1f5   :  { %1193 = vst.msk [vmem:[#allocation6 + $0xd8] sm:$0xff] %vm1183_vm4, %v1010_v41  ;;  %v1256_v41 = vld [vmem:[#allocation2 + $0xb0] sm:$0xff] }
 0x1f7   :  { %1089 = vrot.lane.b32.xlu2 %v912_v45, %s3128_s13 }
 0x1f9   :  { %1091 = vrot.lane.b32.xlu0 %v913_v62, %s3128_s13  ;;  %v1024_v50 = vpop.permute.xlu2 %1023  ;;  %v924_v62 = vld [vmem:[#allocation2 + $0x4b2] sm:$0xff] }
 0x1fa   :  { %1099 = vrot.lane.b32.xlu1 %v917_v12, %s3128_s13  ;;  %1200 = vst.msk [vmem:[#allocation6 + $0x180] sm:$0xff] %vm1183_vm4, %v1024_v50  ;;  %v1255_v50 = vld [vmem:[#allocation2 + $0x80] sm:$0xff] }
 0x1fb   :  { %v1008_v51 = vpop.permute.xlu0 %1007  ;;  %3037 = vst.msk [vmem:[#allocation6 + $0x598] sm:$0xff] %vm25_vm0, %v924_v62 }
 0x1fc   :  { %1192 = vst.msk [vmem:[#allocation6 + $0xc0] sm:$0xff] %vm1183_vm4, %v1008_v51  ;;  %v1016_v52 = vpop.permute.xlu1 %1015  ;;  %v1259_v51 = vld [vmem:[#allocation2 + $0xe0] sm:$0xff] }
 0x1fd   :  { %1196 = vst.msk [vmem:[#allocation6 + $0x120] sm:$0xff] %vm1183_vm4, %v1016_v52  ;;  %v236_v52 = vld [vmem:[#allocation3 + $0x78] sm:$0xff] }
 0x1fe   :  { %301 = vst.msk [vmem:[#allocation2 + $0x121] sm:$0xff] %vm25_vm0, %v236_v52 }
 0x1ff   :  { %1095 = vrot.lane.b32.xlu2 %v915_v31, %s3128_s13 }
 0x201   :  { %1097 = vrot.lane.b32.xlu0 %v916_v14, %s3128_s13  ;;  %v1030_v57 = vpop.permute.xlu2 %1029 }
 0x202   :  { %1105 = vrot.lane.b32.xlu1 %v920_v56, %s3128_s13  ;;  %1203 = vst.msk [vmem:[#allocation6 + $0x1c8] sm:$0xff] %vm1183_vm4, %v1030_v57 }
 0x203   :  { %v1014_v59 = vpop.permute.xlu0 %1013 }
 0x204   :  { %1195 = vst.msk [vmem:[#allocation6 + $0x108] sm:$0xff] %vm1183_vm4, %v1014_v59  ;;  %v1022_v60 = vpop.permute.xlu1 %1021 }
 0x205   :  { %1199 = vst.msk [vmem:[#allocation6 + $0x168] sm:$0xff] %vm1183_vm4, %v1022_v60  ;;  %v1257_v60 = vld [vmem:[#allocation2 + $0xc0] sm:$0xff] }
 0x207   :  { %1101 = vrot.lane.b32.xlu2 %v918_v46, %s3128_s13 }
 0x209   :  { %1103 = vrot.lane.b32.xlu0 %v919_v2, %s3128_s13  ;;  %v1036_v5 = vpop.permute.xlu2 %1035  ;;  %v1262_v2 = vld [vmem:[#allocation2 + $0x110] sm:$0xff] }
 0x20a   :  { %1111 = vrot.lane.b32.xlu1 %v923_v33, %s3128_s13  ;;  %1206 = vst.msk [vmem:[#allocation6 + $0x210] sm:$0xff] %vm1183_vm4, %v1036_v5 }
 0x20b   :  { %v1020_v7 = vpop.permute.xlu0 %1019 }
 0x20c   :  { %1198 = vst.msk [vmem:[#allocation6 + $0x150] sm:$0xff] %vm1183_vm4, %v1020_v7  ;;  %v1028_v10 = vpop.permute.xlu1 %1027 }
 0x20d   :  { %1202 = vst.msk [vmem:[#allocation6 + $0x1b0] sm:$0xff] %vm1183_vm4, %v1028_v10  ;;  %v1260_v10 = vld [vmem:[#allocation2 + $0xf0] sm:$0xff] }
 0x20f   :  { %1107 = vrot.lane.b32.xlu2 %v921_v54, %s3128_s13  ;;  %v244_v54 = vld [vmem:[#allocation3 + $0xb8] sm:$0xff] }
 0x210   :  { %309 = vst.msk [vmem:[#allocation2 + $0x1c1] sm:$0xff] %vm25_vm0, %v244_v54  ;;  %v1272_v54 = vld [vmem:[#allocation2 + $0x1f0] sm:$0xff] }
 0x211   :  { %1109 = vrot.lane.b32.xlu0 %v922_v37, %s3128_s13  ;;  %v1042_v11 = vpop.permute.xlu2 %1041 }
 0x212   :  { %1117 = vrot.lane.b32.xlu1 %v926_v48, %s3128_s13  ;;  %1209 = vst.msk [vmem:[#allocation6 + $0x258] sm:$0xff] %vm1183_vm4, %v1042_v11  ;;  %v1261_v11 = vld [vmem:[#allocation2 + $0x100] sm:$0xff] }
 0x213   :  { %v1026_v12 = vpop.permute.xlu0 %1025 }
 0x214   :  { %1201 = vst.msk [vmem:[#allocation6 + $0x198] sm:$0xff] %vm1183_vm4, %v1026_v12  ;;  %v1034_v14 = vpop.permute.xlu1 %1033  ;;  %v1265_v12 = vld [vmem:[#allocation2 + $0x160] sm:$0xff] }
 0x215   :  { %1205 = vst.msk [vmem:[#allocation6 + $0x1f8] sm:$0xff] %vm1183_vm4, %v1034_v14 }
 0x217   :  { %1113 = vrot.lane.b32.xlu2 %v924_v62, %s3128_s13  ;;  %v1258_v62 = vld [vmem:[#allocation2 + $0xd0] sm:$0xff] }
 0x219   :  { %1115 = vrot.lane.b32.xlu0 %v925_v49, %s3128_s13  ;;  %v1048_v20 = vpop.permute.xlu2 %1047  ;;  %v1254_v49 = vld [vmem:[#allocation2 + $0x70] sm:$0xff] }
 0x21a   :  { %1380 = vrot.lane.b32.xlu1 %v1250_v18, %s3129_s14  ;;  %1212 = vst.msk [vmem:[#allocation6 + $0x2a0] sm:$0xff] %vm1183_vm4, %v1048_v20 }
 0x21b   :  { %v1032_v21 = vpop.permute.xlu0 %1031 }
 0x21c   :  { %1204 = vst.msk [vmem:[#allocation6 + $0x1e0] sm:$0xff] %vm1183_vm4, %v1032_v21  ;;  %v1040_v22 = vpop.permute.xlu1 %1039  ;;  %v1263_v21 = vld [vmem:[#allocation2 + $0x120] sm:$0xff] }
 0x21d   :  { %1208 = vst.msk [vmem:[#allocation6 + $0x240] sm:$0xff] %vm1183_vm4, %v1040_v22  ;;  %v1264_v22 = vld [vmem:[#allocation2 + $0x150] sm:$0xff] }
 0x21f   :  { %1376 = vrot.lane.b32.xlu2 %v1248_v23, %s3129_s14  ;;  %v1268_v23 = vld [vmem:[#allocation2 + $0x190] sm:$0xff] }
 0x221   :  { %1378 = vrot.lane.b32.xlu0 %v1249_v26, %s3129_s14  ;;  %v1054_v31 = vpop.permute.xlu2 %1053  ;;  %v252_v26 = vld [vmem:[#allocation3 + $0xf8] sm:$0xff] }
 0x222   :  { %1386 = vrot.lane.b32.xlu1 %v1253_v29, %s3129_s14  ;;  %1215 = vst.msk [vmem:[#allocation6 + $0x2e8] sm:$0xff] %vm1183_vm4, %v1054_v31 }
 0x223   :  { %v1038_v33 = vpop.permute.xlu0 %1037  ;;  %317 = vst.msk [vmem:[#allocation2 + $0x261] sm:$0xff] %vm25_vm0, %v252_v26 }
 0x224   :  { %1207 = vst.msk [vmem:[#allocation6 + $0x228] sm:$0xff] %vm1183_vm4, %v1038_v33  ;;  %v1046_v37 = vpop.permute.xlu1 %1045 }
 0x225   :  { %1211 = vst.msk [vmem:[#allocation6 + $0x288] sm:$0xff] %vm1183_vm4, %v1046_v37  ;;  %v1266_v37 = vld [vmem:[#allocation2 + $0x170] sm:$0xff] }
 0x227   :  { %1382 = vrot.lane.b32.xlu2 %v1251_v38, %s3129_s14  ;;  %v1267_v38 = vld [vmem:[#allocation2 + $0x180] sm:$0xff] }
 0x229   :  { %1384 = vrot.lane.b32.xlu0 %v1252_v39, %s3129_s14  ;;  %v1060_v45 = vpop.permute.xlu2 %1059  ;;  %v1271_v39 = vld [vmem:[#allocation2 + $0x1c0] sm:$0xff] }
 0x22a   :  { %1392 = vrot.lane.b32.xlu1 %v1256_v41, %s3129_s14  ;;  %1218 = vst.msk [vmem:[#allocation6 + $0x330] sm:$0xff] %vm1183_vm4, %v1060_v45 }
 0x22b   :  { %v1044_v46 = vpop.permute.xlu0 %1043 }
 0x22c   :  { %1210 = vst.msk [vmem:[#allocation6 + $0x270] sm:$0xff] %vm1183_vm4, %v1044_v46  ;;  %v1052_v48 = vpop.permute.xlu1 %1051 }
 0x22d   :  { %1214 = vst.msk [vmem:[#allocation6 + $0x2d0] sm:$0xff] %vm1183_vm4, %v1052_v48  ;;  %v1269_v48 = vld [vmem:[#allocation2 + $0x1a0] sm:$0xff] }
 0x22f   :  { %1388 = vrot.lane.b32.xlu2 %v1254_v49, %s3129_s14  ;;  %v1270_v49 = vld [vmem:[#allocation2 + $0x1b0] sm:$0xff] }
 0x231   :  { %1390 = vrot.lane.b32.xlu0 %v1255_v50, %s3129_s14  ;;  %v1066_v56 = vpop.permute.xlu2 %1065 }
 0x232   :  { %1398 = vrot.lane.b32.xlu1 %v1259_v51, %s3129_s14  ;;  %1221 = vst.msk [vmem:[#allocation6 + $0x378] sm:$0xff] %vm1183_vm4, %v1066_v56  ;;  %v1273_v56 = vld [vmem:[#allocation2 + $0x200] sm:$0xff] }
 0x233   :  { %v1050_v57 = vpop.permute.xlu0 %1049 }
 0x234   :  { %1213 = vst.msk [vmem:[#allocation6 + $0x2b8] sm:$0xff] %vm1183_vm4, %v1050_v57  ;;  %v1058_v59 = vpop.permute.xlu1 %1057 }
 0x235   :  { %1217 = vst.msk [vmem:[#allocation6 + $0x318] sm:$0xff] %vm1183_vm4, %v1058_v59 }
 0x237   :  { %1394 = vrot.lane.b32.xlu2 %v1257_v60, %s3129_s14  ;;  %v1275_v60 = vld [vmem:[#allocation2 + $0x220] sm:$0xff] }
 0x239   :  { %1396 = vrot.lane.b32.xlu0 %v1258_v62, %s3129_s14  ;;  %v1072_v4 = vpop.permute.xlu2 %1071 }
 0x23a   :  { %1404 = vrot.lane.b32.xlu1 %v1262_v2, %s3129_s14  ;;  %1224 = vst.msk [vmem:[#allocation6 + $0x3c0] sm:$0xff] %vm1183_vm4, %v1072_v4  ;;  %v1278_v4 = vld [vmem:[#allocation2 + $0x250] sm:$0xff] }
 0x23b   :  { %v1056_v5 = vpop.permute.xlu0 %1055 }
 0x23c   :  { %1216 = vst.msk [vmem:[#allocation6 + $0x300] sm:$0xff] %vm1183_vm4, %v1056_v5  ;;  %v1064_v7 = vpop.permute.xlu1 %1063  ;;  %v1279_v5 = vld [vmem:[#allocation2 + $0x260] sm:$0xff] }
 0x23d   :  { %1220 = vst.msk [vmem:[#allocation6 + $0x360] sm:$0xff] %vm1183_vm4, %v1064_v7  ;;  %v260_v7 = vld [vmem:[#allocation3 + $0x138] sm:$0xff] }
 0x23e   :  { %325 = vst.msk [vmem:[#allocation2 + $0x301] sm:$0xff] %vm25_vm0, %v260_v7 }
 0x23f   :  { %1400 = vrot.lane.b32.xlu2 %v1260_v10, %s3129_s14  ;;  %v268_v10 = vld [vmem:[#allocation3 + $0x178] sm:$0xff] }
 0x240   :  { %333 = vst.msk [vmem:[#allocation2 + $0x3a1] sm:$0xff] %vm25_vm0, %v268_v10 }
 0x241   :  { %1402 = vrot.lane.b32.xlu0 %v1261_v11, %s3129_s14  ;;  %v1078_v14 = vpop.permute.xlu2 %1077 }
 0x242   :  { %1410 = vrot.lane.b32.xlu1 %v1265_v12, %s3129_s14  ;;  %1227 = vst.msk [vmem:[#allocation6 + $0x408] sm:$0xff] %vm1183_vm4, %v1078_v14  ;;  %v1281_v12 = vld [vmem:[#allocation2 + $0x2a0] sm:$0xff] }
 0x243   :  { %v1062_v18 = vpop.permute.xlu0 %1061 }
 0x244   :  { %1219 = vst.msk [vmem:[#allocation6 + $0x348] sm:$0xff] %vm1183_vm4, %v1062_v18  ;;  %v1070_v20 = vpop.permute.xlu1 %1069 }
 0x245   :  { %1223 = vst.msk [vmem:[#allocation6 + $0x3a8] sm:$0xff] %vm1183_vm4, %v1070_v20 }
 0x247   :  { %1406 = vrot.lane.b32.xlu2 %v1263_v21, %s3129_s14  ;;  %v1287_v21 = vld [vmem:[#allocation2 + $0x300] sm:$0xff] }
 0x249   :  { %1408 = vrot.lane.b32.xlu0 %v1264_v22, %s3129_s14  ;;  %v1084_v29 = vpop.permute.xlu2 %1083  ;;  %v276_v22 = vld [vmem:[#allocation3 + $0x1b8] sm:$0xff] }
 0x24a   :  { %1416 = vrot.lane.b32.xlu1 %v1268_v23, %s3129_s14  ;;  %1230 = vst.msk [vmem:[#allocation6 + $0x450] sm:$0xff] %vm1183_vm4, %v1084_v29  ;;  %v1295_v23 = vld [vmem:[#allocation2 + $0x3a0] sm:$0xff] }
 0x24b   :  { %v1068_v31 = vpop.permute.xlu0 %1067  ;;  %341 = vst.msk [vmem:[#allocation2 + $0x441] sm:$0xff] %vm25_vm0, %v276_v22 }
 0x24c   :  { %1222 = vst.msk [vmem:[#allocation6 + $0x390] sm:$0xff] %vm1183_vm4, %v1068_v31  ;;  %v1076_v33 = vpop.permute.xlu1 %1075 }
 0x24d   :  { %1226 = vst.msk [vmem:[#allocation6 + $0x3f0] sm:$0xff] %vm1183_vm4, %v1076_v33 }
 0x24f   :  { %1412 = vrot.lane.b32.xlu2 %v1266_v37, %s3129_s14  ;;  %v1768_v37 = vld [vmem:[#allocation2 + $0x82] sm:$0xff] }
 0x250   :  { %2984 = vst.msk [vmem:[#allocation6 + $0xa0] sm:$0xff] %vm25_vm0, %v1768_v37 }
 0x251   :  { %1414 = vrot.lane.b32.xlu0 %v1267_v38, %s3129_s14  ;;  %v1090_v41 = vpop.permute.xlu2 %1089 }
 0x252   :  { %1422 = vrot.lane.b32.xlu1 %v1271_v39, %s3129_s14  ;;  %1233 = vst.msk [vmem:[#allocation6 + $0x498] sm:$0xff] %vm1183_vm4, %v1090_v41  ;;  %v1303_v31 = vld [vmem:[#allocation2 + $0x440] sm:$0xff] }
 0x253   :  { %v1074_v45 = vpop.permute.xlu0 %1073  ;;  %v1762_v39 = vld [vmem:[#allocation2 + $0x22] sm:$0xff] }
 0x254   :  { %1225 = vst.msk [vmem:[#allocation6 + $0x3d8] sm:$0xff] %vm1183_vm4, %v1074_v45  ;;  %v1082_v46 = vpop.permute.xlu1 %1081  ;;  %v1761_v45 = vld [vmem:[#allocation2 + $0x12] sm:$0xff] }
 0x255   :  { %1229 = vst.msk [vmem:[#allocation6 + $0x438] sm:$0xff] %vm1183_vm4, %v1082_v46  ;;  %v1765_v46 = vld [vmem:[#allocation2 + $0x52] sm:$0xff] }
 0x257   :  { %1418 = vrot.lane.b32.xlu2 %v1269_v48, %s3129_s14 }
 0x259   :  { %1420 = vrot.lane.b32.xlu0 %v1270_v49, %s3129_s14  ;;  %v1096_v50 = vpop.permute.xlu2 %1095  ;;  %v1763_v49 = vld [vmem:[#allocation2 + $0x32] sm:$0xff] }
 0x25a   :  { %1428 = vrot.lane.b32.xlu1 %v3712_v44, %s3129_s14  ;;  %1236 = vst.msk [vmem:[#allocation6 + $0x4e0] sm:$0xff] %vm1183_vm4, %v1096_v50  ;;  %v1776_v50 = vld [vmem:[#allocation2 + $0x122] sm:$0xff] }
 0x25b   :  { %v1080_v51 = vpop.permute.xlu0 %1079  ;;  %2992 = vst.msk [vmem:[#allocation6 + $0x160] sm:$0xff] %vm25_vm0, %v1776_v50 }
 0x25c   :  { %1228 = vst.msk [vmem:[#allocation6 + $0x420] sm:$0xff] %vm1183_vm4, %v1080_v51  ;;  %v1088_v52 = vpop.permute.xlu1 %1087  ;;  %v1764_v51 = vld [vmem:[#allocation2 + $0x42] sm:$0xff] }
 0x25d   :  { %1232 = vst.msk [vmem:[#allocation6 + $0x480] sm:$0xff] %vm1183_vm4, %v1088_v52 }
 0x25f   :  { %1424 = vrot.lane.b32.xlu2 %v1272_v54, %s3129_s14 }
 0x261   :  { %1426 = vrot.lane.b32.xlu0 %v1273_v56, %s3129_s14  ;;  %v1102_v57 = vpop.permute.xlu2 %1101 }
 0x262   :  { %1434 = vrot.lane.b32.xlu1 %v3725_v53, %s3129_s14  ;;  %1239 = vst.msk [vmem:[#allocation6 + $0x528] sm:$0xff] %vm1183_vm4, %v1102_v57  ;;  %v1766_v57 = vld [vmem:[#allocation2 + $0x62] sm:$0xff] }
 0x263   :  { %v1086_v44 = vpop.permute.xlu0 %1085 }
 0x264   :  { %1231 = vst.msk [vmem:[#allocation6 + $0x468] sm:$0xff] %vm1183_vm4, %v1086_v44  ;;  %v1094_v59 = vpop.permute.xlu1 %1093  ;;  %v1767_v44 = vld [vmem:[#allocation2 + $0x72] sm:$0xff] }
 0x265   :  { %1235 = vst.msk [vmem:[#allocation6 + $0x4c8] sm:$0xff] %vm1183_vm4, %v1094_v59  ;;  %v1771_v59 = vld [vmem:[#allocation2 + $0xd2] sm:$0xff] }
 0x267   :  { %1430 = vrot.lane.b32.xlu2 %v1275_v60, %s3129_s14 }
 0x269   :  { %1432 = vrot.lane.b32.xlu0 %v3709_v43, %s3129_s14  ;;  %v1108_v62 = vpop.permute.xlu2 %1107 }
 0x26a   :  { %1440 = vrot.lane.b32.xlu1 %v3749_v0, %s3129_s14  ;;  %1242 = vst.msk [vmem:[#allocation6 + $0x570] sm:$0xff] %vm1183_vm4, %v1108_v62 }
 0x26b   :  { %v1092_v53 = vpop.permute.xlu0 %1091 }
 0x26c   :  { %1234 = vst.msk [vmem:[#allocation6 + $0x4b0] sm:$0xff] %vm1183_vm4, %v1092_v53  ;;  %v1100_v2 = vpop.permute.xlu1 %1099 }
 0x26d   :  { %1238 = vst.msk [vmem:[#allocation6 + $0x510] sm:$0xff] %vm1183_vm4, %v1100_v2  ;;  %v1769_v2 = vld [vmem:[#allocation2 + $0xb2] sm:$0xff] }
 0x26f   :  { %1436 = vrot.lane.b32.xlu2 %v1278_v4, %s3129_s14  ;;  %v1770_v4 = vld [vmem:[#allocation2 + $0xc2] sm:$0xff] }
 0x271   :  { %1438 = vrot.lane.b32.xlu0 %v1279_v5, %s3129_s14  ;;  %v1114_v43 = vpop.permute.xlu2 %1113  ;;  %v1774_v5 = vld [vmem:[#allocation2 + $0x102] sm:$0xff] }
 0x272   :  { %1446 = vrot.lane.b32.xlu1 %v3774_v9, %s3129_s14  ;;  %1245 = vst.msk [vmem:[#allocation6 + $0x5b8] sm:$0xff] %vm1183_vm4, %v1114_v43 }
 0x273   :  { %v1098_v0 = vpop.permute.xlu0 %1097 }
 0x274   :  { %1237 = vst.msk [vmem:[#allocation6 + $0x4f8] sm:$0xff] %vm1183_vm4, %v1098_v0  ;;  %v1106_v11 = vpop.permute.xlu1 %1105  ;;  %v1772_v0 = vld [vmem:[#allocation2 + $0xe2] sm:$0xff] }
 0x275   :  { %1241 = vst.msk [vmem:[#allocation6 + $0x558] sm:$0xff] %vm1183_vm4, %v1106_v11  ;;  %v1773_v11 = vld [vmem:[#allocation2 + $0xf2] sm:$0xff] }
 0x277   :  { %1442 = vrot.lane.b32.xlu2 %v1281_v12, %s3129_s14  ;;  %v1777_v12 = vld [vmem:[#allocation2 + $0x152] sm:$0xff] }
 0x279   :  { %1444 = vrot.lane.b32.xlu0 %v3746_v63, %s3129_s14  ;;  %v1377_v14 = vpop.permute.xlu2 %1376 }
 0x27a   :  { %1452 = vrot.lane.b32.xlu1 %v3793_v19, %s3129_s14  ;;  %1569 = vst.msk [vmem:[#allocation6] sm:$0xff] %vm1568_vm5, %v1377_v14 }
 0x27b   :  { %v1104_v9 = vpop.permute.xlu0 %1103 }
 0x27c   :  { %1240 = vst.msk [vmem:[#allocation6 + $0x540] sm:$0xff] %vm1183_vm4, %v1104_v9  ;;  %v1112_v18 = vpop.permute.xlu1 %1111 }
 0x27d   :  { %1244 = vst.msk [vmem:[#allocation6 + $0x5a0] sm:$0xff] %vm1183_vm4, %v1112_v18 }
 0x27f   :  { %1448 = vrot.lane.b32.xlu2 %v3765_v6, %s3129_s14 }
 0x281   :  { %1450 = vrot.lane.b32.xlu0 %v3770_v8, %s3129_s14  ;;  %v1383_v20 = vpop.permute.xlu2 %1382 }
 0x282   :  { %1458 = vrot.lane.b32.xlu1 %v3820_v28, %s3129_s14  ;;  %1572 = vst.msk [vmem:[#allocation6 + $0x48] sm:$0xff] %vm1568_vm5, %v1383_v20  ;;  %v1775_v20 = vld [vmem:[#allocation2 + $0x112] sm:$0xff] }
 0x283   :  { %v1110_v63 = vpop.permute.xlu0 %1109 }
 0x284   :  { %1243 = vst.msk [vmem:[#allocation6 + $0x588] sm:$0xff] %vm1183_vm4, %v1110_v63  ;;  %v1118_v19 = vpop.permute.xlu1 %1117  ;;  %v1780_v63 = vld [vmem:[#allocation2 + $0x182] sm:$0xff] }
 0x285   :  { %1247 = vst.msk [vmem:[#allocation6 + $0x5e8] sm:$0xff] %vm1183_vm4, %v1118_v19 }
 0x287   :  { %1454 = vrot.lane.b32.xlu2 %v1287_v21, %s3129_s14 }
 0x289   :  { %1456 = vrot.lane.b32.xlu0 %v3790_v17, %s3129_s14  ;;  %v1389_v6 = vpop.permute.xlu2 %1388 }
 0x28a   :  { %1464 = vrot.lane.b32.xlu1 %v3840_v35, %s3129_s14  ;;  %1575 = vst.msk [vmem:[#allocation6 + $0x90] sm:$0xff] %vm1568_vm5, %v1389_v6  ;;  %v1778_v6 = vld [vmem:[#allocation2 + $0x162] sm:$0xff] }
 0x28b   :  { %v1116_v8 = vpop.permute.xlu0 %1115 }
 0x28c   :  { %1246 = vst.msk [vmem:[#allocation6 + $0x5d0] sm:$0xff] %vm1183_vm4, %v1116_v8  ;;  %v1381_v28 = vpop.permute.xlu1 %1380  ;;  %v1784_v8 = vld [vmem:[#allocation2 + $0x1c2] sm:$0xff] }
 0x28d   :  { %1571 = vst.msk [vmem:[#allocation6 + $0x30] sm:$0xff] %vm1568_vm5, %v1381_v28  ;;  %v1779_v28 = vld [vmem:[#allocation2 + $0x172] sm:$0xff] }
 0x28e   :  { %3000 = vst.msk [vmem:[#allocation6 + $0x220] sm:$0xff] %vm25_vm0, %v1784_v8 }
 0x28f   :  { %1460 = vrot.lane.b32.xlu2 %v3808_v25, %s3129_s14 }
 0x291   :  { %1462 = vrot.lane.b32.xlu0 %v3813_v27, %s3129_s14  ;;  %v1395_v17 = vpop.permute.xlu2 %1394 }
 0x292   :  { %1470 = vrot.lane.b32.xlu1 %v1295_v23, %s3129_s14  ;;  %1578 = vst.msk [vmem:[#allocation6 + $0xd8] sm:$0xff] %vm1568_vm5, %v1395_v17  ;;  %v1792_v23 = vld [vmem:[#allocation2 + $0x262] sm:$0xff]  ;;  %v1783_v17 = vld [vmem:[#allocation2 + $0x1b2] sm:$0xff] }
 0x293   :  { %v1379_v35 = vpop.permute.xlu0 %1378  ;;  %3008 = vst.msk [vmem:[#allocation6 + $0x2e0] sm:$0xff] %vm25_vm0, %v1792_v23 }
 0x294   :  { %1570 = vst.msk [vmem:[#allocation6 + $0x18] sm:$0xff] %vm1568_vm5, %v1379_v35  ;;  %v1387_v26 = vpop.permute.xlu1 %1386 }
 0x295   :  { %1574 = vst.msk [vmem:[#allocation6 + $0x78] sm:$0xff] %vm1568_vm5, %v1387_v26 }
 0x297   :  { %1466 = vrot.lane.b32.xlu2 %v3831_v32, %s3129_s14 }
 0x299   :  { %1468 = vrot.lane.b32.xlu0 %v3836_v34, %s3129_s14  ;;  %v1401_v25 = vpop.permute.xlu2 %1400 }
 0x29a   :  { %1476 = vrot.lane.b32.xlu1 %v3892_v61, %s3129_s14  ;;  %1581 = vst.msk [vmem:[#allocation6 + $0x120] sm:$0xff] %vm1568_vm5, %v1401_v25 }
 0x29b   :  { %v1385_v27 = vpop.permute.xlu0 %1384 }
 0x29c   :  { %1573 = vst.msk [vmem:[#allocation6 + $0x60] sm:$0xff] %vm1568_vm5, %v1385_v27  ;;  %v1393_v29 = vpop.permute.xlu1 %1392  ;;  %v1781_v27 = vld [vmem:[#allocation2 + $0x192] sm:$0xff] }
 0x29d   :  { %1577 = vst.msk [vmem:[#allocation6 + $0xc0] sm:$0xff] %vm1568_vm5, %v1393_v29  ;;  %v1782_v29 = vld [vmem:[#allocation2 + $0x1a2] sm:$0xff] }
 0x29f   :  { %1472 = vrot.lane.b32.xlu2 %v3856_v42, %s3129_s14 }
 0x2a1   :  { %1474 = vrot.lane.b32.xlu0 %v3861_v47, %s3129_s14  ;;  %v1407_v32 = vpop.permute.xlu2 %1406 }
 0x2a2   :  { %1482 = vrot.lane.b32.xlu1 %v3900_v3, %s3129_s14  ;;  %1584 = vst.msk [vmem:[#allocation6 + $0x168] sm:$0xff] %vm1568_vm5, %v1407_v32  ;;  %v1786_v32 = vld [vmem:[#allocation2 + $0x202] sm:$0xff] }
 0x2a3   :  { %v1391_v34 = vpop.permute.xlu0 %1390 }
 0x2a4   :  { %1576 = vst.msk [vmem:[#allocation6 + $0xa8] sm:$0xff] %vm1568_vm5, %v1391_v34  ;;  %v1399_v61 = vpop.permute.xlu1 %1398 }
 0x2a5   :  { %1580 = vst.msk [vmem:[#allocation6 + $0x108] sm:$0xff] %vm1568_vm5, %v1399_v61 }
 0x2a7   :  { %1478 = vrot.lane.b32.xlu2 %v3877_v55, %s3129_s14  ;;  %v284_v55 = vld [vmem:[#allocation3 + $0x1f8] sm:$0xff] }
 0x2a8   :  { %349 = vst.msk [vmem:[#allocation2 + $0x4e1] sm:$0xff] %vm25_vm0, %v284_v55 }
 0x2a9   :  { %1480 = vrot.lane.b32.xlu0 %v3882_v58, %s3129_s14  ;;  %v1413_v42 = vpop.permute.xlu2 %1412 }
 0x2aa   :  { %1488 = vrot.lane.b32.xlu1 %v3927_v16, %s3129_s14  ;;  %1587 = vst.msk [vmem:[#allocation6 + $0x1b0] sm:$0xff] %vm1568_vm5, %v1413_v42 }
 0x2ab   :  { %v1397_v47 = vpop.permute.xlu0 %1396 }
 0x2ac   :  { %1579 = vst.msk [vmem:[#allocation6 + $0xf0] sm:$0xff] %vm1568_vm5, %v1397_v47  ;;  %v1405_v3 = vpop.permute.xlu1 %1404  ;;  %v1785_v47 = vld [vmem:[#allocation2 + $0x1f2] sm:$0xff] }
 0x2ad   :  { %1583 = vst.msk [vmem:[#allocation6 + $0x150] sm:$0xff] %vm1568_vm5, %v1405_v3  ;;  %v1789_v3 = vld [vmem:[#allocation2 + $0x232] sm:$0xff] }
 0x2af   :  { %1484 = vrot.lane.b32.xlu2 %v3895_v1, %s3129_s14  ;;  %v1311_v41 = vld [vmem:[#allocation2 + $0x4e0] sm:$0xff] }
 0x2b1   :  { %1486 = vrot.lane.b32.xlu0 %v1303_v31, %s3129_s14  ;;  %v1419_v58 = vpop.permute.xlu2 %1418 }
 0x2b2   :  { %1494 = vrot.lane.b32.xlu1 %v3954_v36, %s3129_s14  ;;  %1590 = vst.msk [vmem:[#allocation6 + $0x1f8] sm:$0xff] %vm1568_vm5, %v1419_v58 }
 0x2b3   :  { %v1403_v16 = vpop.permute.xlu0 %1402 }
 0x2b4   :  { %1582 = vst.msk [vmem:[#allocation6 + $0x138] sm:$0xff] %vm1568_vm5, %v1403_v16  ;;  %v1411_v33 = vpop.permute.xlu1 %1410  ;;  %v1787_v16 = vld [vmem:[#allocation2 + $0x212] sm:$0xff] }
 0x2b5   :  { %1586 = vst.msk [vmem:[#allocation6 + $0x198] sm:$0xff] %vm1568_vm5, %v1411_v33  ;;  %v4273_v33 = vld [vmem:[#allocation2 + $0x302] sm:$0xff] }
 0x2b6   :  { %3016 = vst.msk [vmem:[#allocation6 + $0x3a0] sm:$0xff] %vm25_vm0, %v4273_v33 }
 0x2b7   :  { %1490 = vrot.lane.b32.xlu2 %v3915_v13, %s3129_s14 }
 0x2b9   :  { %1492 = vrot.lane.b32.xlu0 %v3920_v15, %s3129_s14  ;;  %v1425_v1 = vpop.permute.xlu2 %1424 }
 0x2ba   :  { %1500 = vrot.lane.b32.xlu1 %v3960_v40, %s3129_s14  ;;  %1593 = vst.msk [vmem:[#allocation6 + $0x240] sm:$0xff] %vm1568_vm5, %v1425_v1 }
 0x2bb   :  { %v1409_v36 = vpop.permute.xlu0 %1408 }
 0x2bc   :  { %1585 = vst.msk [vmem:[#allocation6 + $0x180] sm:$0xff] %vm1568_vm5, %v1409_v36  ;;  %v1417_v38 = vpop.permute.xlu1 %1416 }
 0x2bd   :  { %1589 = vst.msk [vmem:[#allocation6 + $0x1e0] sm:$0xff] %vm1568_vm5, %v1417_v38 }
 0x2bf   :  { %1496 = vrot.lane.b32.xlu2 %v3940_v24, %s3129_s14 }
 0x2c1   :  { %1498 = vrot.lane.b32.xlu0 %v3945_v30, %s3129_s14  ;;  %v1431_v13 = vpop.permute.xlu2 %1430 }
 0x2c2   :  { %1891 = vrot.lane.b32.xlu1 %v1762_v39, %s3127_s0  ;;  %1596 = vst.msk [vmem:[#allocation6 + $0x288] sm:$0xff] %vm1568_vm5, %v1431_v13  ;;  %v1790_v39 = vld [vmem:[#allocation2 + $0x242] sm:$0xff]  ;;  %v1791_v13 = vld [vmem:[#allocation2 + $0x252] sm:$0xff] }
 0x2c3   :  { %v1415_v15 = vpop.permute.xlu0 %1414 }
 0x2c4   :  { %1588 = vst.msk [vmem:[#allocation6 + $0x1c8] sm:$0xff] %vm1568_vm5, %v1415_v15  ;;  %v1423_v40 = vpop.permute.xlu1 %1422  ;;  %v1795_v15 = vld [vmem:[#allocation2 + $0x2b2] sm:$0xff] }
 0x2c5   :  { %1592 = vst.msk [vmem:[#allocation6 + $0x228] sm:$0xff] %vm1568_vm5, %v1423_v40 }
 0x2c7   :  { %1502 = vrot.lane.b32.xlu2 %v1311_v41, %s3129_s14  ;;  %v4285_v41 = vld [vmem:[#allocation2 + $0x31] sm:$0xff] }
 0x2c8   :  { %1699 = vst.msk [vmem:[#allocation6 + $0x38] sm:$0xff] %vm25_vm0, %v4285_v41 }
 0x2c9   :  { %1889 = vrot.lane.b32.xlu0 %v1761_v45, %s3127_s0  ;;  %v1437_v24 = vpop.permute.xlu2 %1436 }
 0x2ca   :  { %1897 = vrot.lane.b32.xlu1 %v1765_v46, %s3127_s0  ;;  %1599 = vst.msk [vmem:[#allocation6 + $0x2d0] sm:$0xff] %vm1568_vm5, %v1437_v24  ;;  %v4291_v46 = vld [vmem:[#allocation2 + $0x21] sm:$0xff] }
 0x2cb   :  { %v1421_v30 = vpop.permute.xlu0 %1420  ;;  %1698 = vst.msk [vmem:[#allocation6 + $0x20] sm:$0xff] %vm25_vm0, %v4291_v46 }
 0x2cc   :  { %1591 = vst.msk [vmem:[#allocation6 + $0x210] sm:$0xff] %vm1568_vm5, %v1421_v30  ;;  %v1429_v48 = vpop.permute.xlu1 %1428  ;;  %v1793_v30 = vld [vmem:[#allocation2 + $0x292] sm:$0xff] }
 0x2cd   :  { %1595 = vst.msk [vmem:[#allocation6 + $0x270] sm:$0xff] %vm1568_vm5, %v1429_v48  ;;  %v1633_v48 = vld [vmem:[#allocation2 + $0x11] sm:$0xff] }
 0x2ce   :  { %1697 = vst.msk [vmem:[#allocation6 + $0x8] sm:$0xff] %vm25_vm0, %v1633_v48  ;;  %v1814_v48 = vld [vmem:[#allocation2 + $0x422] sm:$0xff] }
 0x2cf   :  { %1893 = vrot.lane.b32.xlu2 %v1763_v49, %s3127_s0  ;;  %v1794_v49 = vld [vmem:[#allocation2 + $0x2a2] sm:$0xff] }
 0x2d1   :  { %1895 = vrot.lane.b32.xlu0 %v1764_v51, %s3127_s0  ;;  %v1443_v52 = vpop.permute.xlu2 %1442 }
 0x2d2   :  { %1903 = vrot.lane.b32.xlu1 %v1768_v37, %s3127_s0  ;;  %1602 = vst.msk [vmem:[#allocation6 + $0x318] sm:$0xff] %vm1568_vm5, %v1443_v52  ;;  %v1788_v37 = vld [vmem:[#allocation2 + $0x222] sm:$0xff] }
 0x2d3   :  { %v1427_v54 = vpop.permute.xlu0 %1426  ;;  %v4300_v52 = vld [vmem:[#allocation2 + $0x61] sm:$0xff] }
 0x2d4   :  { %1594 = vst.msk [vmem:[#allocation6 + $0x258] sm:$0xff] %vm1568_vm5, %v1427_v54  ;;  %v1435_v56 = vpop.permute.xlu1 %1434 }
 0x2d5   :  { %1598 = vst.msk [vmem:[#allocation6 + $0x2b8] sm:$0xff] %vm1568_vm5, %v1435_v56  ;;  %v4306_v56 = vld [vmem:[#allocation2 + $0x51] sm:$0xff] }
 0x2d6   :  { %1702 = vst.msk [vmem:[#allocation6 + $0x80] sm:$0xff] %vm25_vm0, %v4300_v52 }
 0x2d7   :  { %1899 = vrot.lane.b32.xlu2 %v1766_v57, %s3127_s0  ;;  %1701 = vst.msk [vmem:[#allocation6 + $0x68] sm:$0xff] %vm25_vm0, %v4306_v56 }
 0x2d9   :  { %1901 = vrot.lane.b32.xlu0 %v1767_v44, %s3127_s0  ;;  %v1449_v60 = vpop.permute.xlu2 %1448  ;;  %v1796_v44 = vld [vmem:[#allocation2 + $0x2c2] sm:$0xff] }
 0x2da   :  { %1909 = vrot.lane.b32.xlu1 %v1771_v59, %s3127_s0  ;;  %1605 = vst.msk [vmem:[#allocation6 + $0x360] sm:$0xff] %vm1568_vm5, %v1449_v60  ;;  %v4309_v59 = vld [vmem:[#allocation2 + $0x41] sm:$0xff]  ;;  %v1797_v60 = vld [vmem:[#allocation2 + $0x2d2] sm:$0xff] }
 0x2db   :  { %v1433_v62 = vpop.permute.xlu0 %1432  ;;  %1700 = vst.msk [vmem:[#allocation6 + $0x50] sm:$0xff] %vm25_vm0, %v4309_v59 }
 0x2dc   :  { %1597 = vst.msk [vmem:[#allocation6 + $0x2a0] sm:$0xff] %vm1568_vm5, %v1433_v62  ;;  %v1441_v53 = vpop.permute.xlu1 %1440  ;;  %v1801_v62 = vld [vmem:[#allocation2 + $0x332] sm:$0xff] }
 0x2dd   :  { %1601 = vst.msk [vmem:[#allocation6 + $0x300] sm:$0xff] %vm1568_vm5, %v1441_v53 }
 0x2df   :  { %1905 = vrot.lane.b32.xlu2 %v1769_v2, %s3127_s0  ;;  %v1641_v2 = vld [vmem:[#allocation2 + $0xb1] sm:$0xff] }
 0x2e0   :  { %1705 = vst.msk [vmem:[#allocation6 + $0xc8] sm:$0xff] %vm25_vm0, %v1641_v2  ;;  %v1657_v2 = vld [vmem:[#allocation2 + $0x1f1] sm:$0xff] }
 0x2e1   :  { %1907 = vrot.lane.b32.xlu0 %v1770_v4, %s3127_s0  ;;  %v1455_v7 = vpop.permute.xlu2 %1454  ;;  %1721 = vst.msk [vmem:[#allocation6 + $0x248] sm:$0xff] %vm25_vm0, %v1657_v2  ;;  %v1673_v2 = vld [vmem:[#allocation2 + $0x331] sm:$0xff] }
 0x2e2   :  { %1915 = vrot.lane.b32.xlu1 %v1774_v5, %s3127_s0  ;;  %1608 = vst.msk [vmem:[#allocation6 + $0x3a8] sm:$0xff] %vm1568_vm5, %v1455_v7  ;;  %v4321_v5 = vld [vmem:[#allocation2 + $0x81] sm:$0xff] }
 0x2e3   :  { %v1439_v10 = vpop.permute.xlu0 %1438  ;;  %1704 = vst.msk [vmem:[#allocation6 + $0xb0] sm:$0xff] %vm25_vm0, %v4321_v5 }
 0x2e4   :  { %1600 = vst.msk [vmem:[#allocation6 + $0x2e8] sm:$0xff] %vm1568_vm5, %v1439_v10  ;;  %v1447_v43 = vpop.permute.xlu1 %1446  ;;  %v1799_v10 = vld [vmem:[#allocation2 + $0x2f2] sm:$0xff] }
 0x2e5   :  { %1604 = vst.msk [vmem:[#allocation6 + $0x348] sm:$0xff] %vm1568_vm5, %v1447_v43  ;;  %v4324_v43 = vld [vmem:[#allocation2 + $0x71] sm:$0xff] }
 0x2e6   :  { %1703 = vst.msk [vmem:[#allocation6 + $0x98] sm:$0xff] %vm25_vm0, %v4324_v43 }
 0x2e7   :  { %1911 = vrot.lane.b32.xlu2 %v1772_v0, %s3127_s0  ;;  %v1804_v0 = vld [vmem:[#allocation2 + $0x362] sm:$0xff]  ;;  %1737 = vst.msk [vmem:[#allocation6 + $0x3c8] sm:$0xff] %vm25_vm0, %v1673_v2 }
 0x2e8   :  { %v2162_v2 = vld [vmem:[#allocation2 + $0x160] sm:$0xff] }
 0x2e9   :  { %1913 = vrot.lane.b32.xlu0 %v1773_v11, %s3127_s0  ;;  %v1461_v14 = vpop.permute.xlu2 %1460 }
 0x2ea   :  { %1921 = vrot.lane.b32.xlu1 %v1777_v12, %s3127_s0  ;;  %1611 = vst.msk [vmem:[#allocation6 + $0x3f0] sm:$0xff] %vm1568_vm5, %v1461_v14  ;;  %v4334_v12 = vld [vmem:[#allocation2 + $0xe1] sm:$0xff] }
 0x2eb   :  { %v1445_v9 = vpop.permute.xlu0 %1444  ;;  %1708 = vst.msk [vmem:[#allocation6 + $0x110] sm:$0xff] %vm25_vm0, %v4334_v12 }
 0x2ec   :  { %1603 = vst.msk [vmem:[#allocation6 + $0x330] sm:$0xff] %vm1568_vm5, %v1445_v9  ;;  %v1453_v18 = vpop.permute.xlu1 %1452  ;;  %v4340_v9 = vld [vmem:[#allocation2 + $0xd1] sm:$0xff] }
 0x2ed   :  { %1607 = vst.msk [vmem:[#allocation6 + $0x390] sm:$0xff] %vm1568_vm5, %v1453_v18 }
 0x2ee   :  { %1707 = vst.msk [vmem:[#allocation6 + $0xf8] sm:$0xff] %vm25_vm0, %v4340_v9 }
 0x2ef   :  { %1917 = vrot.lane.b32.xlu2 %v1775_v20, %s3127_s0  ;;  %v1802_v20 = vld [vmem:[#allocation2 + $0x342] sm:$0xff] }
 0x2f1   :  { %1919 = vrot.lane.b32.xlu0 %v1776_v50, %s3127_s0  ;;  %v1467_v19 = vpop.permute.xlu2 %1466  ;;  %v1798_v50 = vld [vmem:[#allocation2 + $0x2e2] sm:$0xff] }
 0x2f2   :  { %1927 = vrot.lane.b32.xlu1 %v1780_v63, %s3127_s0  ;;  %1614 = vst.msk [vmem:[#allocation6 + $0x438] sm:$0xff] %vm1568_vm5, %v1467_v19  ;;  %v4343_v63 = vld [vmem:[#allocation2 + $0xc1] sm:$0xff]  ;;  %v1803_v19 = vld [vmem:[#allocation2 + $0x352] sm:$0xff] }
 0x2f3   :  { %v1451_v21 = vpop.permute.xlu0 %1450  ;;  %1706 = vst.msk [vmem:[#allocation6 + $0xe0] sm:$0xff] %vm25_vm0, %v4343_v63 }
 0x2f4   :  { %1606 = vst.msk [vmem:[#allocation6 + $0x378] sm:$0xff] %vm1568_vm5, %v1451_v21  ;;  %v1459_v22 = vpop.permute.xlu1 %1458  ;;  %v1807_v21 = vld [vmem:[#allocation2 + $0x392] sm:$0xff] }
 0x2f5   :  { %1610 = vst.msk [vmem:[#allocation6 + $0x3d8] sm:$0xff] %vm1568_vm5, %v1459_v22  ;;  %v1808_v22 = vld [vmem:[#allocation2 + $0x3a2] sm:$0xff] }
 0x2f6   :  { %3024 = vst.msk [vmem:[#allocation6 + $0x460] sm:$0xff] %vm25_vm0, %v1808_v22 }
 0x2f7   :  { %1923 = vrot.lane.b32.xlu2 %v1778_v6, %s3127_s0  ;;  %v1816_v6 = vld [vmem:[#allocation2 + $0x442] sm:$0xff] }
 0x2f8   :  { %3032 = vst.msk [vmem:[#allocation6 + $0x520] sm:$0xff] %vm25_vm0, %v1816_v6 }
 0x2f9   :  { %1925 = vrot.lane.b32.xlu0 %v1779_v28, %s3127_s0  ;;  %v1473_v35 = vpop.permute.xlu2 %1472  ;;  %v4354_v28 = vld [vmem:[#allocation2 + $0x111] sm:$0xff] }
 0x2fa   :  { %1933 = vrot.lane.b32.xlu1 %v1783_v17, %s3127_s0  ;;  %1617 = vst.msk [vmem:[#allocation6 + $0x480] sm:$0xff] %vm1568_vm5, %v1473_v35  ;;  %v4360_v17 = vld [vmem:[#allocation2 + $0x101] sm:$0xff] }
 0x2fb   :  { %v1457_v26 = vpop.permute.xlu0 %1456  ;;  %1711 = vst.msk [vmem:[#allocation6 + $0x158] sm:$0xff] %vm25_vm0, %v4354_v28 }
 0x2fc   :  { %1609 = vst.msk [vmem:[#allocation6 + $0x3c0] sm:$0xff] %vm1568_vm5, %v1457_v26  ;;  %v1465_v25 = vpop.permute.xlu1 %1464  ;;  %v1805_v26 = vld [vmem:[#allocation2 + $0x372] sm:$0xff] }
 0x2fd   :  { %1613 = vst.msk [vmem:[#allocation6 + $0x420] sm:$0xff] %vm1568_vm5, %v1465_v25  ;;  %v4363_v25 = vld [vmem:[#allocation2 + $0xf1] sm:$0xff] }
 0x2fe   :  { %1710 = vst.msk [vmem:[#allocation6 + $0x140] sm:$0xff] %vm25_vm0, %v4360_v17 }
 0x2ff   :  { %1929 = vrot.lane.b32.xlu2 %v1781_v27, %s3127_s0  ;;  %v1806_v27 = vld [vmem:[#allocation2 + $0x382] sm:$0xff]  ;;  %1709 = vst.msk [vmem:[#allocation6 + $0x128] sm:$0xff] %vm25_vm0, %v4363_v25 }
 0x301   :  { %1931 = vrot.lane.b32.xlu0 %v1782_v29, %s3127_s0  ;;  %v1479_v34 = vpop.permute.xlu2 %1478  ;;  %v1810_v29 = vld [vmem:[#allocation2 + $0x3e2] sm:$0xff] }
 0x302   :  { %1939 = vrot.lane.b32.xlu1 %v1786_v32, %s3127_s0  ;;  %1620 = vst.msk [vmem:[#allocation6 + $0x4c8] sm:$0xff] %vm1568_vm5, %v1479_v34  ;;  %v4372_v34 = vld [vmem:[#allocation2 + $0x161] sm:$0xff] }
 0x303   :  { %v1463_v61 = vpop.permute.xlu0 %1462  ;;  %1714 = vst.msk [vmem:[#allocation6 + $0x1a0] sm:$0xff] %vm25_vm0, %v4372_v34 }
 0x304   :  { %1612 = vst.msk [vmem:[#allocation6 + $0x408] sm:$0xff] %vm1568_vm5, %v1463_v61  ;;  %v1471_v42 = vpop.permute.xlu1 %1470 }
 0x305   :  { %1616 = vst.msk [vmem:[#allocation6 + $0x468] sm:$0xff] %vm1568_vm5, %v1471_v42  ;;  %v1649_v42 = vld [vmem:[#allocation2 + $0x151] sm:$0xff] }
 0x306   :  { %1713 = vst.msk [vmem:[#allocation6 + $0x188] sm:$0xff] %vm25_vm0, %v1649_v42  ;;  %v4476_v42 = vld [vmem:[#allocation2 + $0x2c1] sm:$0xff] }
 0x307   :  { %1935 = vrot.lane.b32.xlu2 %v1784_v8, %s3127_s0  ;;  %1732 = vst.msk [vmem:[#allocation6 + $0x350] sm:$0xff] %vm25_vm0, %v4476_v42 }
 0x309   :  { %1937 = vrot.lane.b32.xlu0 %v1785_v47, %s3127_s0  ;;  %v1485_v31 = vpop.permute.xlu2 %1484 }
 0x30a   :  { %1945 = vrot.lane.b32.xlu1 %v1789_v3, %s3127_s0  ;;  %1623 = vst.msk [vmem:[#allocation6 + $0x510] sm:$0xff] %vm1568_vm5, %v1485_v31  ;;  %v4379_v3 = vld [vmem:[#allocation2 + $0x121] sm:$0xff]  ;;  %v1809_v31 = vld [vmem:[#allocation2 + $0x3d2] sm:$0xff] }
 0x30b   :  { %v1469_v55 = vpop.permute.xlu0 %1468  ;;  %1712 = vst.msk [vmem:[#allocation6 + $0x170] sm:$0xff] %vm25_vm0, %v4379_v3 }
 0x30c   :  { %1615 = vst.msk [vmem:[#allocation6 + $0x450] sm:$0xff] %vm1568_vm5, %v1469_v55  ;;  %v1477_v58 = vpop.permute.xlu1 %1476  ;;  %v1813_v55 = vld [vmem:[#allocation2 + $0x412] sm:$0xff] }
 0x30d   :  { %1619 = vst.msk [vmem:[#allocation6 + $0x4b0] sm:$0xff] %vm1568_vm5, %v1477_v58 }
 0x30f   :  { %1941 = vrot.lane.b32.xlu2 %v1787_v16, %s3127_s0  ;;  %v4387_v16 = vld [vmem:[#allocation2 + $0x191] sm:$0xff] }
 0x310   :  { %1717 = vst.msk [vmem:[#allocation6 + $0x1e8] sm:$0xff] %vm25_vm0, %v4387_v16 }
 0x311   :  { %1943 = vrot.lane.b32.xlu0 %v1788_v37, %s3127_s0  ;;  %v1491_v1 = vpop.permute.xlu2 %1490  ;;  %v4393_v37 = vld [vmem:[#allocation2 + $0x181] sm:$0xff] }
 0x312   :  { %1951 = vrot.lane.b32.xlu1 %v1792_v23, %s3127_s0  ;;  %1626 = vst.msk [vmem:[#allocation6 + $0x558] sm:$0xff] %vm1568_vm5, %v1491_v1 }
 0x313   :  { %v1475_v36 = vpop.permute.xlu0 %1474  ;;  %1716 = vst.msk [vmem:[#allocation6 + $0x1d0] sm:$0xff] %vm25_vm0, %v4393_v37 }
 0x314   :  { %1618 = vst.msk [vmem:[#allocation6 + $0x498] sm:$0xff] %vm1568_vm5, %v1475_v36  ;;  %v1483_v38 = vpop.permute.xlu1 %1482  ;;  %v1811_v36 = vld [vmem:[#allocation2 + $0x3f2] sm:$0xff] }
 0x315   :  { %1622 = vst.msk [vmem:[#allocation6 + $0x4f8] sm:$0xff] %vm1568_vm5, %v1483_v38  ;;  %v4396_v38 = vld [vmem:[#allocation2 + $0x171] sm:$0xff] }
 0x316   :  { %1715 = vst.msk [vmem:[#allocation6 + $0x1b8] sm:$0xff] %vm25_vm0, %v4396_v38 }
 0x317   :  { %1947 = vrot.lane.b32.xlu2 %v1790_v39, %s3127_s0  ;;  %v1812_v39 = vld [vmem:[#allocation2 + $0x402] sm:$0xff] }
 0x319   :  { %1949 = vrot.lane.b32.xlu0 %v1791_v13, %s3127_s0  ;;  %v1497_v40 = vpop.permute.xlu2 %1496  ;;  %v4404_v13 = vld [vmem:[#allocation2 + $0x4e2] sm:$0xff] }
 0x31a   :  { %1957 = vrot.lane.b32.xlu1 %v1795_v15, %s3127_s0  ;;  %1629 = vst.msk [vmem:[#allocation6 + $0x5a0] sm:$0xff] %vm1568_vm5, %v1497_v40  ;;  %v4409_v40 = vld [vmem:[#allocation2 + $0x1c1] sm:$0xff] }
 0x31b   :  { %v1481_v45 = vpop.permute.xlu0 %1480  ;;  %3040 = vst.msk [vmem:[#allocation6 + $0x5e0] sm:$0xff] %vm25_vm0, %v4404_v13 }
 0x31c   :  { %1621 = vst.msk [vmem:[#allocation6 + $0x4e0] sm:$0xff] %vm1568_vm5, %v1481_v45  ;;  %v1489_v24 = vpop.permute.xlu1 %1488 }
 0x31d   :  { %1625 = vst.msk [vmem:[#allocation6 + $0x540] sm:$0xff] %vm1568_vm5, %v1489_v24  ;;  %v4415_v24 = vld [vmem:[#allocation2 + $0x1b1] sm:$0xff] }
 0x31e   :  { %1720 = vst.msk [vmem:[#allocation6 + $0x230] sm:$0xff] %vm25_vm0, %v4409_v40 }
 0x31f   :  { %1953 = vrot.lane.b32.xlu2 %v1793_v30, %s3127_s0  ;;  %1719 = vst.msk [vmem:[#allocation6 + $0x218] sm:$0xff] %vm25_vm0, %v4415_v24 }
 0x321   :  { %1955 = vrot.lane.b32.xlu0 %v1794_v49, %s3127_s0  ;;  %v1503_v51 = vpop.permute.xlu2 %1502  ;;  %v4418_v49 = vld [vmem:[#allocation2 + $0x1a1] sm:$0xff] }
 0x322   :  { %1963 = vrot.lane.b32.xlu1 %v1798_v50, %s3127_s0  ;;  %1632 = vst.msk [vmem:[#allocation6 + $0x5e8] sm:$0xff] %vm1568_vm5, %v1503_v51  ;;  %v1815_v50 = vld [vmem:[#allocation2 + $0x432] sm:$0xff] }
 0x323   :  { %v1487_v54 = vpop.permute.xlu0 %1486  ;;  %v1819_v51 = vld [vmem:[#allocation2 + $0x492] sm:$0xff]  ;;  %1718 = vst.msk [vmem:[#allocation6 + $0x200] sm:$0xff] %vm25_vm0, %v4418_v49 }
 0x324   :  { %1624 = vst.msk [vmem:[#allocation6 + $0x528] sm:$0xff] %vm1568_vm5, %v1487_v54  ;;  %v1495_v57 = vpop.permute.xlu1 %1494 }
 0x325   :  { %1628 = vst.msk [vmem:[#allocation6 + $0x588] sm:$0xff] %vm1568_vm5, %v1495_v57  ;;  %v4427_v57 = vld [vmem:[#allocation2 + $0x211] sm:$0xff] }
 0x326   :  { %1723 = vst.msk [vmem:[#allocation6 + $0x278] sm:$0xff] %vm25_vm0, %v4427_v57 }
 0x327   :  { %1959 = vrot.lane.b32.xlu2 %v1796_v44, %s3127_s0 }
 0x329   :  { %1961 = vrot.lane.b32.xlu0 %v1797_v60, %s3127_s0  ;;  %v1894_v53 = vpop.permute.xlu2 %1893  ;;  %v4433_v60 = vld [vmem:[#allocation2 + $0x201] sm:$0xff] }
 0x32a   :  { %1969 = vrot.lane.b32.xlu1 %v1801_v62, %s3127_s0  ;;  %2083 = vst.msk [vmem:[#allocation6 + $0x38] sm:$0xff] %vm798_vm3, %v1894_v53  ;;  %v1817_v53 = vld [vmem:[#allocation2 + $0x472] sm:$0xff] }
 0x32b   :  { %v1493_v4 = vpop.permute.xlu0 %1492  ;;  %1722 = vst.msk [vmem:[#allocation6 + $0x260] sm:$0xff] %vm25_vm0, %v4433_v60 }
 0x32c   :  { %1627 = vst.msk [vmem:[#allocation6 + $0x570] sm:$0xff] %vm1568_vm5, %v1493_v4  ;;  %v1501_v7 = vpop.permute.xlu1 %1500  ;;  %v1818_v4 = vld [vmem:[#allocation2 + $0x482] sm:$0xff] }
 0x32d   :  { %1631 = vst.msk [vmem:[#allocation6 + $0x5d0] sm:$0xff] %vm1568_vm5, %v1501_v7  ;;  %v1822_v7 = vld [vmem:[#allocation2 + $0x4c2] sm:$0xff] }
 0x32f   :  { %1965 = vrot.lane.b32.xlu2 %v1799_v10, %s3127_s0 }
 0x331   :  { %1967 = vrot.lane.b32.xlu0 %v4273_v33, %s3127_s0  ;;  %v1900_v11 = vpop.permute.xlu2 %1899 }
 0x332   :  { %1975 = vrot.lane.b32.xlu1 %v1804_v0, %s3127_s0  ;;  %2086 = vst.msk [vmem:[#allocation6 + $0x80] sm:$0xff] %vm798_vm3, %v1900_v11  ;;  %v4442_v0 = vld [vmem:[#allocation2 + $0x241] sm:$0xff] }
 0x333   :  { %v1499_v14 = vpop.permute.xlu0 %1498  ;;  %1726 = vst.msk [vmem:[#allocation6 + $0x2c0] sm:$0xff] %vm25_vm0, %v4442_v0 }
 0x334   :  { %1630 = vst.msk [vmem:[#allocation6 + $0x5b8] sm:$0xff] %vm1568_vm5, %v1499_v14  ;;  %v1892_v18 = vpop.permute.xlu1 %1891  ;;  %v4448_v14 = vld [vmem:[#allocation2 + $0x231] sm:$0xff] }
 0x335   :  { %2082 = vst.msk [vmem:[#allocation6 + $0x20] sm:$0xff] %vm798_vm3, %v1892_v18 }
 0x336   :  { %1725 = vst.msk [vmem:[#allocation6 + $0x2a8] sm:$0xff] %vm25_vm0, %v4448_v14 }
 0x337   :  { %1971 = vrot.lane.b32.xlu2 %v1802_v20, %s3127_s0  ;;  %v1820_v20 = vld [vmem:[#allocation2 + $0x4a2] sm:$0xff] }
 0x339   :  { %1973 = vrot.lane.b32.xlu0 %v1803_v19, %s3127_s0  ;;  %v1906_v8 = vpop.permute.xlu2 %1905  ;;  %v4451_v19 = vld [vmem:[#allocation2 + $0x221] sm:$0xff] }
 0x33a   :  { %1981 = vrot.lane.b32.xlu1 %v1807_v21, %s3127_s0  ;;  %2089 = vst.msk [vmem:[#allocation6 + $0xc8] sm:$0xff] %vm798_vm3, %v1906_v8  ;;  %v1821_v21 = vld [vmem:[#allocation2 + $0x4b2] sm:$0xff] }
 0x33b   :  { %v1890_v23 = vpop.permute.xlu0 %1889  ;;  %1724 = vst.msk [vmem:[#allocation6 + $0x290] sm:$0xff] %vm25_vm0, %v4451_v19  ;;  %v1665_v8 = vld [vmem:[#allocation2 + $0x291] sm:$0xff] }
 0x33c   :  { %2081 = vst.msk [vmem:[#allocation6 + $0x8] sm:$0xff] %vm798_vm3, %v1890_v23  ;;  %v1898_v35 = vpop.permute.xlu1 %1897 }
 0x33d   :  { %2085 = vst.msk [vmem:[#allocation6 + $0x68] sm:$0xff] %vm798_vm3, %v1898_v35  ;;  %v4463_v35 = vld [vmem:[#allocation2 + $0x261] sm:$0xff] }
 0x33e   :  { %1729 = vst.msk [vmem:[#allocation6 + $0x308] sm:$0xff] %vm25_vm0, %v1665_v8 }
 0x33f   :  { %1977 = vrot.lane.b32.xlu2 %v1805_v26, %s3127_s0  ;;  %1728 = vst.msk [vmem:[#allocation6 + $0x2f0] sm:$0xff] %vm25_vm0, %v4463_v35 }
 0x341   :  { %1979 = vrot.lane.b32.xlu0 %v1806_v27, %s3127_s0  ;;  %v1912_v32 = vpop.permute.xlu2 %1911  ;;  %v1823_v27 = vld [vmem:[#allocation2 + $0x4d2] sm:$0xff] }
 0x342   :  { %1987 = vrot.lane.b32.xlu1 %v1810_v29, %s3127_s0  ;;  %2092 = vst.msk [vmem:[#allocation6 + $0x110] sm:$0xff] %vm798_vm3, %v1912_v32  ;;  %v4466_v29 = vld [vmem:[#allocation2 + $0x251] sm:$0xff] }
 0x343   :  { %v1896_v61 = vpop.permute.xlu0 %1895  ;;  %v2149_v32 = vld [vmem:[#allocation2 + $0x50] sm:$0xff]  ;;  %1727 = vst.msk [vmem:[#allocation6 + $0x2d8] sm:$0xff] %vm25_vm0, %v4466_v29 }
 0x344   :  { %2084 = vst.msk [vmem:[#allocation6 + $0x50] sm:$0xff] %vm798_vm3, %v1896_v61  ;;  %v1904_v47 = vpop.permute.xlu1 %1903 }
 0x345   :  { %2088 = vst.msk [vmem:[#allocation6 + $0xb0] sm:$0xff] %vm798_vm3, %v1904_v47 }
 0x347   :  { %1983 = vrot.lane.b32.xlu2 %v1808_v22, %s3127_s0  ;;  %v2146_v22 = vld [vmem:[#allocation2 + $0x20] sm:$0xff] }
 0x349   :  { %1985 = vrot.lane.b32.xlu0 %v1809_v31, %s3127_s0  ;;  %v1918_v58 = vpop.permute.xlu2 %1917  ;;  %v4482_v31 = vld [vmem:[#allocation2 + $0x2b1] sm:$0xff] }
 0x34a   :  { %1993 = vrot.lane.b32.xlu1 %v1813_v55, %s3127_s0  ;;  %2095 = vst.msk [vmem:[#allocation6 + $0x158] sm:$0xff] %vm798_vm3, %v1918_v58  ;;  %v2147_v58 = vld [vmem:[#allocation2 + $0x30] sm:$0xff] }
 0x34b   :  { %v1902_v33 = vpop.permute.xlu0 %1901  ;;  %1731 = vst.msk [vmem:[#allocation6 + $0x338] sm:$0xff] %vm25_vm0, %v4482_v31 }
 0x34c   :  { %2087 = vst.msk [vmem:[#allocation6 + $0x98] sm:$0xff] %vm798_vm3, %v1902_v33  ;;  %v1910_v1 = vpop.permute.xlu1 %1909  ;;  %v4485_v33 = vld [vmem:[#allocation2 + $0x2a1] sm:$0xff] }
 0x34d   :  { %2091 = vst.msk [vmem:[#allocation6 + $0xf8] sm:$0xff] %vm798_vm3, %v1910_v1  ;;  %v2148_v1 = vld [vmem:[#allocation2 + $0x40] sm:$0xff] }
 0x34e   :  { %1730 = vst.msk [vmem:[#allocation6 + $0x320] sm:$0xff] %vm25_vm0, %v4485_v33 }
 0x34f   :  { %1989 = vrot.lane.b32.xlu2 %v1811_v36, %s3127_s0  ;;  %v2152_v36 = vld [vmem:[#allocation2 + $0x80] sm:$0xff] }
 0x351   :  { %1991 = vrot.lane.b32.xlu0 %v1812_v39, %s3127_s0  ;;  %v1924_v15 = vpop.permute.xlu2 %1923 }
 0x352   :  { %1999 = vrot.lane.b32.xlu1 %v1816_v6, %s3127_s0  ;;  %2098 = vst.msk [vmem:[#allocation6 + $0x1a0] sm:$0xff] %vm798_vm3, %v1924_v15 }
 0x353   :  { %v1908_v45 = vpop.permute.xlu0 %1907 }
 0x354   :  { %2090 = vst.msk [vmem:[#allocation6 + $0xe0] sm:$0xff] %vm798_vm3, %v1908_v45  ;;  %v1916_v30 = vpop.permute.xlu1 %1915  ;;  %v4500_v45 = vld [vmem:[#allocation2 + $0x2e1] sm:$0xff] }
 0x355   :  { %2094 = vst.msk [vmem:[#allocation6 + $0x140] sm:$0xff] %vm798_vm3, %v1916_v30 }
 0x356   :  { %1734 = vst.msk [vmem:[#allocation6 + $0x380] sm:$0xff] %vm25_vm0, %v4500_v45 }
 0x357   :  { %1995 = vrot.lane.b32.xlu2 %v1814_v48, %s3127_s0  ;;  %v2150_v48 = vld [vmem:[#allocation2 + $0x60] sm:$0xff] }
 0x359   :  { %1997 = vrot.lane.b32.xlu0 %v1815_v50, %s3127_s0  ;;  %v1930_v54 = vpop.permute.xlu2 %1929  ;;  %v4503_v50 = vld [vmem:[#allocation2 + $0x2d1] sm:$0xff] }
 0x35a   :  { %2005 = vrot.lane.b32.xlu1 %v1819_v51, %s3127_s0  ;;  %2101 = vst.msk [vmem:[#allocation6 + $0x1e8] sm:$0xff] %vm798_vm3, %v1930_v54  ;;  %v2151_v51 = vld [vmem:[#allocation2 + $0x70] sm:$0xff] }
 0x35b   :  { %v1914_v44 = vpop.permute.xlu0 %1913  ;;  %v2155_v54 = vld [vmem:[#allocation2 + $0xd0] sm:$0xff]  ;;  %1733 = vst.msk [vmem:[#allocation6 + $0x368] sm:$0xff] %vm25_vm0, %v4503_v50 }
 0x35c   :  { %2093 = vst.msk [vmem:[#allocation6 + $0x128] sm:$0xff] %vm798_vm3, %v1914_v44  ;;  %v1922_v62 = vpop.permute.xlu1 %1921 }
 0x35d   :  { %2097 = vst.msk [vmem:[#allocation6 + $0x188] sm:$0xff] %vm798_vm3, %v1922_v62  ;;  %v4512_v62 = vld [vmem:[#allocation2 + $0x341] sm:$0xff] }
 0x35e   :  { %1738 = vst.msk [vmem:[#allocation6 + $0x3e0] sm:$0xff] %vm25_vm0, %v4512_v62 }
 0x35f   :  { %2001 = vrot.lane.b32.xlu2 %v1817_v53, %s3127_s0 }
 0x361   :  { %2003 = vrot.lane.b32.xlu0 %v1818_v4, %s3127_s0  ;;  %v1936_v10 = vpop.permute.xlu2 %1935 }
 0x362   :  { %2011 = vrot.lane.b32.xlu1 %v1822_v7, %s3127_s0  ;;  %2104 = vst.msk [vmem:[#allocation6 + $0x230] sm:$0xff] %vm798_vm3, %v1936_v10  ;;  %v2153_v7 = vld [vmem:[#allocation2 + $0x90] sm:$0xff]  ;;  %v4519_v10 = vld [vmem:[#allocation2 + $0x301] sm:$0xff] }
 0x363   :  { %v1920_v11 = vpop.permute.xlu0 %1919  ;;  %1736 = vst.msk [vmem:[#allocation6 + $0x3b0] sm:$0xff] %vm25_vm0, %v4519_v10 }
 0x364   :  { %2096 = vst.msk [vmem:[#allocation6 + $0x170] sm:$0xff] %vm798_vm3, %v1920_v11  ;;  %v1928_v18 = vpop.permute.xlu1 %1927  ;;  %v2154_v11 = vld [vmem:[#allocation2 + $0xc0] sm:$0xff] }
 0x365   :  { %2100 = vst.msk [vmem:[#allocation6 + $0x1d0] sm:$0xff] %vm798_vm3, %v1928_v18  ;;  %v2158_v18 = vld [vmem:[#allocation2 + $0x100] sm:$0xff] }
 0x367   :  { %2007 = vrot.lane.b32.xlu2 %v1820_v20, %s3127_s0 }
 0x369   :  { %2009 = vrot.lane.b32.xlu0 %v1821_v21, %s3127_s0  ;;  %v1942_v6 = vpop.permute.xlu2 %1941  ;;  %v4527_v21 = vld [vmem:[#allocation2 + $0x371] sm:$0xff] }
 0x36a   :  { %2274 = vrot.lane.b32.xlu1 %v2146_v22, %s3128_s13  ;;  %2107 = vst.msk [vmem:[#allocation6 + $0x278] sm:$0xff] %vm798_vm3, %v1942_v6  ;;  %v4533_v6 = vld [vmem:[#allocation2 + $0x361] sm:$0xff] }
 0x36b   :  { %v1926_v23 = vpop.permute.xlu0 %1925  ;;  %1741 = vst.msk [vmem:[#allocation6 + $0x428] sm:$0xff] %vm25_vm0, %v4527_v21 }
 0x36c   :  { %2099 = vst.msk [vmem:[#allocation6 + $0x1b8] sm:$0xff] %vm798_vm3, %v1926_v23  ;;  %v1934_v26 = vpop.permute.xlu1 %1933  ;;  %v2156_v23 = vld [vmem:[#allocation2 + $0xe0] sm:$0xff] }
 0x36d   :  { %2103 = vst.msk [vmem:[#allocation6 + $0x218] sm:$0xff] %vm798_vm3, %v1934_v26  ;;  %v4536_v26 = vld [vmem:[#allocation2 + $0x351] sm:$0xff] }
 0x36e   :  { %1740 = vst.msk [vmem:[#allocation6 + $0x410] sm:$0xff] %vm25_vm0, %v4533_v6 }
 0x36f   :  { %2013 = vrot.lane.b32.xlu2 %v1823_v27, %s3127_s0  ;;  %v2157_v27 = vld [vmem:[#allocation2 + $0xf0] sm:$0xff]  ;;  %1739 = vst.msk [vmem:[#allocation6 + $0x3f8] sm:$0xff] %vm25_vm0, %v4536_v26 }
 0x371   :  { %2015 = vrot.lane.b32.xlu0 %v4404_v13, %s3127_s0  ;;  %v1948_v61 = vpop.permute.xlu2 %1947  ;;  %v4494_v13 = vld [vmem:[#allocation2 + $0x2f1] sm:$0xff] }
 0x372   :  { %2280 = vrot.lane.b32.xlu1 %v2149_v32, %s3128_s13  ;;  %2110 = vst.msk [vmem:[#allocation6 + $0x2c0] sm:$0xff] %vm798_vm3, %v1948_v61  ;;  %v2161_v32 = vld [vmem:[#allocation2 + $0x130] sm:$0xff] }
 0x373   :  { %v1932_v47 = vpop.permute.xlu0 %1931  ;;  %1735 = vst.msk [vmem:[#allocation6 + $0x398] sm:$0xff] %vm25_vm0, %v4494_v13 }
 0x374   :  { %2102 = vst.msk [vmem:[#allocation6 + $0x200] sm:$0xff] %vm798_vm3, %v1932_v47  ;;  %v1940_v55 = vpop.permute.xlu1 %1939  ;;  %v4545_v47 = vld [vmem:[#allocation2 + $0x3a1] sm:$0xff] }
 0x375   :  { %2106 = vst.msk [vmem:[#allocation6 + $0x260] sm:$0xff] %vm798_vm3, %v1940_v55 }
 0x376   :  { %1744 = vst.msk [vmem:[#allocation6 + $0x470] sm:$0xff] %vm25_vm0, %v4545_v47 }
 0x377   :  { %2276 = vrot.lane.b32.xlu2 %v2147_v58, %s3128_s13  ;;  %v4551_v58 = vld [vmem:[#allocation2 + $0x391] sm:$0xff] }
 0x378   :  { %1743 = vst.msk [vmem:[#allocation6 + $0x458] sm:$0xff] %vm25_vm0, %v4551_v58 }
 0x379   :  { %2278 = vrot.lane.b32.xlu0 %v2148_v1, %s3128_s13  ;;  %v1954_v39 = vpop.permute.xlu2 %1953 }
 0x37a   :  { %2286 = vrot.lane.b32.xlu1 %v2152_v36, %s3128_s13  ;;  %2113 = vst.msk [vmem:[#allocation6 + $0x308] sm:$0xff] %vm798_vm3, %v1954_v39  ;;  %v2159_v36 = vld [vmem:[#allocation2 + $0x110] sm:$0xff]  ;;  %v4554_v39 = vld [vmem:[#allocation2 + $0x381] sm:$0xff] }
 0x37b   :  { %v1938_v15 = vpop.permute.xlu0 %1937  ;;  %1742 = vst.msk [vmem:[#allocation6 + $0x440] sm:$0xff] %vm25_vm0, %v4554_v39 }
 0x37c   :  { %2105 = vst.msk [vmem:[#allocation6 + $0x248] sm:$0xff] %vm798_vm3, %v1938_v15  ;;  %v1946_v30 = vpop.permute.xlu1 %1945  ;;  %v2160_v15 = vld [vmem:[#allocation2 + $0x120] sm:$0xff] }
 0x37d   :  { %2109 = vst.msk [vmem:[#allocation6 + $0x2a8] sm:$0xff] %vm798_vm3, %v1946_v30  ;;  %v2164_v30 = vld [vmem:[#allocation2 + $0x180] sm:$0xff] }
 0x37f   :  { %2282 = vrot.lane.b32.xlu2 %v2150_v48, %s3128_s13 }
 0x381   :  { %2284 = vrot.lane.b32.xlu0 %v2151_v51, %s3128_s13  ;;  %v1960_v44 = vpop.permute.xlu2 %1959  ;;  %v4563_v51 = vld [vmem:[#allocation2 + $0x3f1] sm:$0xff] }
 0x382   :  { %2292 = vrot.lane.b32.xlu1 %v2155_v54, %s3128_s13  ;;  %2116 = vst.msk [vmem:[#allocation6 + $0x350] sm:$0xff] %vm798_vm3, %v1960_v44  ;;  %v4569_v44 = vld [vmem:[#allocation2 + $0x3e1] sm:$0xff] }
 0x383   :  { %v1944_v53 = vpop.permute.xlu0 %1943  ;;  %1747 = vst.msk [vmem:[#allocation6 + $0x4b8] sm:$0xff] %vm25_vm0, %v4563_v51 }
 0x384   :  { %2108 = vst.msk [vmem:[#allocation6 + $0x290] sm:$0xff] %vm798_vm3, %v1944_v53  ;;  %v1952_v4 = vpop.permute.xlu1 %1951 }
 0x385   :  { %2112 = vst.msk [vmem:[#allocation6 + $0x2f0] sm:$0xff] %vm798_vm3, %v1952_v4  ;;  %v1681_v4 = vld [vmem:[#allocation2 + $0x3d1] sm:$0xff] }
 0x386   :  { %1746 = vst.msk [vmem:[#allocation6 + $0x4a0] sm:$0xff] %vm25_vm0, %v4569_v44 }
 0x387   :  { %2288 = vrot.lane.b32.xlu2 %v2153_v7, %s3128_s13  ;;  %v2163_v7 = vld [vmem:[#allocation2 + $0x170] sm:$0xff]  ;;  %1745 = vst.msk [vmem:[#allocation6 + $0x488] sm:$0xff] %vm25_vm0, %v1681_v4 }
 0x388   :  { %v2173_v4 = vld [vmem:[#allocation2 + $0x230] sm:$0xff] }
 0x389   :  { %2290 = vrot.lane.b32.xlu0 %v2154_v11, %s3128_s13  ;;  %v1966_v20 = vpop.permute.xlu2 %1965  ;;  %v2167_v11 = vld [vmem:[#allocation2 + $0x1b0] sm:$0xff] }
 0x38a   :  { %2298 = vrot.lane.b32.xlu1 %v2158_v18, %s3128_s13  ;;  %2119 = vst.msk [vmem:[#allocation6 + $0x398] sm:$0xff] %vm798_vm3, %v1966_v20  ;;  %v4578_v20 = vld [vmem:[#allocation2 + $0x421] sm:$0xff] }
 0x38b   :  { %v1950_v22 = vpop.permute.xlu0 %1949  ;;  %1750 = vst.msk [vmem:[#allocation6 + $0x500] sm:$0xff] %vm25_vm0, %v4578_v20 }
 0x38c   :  { %2111 = vst.msk [vmem:[#allocation6 + $0x2d8] sm:$0xff] %vm798_vm3, %v1950_v22  ;;  %v1958_v8 = vpop.permute.xlu1 %1957 }
 0x38d   :  { %2115 = vst.msk [vmem:[#allocation6 + $0x338] sm:$0xff] %vm798_vm3, %v1958_v8  ;;  %v4584_v8 = vld [vmem:[#allocation2 + $0x411] sm:$0xff] }
 0x38e   :  { %1749 = vst.msk [vmem:[#allocation6 + $0x4e8] sm:$0xff] %vm25_vm0, %v4584_v8 }
 0x38f   :  { %2294 = vrot.lane.b32.xlu2 %v2156_v23, %s3128_s13 }
 0x391   :  { %2296 = vrot.lane.b32.xlu0 %v2157_v27, %s3128_s13  ;;  %v1972_v61 = vpop.permute.xlu2 %1971  ;;  %v2165_v27 = vld [vmem:[#allocation2 + $0x190] sm:$0xff] }
 0x392   :  { %2304 = vrot.lane.b32.xlu1 %v2161_v32, %s3128_s13  ;;  %2122 = vst.msk [vmem:[#allocation6 + $0x3e0] sm:$0xff] %vm798_vm3, %v1972_v61  ;;  %v4587_v32 = vld [vmem:[#allocation2 + $0x401] sm:$0xff] }
 0x393   :  { %v1956_v55 = vpop.permute.xlu0 %1955  ;;  %v2166_v61 = vld [vmem:[#allocation2 + $0x1a0] sm:$0xff]  ;;  %1748 = vst.msk [vmem:[#allocation6 + $0x4d0] sm:$0xff] %vm25_vm0, %v4587_v32 }
 0x394   :  { %2114 = vst.msk [vmem:[#allocation6 + $0x320] sm:$0xff] %vm798_vm3, %v1956_v55  ;;  %v1964_v1 = vpop.permute.xlu1 %1963  ;;  %v2170_v55 = vld [vmem:[#allocation2 + $0x200] sm:$0xff] }
 0x395   :  { %2118 = vst.msk [vmem:[#allocation6 + $0x380] sm:$0xff] %vm798_vm3, %v1964_v1 }
 0x397   :  { %2300 = vrot.lane.b32.xlu2 %v2159_v36, %s3128_s13  ;;  %v1689_v36 = vld [vmem:[#allocation2 + $0x471] sm:$0xff] }
 0x398   :  { %1753 = vst.msk [vmem:[#allocation6 + $0x548] sm:$0xff] %vm25_vm0, %v1689_v36 }
 0x399   :  { %2302 = vrot.lane.b32.xlu0 %v2160_v15, %s3128_s13  ;;  %v1978_v48 = vpop.permute.xlu2 %1977 }
 0x39a   :  { %2310 = vrot.lane.b32.xlu1 %v2164_v30, %s3128_s13  ;;  %2125 = vst.msk [vmem:[#allocation6 + $0x428] sm:$0xff] %vm798_vm3, %v1978_v48  ;;  %v4599_v30 = vld [vmem:[#allocation2 + $0x441] sm:$0xff] }
 0x39b   :  { %v1962_v54 = vpop.permute.xlu0 %1961  ;;  %1752 = vst.msk [vmem:[#allocation6 + $0x530] sm:$0xff] %vm25_vm0, %v4599_v30 }
 0x39c   :  { %2117 = vst.msk [vmem:[#allocation6 + $0x368] sm:$0xff] %vm798_vm3, %v1962_v54  ;;  %v1970_v53 = vpop.permute.xlu1 %1969  ;;  %v2168_v54 = vld [vmem:[#allocation2 + $0x1c0] sm:$0xff] }
 0x39d   :  { %2121 = vst.msk [vmem:[#allocation6 + $0x3c8] sm:$0xff] %vm798_vm3, %v1970_v53  ;;  %v4602_v53 = vld [vmem:[#allocation2 + $0x431] sm:$0xff] }
 0x39e   :  { %1751 = vst.msk [vmem:[#allocation6 + $0x518] sm:$0xff] %vm25_vm0, %v4602_v53 }
 0x39f   :  { %2306 = vrot.lane.b32.xlu2 %v2162_v2, %s3128_s13  ;;  %v2169_v2 = vld [vmem:[#allocation2 + $0x1d0] sm:$0xff] }
 0x3a1   :  { %2308 = vrot.lane.b32.xlu0 %v2163_v7, %s3128_s13  ;;  %v1984_v18 = vpop.permute.xlu2 %1983 }
 0x3a2   :  { %2316 = vrot.lane.b32.xlu1 %v2167_v11, %s3128_s13  ;;  %2128 = vst.msk [vmem:[#allocation6 + $0x470] sm:$0xff] %vm798_vm3, %v1984_v18  ;;  %v4611_v11 = vld [vmem:[#allocation2 + $0x4a1] sm:$0xff] }
 0x3a3   :  { %v1968_v22 = vpop.permute.xlu0 %1967  ;;  %1756 = vst.msk [vmem:[#allocation6 + $0x590] sm:$0xff] %vm25_vm0, %v4611_v11 }
 0x3a4   :  { %2120 = vst.msk [vmem:[#allocation6 + $0x3b0] sm:$0xff] %vm798_vm3, %v1968_v22  ;;  %v1976_v23 = vpop.permute.xlu1 %1975  ;;  %v4617_v22 = vld [vmem:[#allocation2 + $0x491] sm:$0xff] }
 0x3a5   :  { %2124 = vst.msk [vmem:[#allocation6 + $0x410] sm:$0xff] %vm798_vm3, %v1976_v23 }
 0x3a6   :  { %1755 = vst.msk [vmem:[#allocation6 + $0x578] sm:$0xff] %vm25_vm0, %v4617_v22 }
 0x3a7   :  { %2312 = vrot.lane.b32.xlu2 %v2165_v27, %s3128_s13  ;;  %v2171_v27 = vld [vmem:[#allocation2 + $0x210] sm:$0xff] }
 0x3a9   :  { %2314 = vrot.lane.b32.xlu0 %v2166_v61, %s3128_s13  ;;  %v1990_v1 = vpop.permute.xlu2 %1989  ;;  %v4620_v61 = vld [vmem:[#allocation2 + $0x481] sm:$0xff] }
 0x3aa   :  { %2322 = vrot.lane.b32.xlu1 %v2170_v55, %s3128_s13  ;;  %2131 = vst.msk [vmem:[#allocation6 + $0x4b8] sm:$0xff] %vm798_vm3, %v1990_v1  ;;  %v2172_v55 = vld [vmem:[#allocation2 + $0x220] sm:$0xff] }
 0x3ab   :  { %v1974_v15 = vpop.permute.xlu0 %1973  ;;  %v2176_v1 = vld [vmem:[#allocation2 + $0x260] sm:$0xff]  ;;  %1754 = vst.msk [vmem:[#allocation6 + $0x560] sm:$0xff] %vm25_vm0, %v4620_v61 }
 0x3ac   :  { %2123 = vst.msk [vmem:[#allocation6 + $0x3f8] sm:$0xff] %vm798_vm3, %v1974_v15  ;;  %v1982_v48 = vpop.permute.xlu1 %1981  ;;  %v4629_v15 = vld [vmem:[#allocation2 + $0x4d1] sm:$0xff] }
 0x3ad   :  { %2127 = vst.msk [vmem:[#allocation6 + $0x458] sm:$0xff] %vm798_vm3, %v1982_v48 }
 0x3ae   :  { %4957 = vst [vmem:[#allocation9_spill] sm:$0xff] %v4629_v15 }
 0x3af   :  { %2318 = vrot.lane.b32.xlu2 %v2168_v54, %s3128_s13  ;;  %1759 = vst.msk [vmem:[#allocation6 + $0x5d8] sm:$0xff] %vm25_vm0, %v4629_v15  ;;  %v4635_v54 = vld [vmem:[#allocation2 + $0x4c1] sm:$0xff]  ;;  %v2181_v15 = vld [vmem:[#allocation2 + $0x2d0] sm:$0xff] }
 0x3b0   :  { %4958 = vst [vmem:[#allocation10_spill] sm:$0xff] %v4635_v54 }
 0x3b1   :  { %2320 = vrot.lane.b32.xlu0 %v2169_v2, %s3128_s13  ;;  %v1996_v7 = vpop.permute.xlu2 %1995  ;;  %1758 = vst.msk [vmem:[#allocation6 + $0x5c0] sm:$0xff] %vm25_vm0, %v4635_v54  ;;  %v2209_v54 = vld [vmem:[#allocation2 + $0x4f0] sm:$0xff] }
 0x3b2   :  { %2328 = vrot.lane.b32.xlu1 %v2173_v4, %s3128_s13  ;;  %2134 = vst.msk [vmem:[#allocation6 + $0x500] sm:$0xff] %vm798_vm3, %v1996_v7  ;;  %v2174_v4 = vld [vmem:[#allocation2 + $0x240] sm:$0xff]  ;;  %v4638_v7 = vld [vmem:[#allocation2 + $0x4b1] sm:$0xff] }
 0x3b3   :  { %v1980_v18 = vpop.permute.xlu0 %1979  ;;  %1757 = vst.msk [vmem:[#allocation6 + $0x5a8] sm:$0xff] %vm25_vm0, %v4638_v7 }
 0x3b4   :  { %2126 = vst.msk [vmem:[#allocation6 + $0x440] sm:$0xff] %vm798_vm3, %v1980_v18  ;;  %v1988_v23 = vpop.permute.xlu1 %1987  ;;  %v2175_v18 = vld [vmem:[#allocation2 + $0x250] sm:$0xff] }
 0x3b5   :  { %2130 = vst.msk [vmem:[#allocation6 + $0x4a0] sm:$0xff] %vm798_vm3, %v1988_v23  ;;  %v2179_v23 = vld [vmem:[#allocation2 + $0x2b0] sm:$0xff] }
 0x3b7   :  { %2324 = vrot.lane.b32.xlu2 %v2171_v27, %s3128_s13 }
 0x3b9   :  { %2326 = vrot.lane.b32.xlu0 %v2172_v55, %s3128_s13  ;;  %v2002_v36 = vpop.permute.xlu2 %2001  ;;  %v4647_v55 = vld [vmem:[#allocation2 + $0x4e1] sm:$0xff] }
 0x3ba   :  { %2334 = vrot.lane.b32.xlu1 %v2176_v1, %s3128_s13  ;;  %2137 = vst.msk [vmem:[#allocation6 + $0x548] sm:$0xff] %vm798_vm3, %v2002_v36 }
 0x3bb   :  { %v1986_v48 = vpop.permute.xlu0 %1985  ;;  %1760 = vst.msk [vmem:[#allocation6 + $0x5f0] sm:$0xff] %vm25_vm0, %v4647_v55 }
 0x3bc   :  { %2129 = vst.msk [vmem:[#allocation6 + $0x488] sm:$0xff] %vm798_vm3, %v1986_v48  ;;  %v1994_v2 = vpop.permute.xlu1 %1993  ;;  %v2177_v48 = vld [vmem:[#allocation2 + $0x270] sm:$0xff] }
 0x3bd   :  { %2133 = vst.msk [vmem:[#allocation6 + $0x4e8] sm:$0xff] %vm798_vm3, %v1994_v2  ;;  %v2178_v2 = vld [vmem:[#allocation2 + $0x2a0] sm:$0xff] }
 0x3bf   :  { %2330 = vrot.lane.b32.xlu2 %v2174_v4, %s3128_s13  ;;  %v2182_v4 = vld [vmem:[#allocation2 + $0x2e0] sm:$0xff] }
 0x3c1   :  { %2332 = vrot.lane.b32.xlu0 %v2175_v18, %s3128_s13  ;;  %v2008_v27 = vpop.permute.xlu2 %2007 }
 0x3c2   :  { %2340 = vrot.lane.b32.xlu1 %v2179_v23, %s3128_s13  ;;  %2140 = vst.msk [vmem:[#allocation6 + $0x590] sm:$0xff] %vm798_vm3, %v2008_v27 }
 0x3c3   :  { %v1992_v1 = vpop.permute.xlu0 %1991 }
 0x3c4   :  { %2132 = vst.msk [vmem:[#allocation6 + $0x4d0] sm:$0xff] %vm798_vm3, %v1992_v1  ;;  %v2000_v36 = vpop.permute.xlu1 %1999  ;;  %v2180_v1 = vld [vmem:[#allocation2 + $0x2c0] sm:$0xff] }
 0x3c5   :  { %2136 = vst.msk [vmem:[#allocation6 + $0x530] sm:$0xff] %vm798_vm3, %v2000_v36  ;;  %v2185_v36 = vld [vmem:[#allocation2 + $0x310] sm:$0xff] }
 0x3c7   :  { %2336 = vrot.lane.b32.xlu2 %v2177_v48, %s3128_s13 }
 0x3c9   :  { %2338 = vrot.lane.b32.xlu0 %v2178_v2, %s3128_s13  ;;  %v2014_v18 = vpop.permute.xlu2 %2013 }
 0x3ca   :  { %2346 = vrot.lane.b32.xlu1 %v2182_v4, %s3128_s13  ;;  %2143 = vst.msk [vmem:[#allocation6 + $0x5d8] sm:$0xff] %vm798_vm3, %v2014_v18  ;;  %v2183_v18 = vld [vmem:[#allocation2 + $0x2f0] sm:$0xff] }
 0x3cb   :  { %v1998_v23 = vpop.permute.xlu0 %1997 }
 0x3cc   :  { %2135 = vst.msk [vmem:[#allocation6 + $0x518] sm:$0xff] %vm798_vm3, %v1998_v23  ;;  %v2006_v27 = vpop.permute.xlu1 %2005  ;;  %v2184_v23 = vld [vmem:[#allocation2 + $0x300] sm:$0xff] }
 0x3cd   :  { %2139 = vst.msk [vmem:[#allocation6 + $0x578] sm:$0xff] %vm798_vm3, %v2006_v27  ;;  %v2188_v27 = vld [vmem:[#allocation2 + $0x360] sm:$0xff] }
 0x3cf   :  { %2342 = vrot.lane.b32.xlu2 %v2180_v1, %s3128_s13 }
 0x3d1   :  { %2344 = vrot.lane.b32.xlu0 %v2181_v15, %s3128_s13  ;;  %v2277_v48 = vpop.permute.xlu2 %2276 }
 0x3d2   :  { %2352 = vrot.lane.b32.xlu1 %v2185_v36, %s3128_s13  ;;  %2467 = vst.msk [vmem:[#allocation6 + $0x20] sm:$0xff] %vm1183_vm4, %v2277_v48  ;;  %v2186_v48 = vld [vmem:[#allocation2 + $0x340] sm:$0xff] }
 0x3d3   :  { %v2004_v2 = vpop.permute.xlu0 %2003 }
 0x3d4   :  { %2138 = vst.msk [vmem:[#allocation6 + $0x560] sm:$0xff] %vm798_vm3, %v2004_v2  ;;  %v2012_v4 = vpop.permute.xlu1 %2011  ;;  %v2187_v2 = vld [vmem:[#allocation2 + $0x350] sm:$0xff] }
 0x3d5   :  { %2142 = vst.msk [vmem:[#allocation6 + $0x5c0] sm:$0xff] %vm798_vm3, %v2012_v4  ;;  %v2191_v4 = vld [vmem:[#allocation2 + $0x390] sm:$0xff] }
 0x3d7   :  { %2348 = vrot.lane.b32.xlu2 %v2183_v18, %s3128_s13 }
 0x3d9   :  { %2350 = vrot.lane.b32.xlu0 %v2184_v23, %s3128_s13  ;;  %v2283_v1 = vpop.permute.xlu2 %2282 }
 0x3da   :  { %2358 = vrot.lane.b32.xlu1 %v2188_v27, %s3128_s13  ;;  %2470 = vst.msk [vmem:[#allocation6 + $0x68] sm:$0xff] %vm1183_vm4, %v2283_v1  ;;  %v2189_v1 = vld [vmem:[#allocation2 + $0x370] sm:$0xff] }
 0x3db   :  { %v2010_v15 = vpop.permute.xlu0 %2009 }
 0x3dc   :  { %2141 = vst.msk [vmem:[#allocation6 + $0x5a8] sm:$0xff] %vm798_vm3, %v2010_v15  ;;  %v2275_v36 = vpop.permute.xlu1 %2274  ;;  %v2190_v15 = vld [vmem:[#allocation2 + $0x380] sm:$0xff] }
 0x3dd   :  { %2466 = vst.msk [vmem:[#allocation6 + $0x8] sm:$0xff] %vm1183_vm4, %v2275_v36  ;;  %v2194_v36 = vld [vmem:[#allocation2 + $0x3e0] sm:$0xff] }
 0x3df   :  { %2354 = vrot.lane.b32.xlu2 %v2186_v48, %s3128_s13 }
 0x3e1   :  { %2356 = vrot.lane.b32.xlu0 %v2187_v2, %s3128_s13  ;;  %v2289_v18 = vpop.permute.xlu2 %2288 }
 0x3e2   :  { %2364 = vrot.lane.b32.xlu1 %v2191_v4, %s3128_s13  ;;  %2473 = vst.msk [vmem:[#allocation6 + $0xb0] sm:$0xff] %vm1183_vm4, %v2289_v18  ;;  %v2192_v18 = vld [vmem:[#allocation2 + $0x3a0] sm:$0xff] }
 0x3e3   :  { %v2016_v23 = vpop.permute.xlu0 %2015 }
 0x3e4   :  { %2144 = vst.msk [vmem:[#allocation6 + $0x5f0] sm:$0xff] %vm798_vm3, %v2016_v23  ;;  %v2281_v27 = vpop.permute.xlu1 %2280  ;;  %v2193_v23 = vld [vmem:[#allocation2 + $0x3b0] sm:$0xff] }
 0x3e5   :  { %2469 = vst.msk [vmem:[#allocation6 + $0x50] sm:$0xff] %vm1183_vm4, %v2281_v27  ;;  %v2197_v27 = vld [vmem:[#allocation2 + $0x410] sm:$0xff] }
 0x3e7   :  { %2360 = vrot.lane.b32.xlu2 %v2189_v1, %s3128_s13 }
 0x3e9   :  { %2362 = vrot.lane.b32.xlu0 %v2190_v15, %s3128_s13  ;;  %v2295_v48 = vpop.permute.xlu2 %2294 }
 0x3ea   :  { %2370 = vrot.lane.b32.xlu1 %v2194_v36, %s3128_s13  ;;  %2476 = vst.msk [vmem:[#allocation6 + $0xf8] sm:$0xff] %vm1183_vm4, %v2295_v48  ;;  %v2195_v48 = vld [vmem:[#allocation2 + $0x3f0] sm:$0xff] }
 0x3eb   :  { %v2279_v2 = vpop.permute.xlu0 %2278 }
 0x3ec   :  { %2468 = vst.msk [vmem:[#allocation6 + $0x38] sm:$0xff] %vm1183_vm4, %v2279_v2  ;;  %v2287_v4 = vpop.permute.xlu1 %2286  ;;  %v2196_v2 = vld [vmem:[#allocation2 + $0x400] sm:$0xff] }
 0x3ed   :  { %2472 = vst.msk [vmem:[#allocation6 + $0x98] sm:$0xff] %vm1183_vm4, %v2287_v4  ;;  %v2200_v4 = vld [vmem:[#allocation2 + $0x440] sm:$0xff] }
 0x3ef   :  { %2366 = vrot.lane.b32.xlu2 %v2192_v18, %s3128_s13 }
 0x3f1   :  { %2368 = vrot.lane.b32.xlu0 %v2193_v23, %s3128_s13  ;;  %v2301_v1 = vpop.permute.xlu2 %2300 }
 0x3f2   :  { %2376 = vrot.lane.b32.xlu1 %v2197_v27, %s3128_s13  ;;  %2479 = vst.msk [vmem:[#allocation6 + $0x140] sm:$0xff] %vm1183_vm4, %v2301_v1  ;;  %v2198_v1 = vld [vmem:[#allocation2 + $0x420] sm:$0xff] }
 0x3f3   :  { %v2285_v15 = vpop.permute.xlu0 %2284 }
 0x3f4   :  { %2471 = vst.msk [vmem:[#allocation6 + $0x80] sm:$0xff] %vm1183_vm4, %v2285_v15  ;;  %v2293_v36 = vpop.permute.xlu1 %2292  ;;  %v2199_v15 = vld [vmem:[#allocation2 + $0x430] sm:$0xff] }
 0x3f5   :  { %2475 = vst.msk [vmem:[#allocation6 + $0xe0] sm:$0xff] %vm1183_vm4, %v2293_v36  ;;  %v2203_v36 = vld [vmem:[#allocation2 + $0x490] sm:$0xff] }
 0x3f7   :  { %2372 = vrot.lane.b32.xlu2 %v2195_v48, %s3128_s13 }
 0x3f9   :  { %2374 = vrot.lane.b32.xlu0 %v2196_v2, %s3128_s13  ;;  %v2307_v18 = vpop.permute.xlu2 %2306 }
 0x3fa   :  { %2382 = vrot.lane.b32.xlu1 %v2200_v4, %s3128_s13  ;;  %2482 = vst.msk [vmem:[#allocation6 + $0x188] sm:$0xff] %vm1183_vm4, %v2307_v18  ;;  %v2201_v18 = vld [vmem:[#allocation2 + $0x450] sm:$0xff] }
 0x3fb   :  { %v2291_v23 = vpop.permute.xlu0 %2290 }
 0x3fc   :  { %2474 = vst.msk [vmem:[#allocation6 + $0xc8] sm:$0xff] %vm1183_vm4, %v2291_v23  ;;  %v2299_v27 = vpop.permute.xlu1 %2298  ;;  %v2202_v23 = vld [vmem:[#allocation2 + $0x480] sm:$0xff] }
 0x3fd   :  { %2478 = vst.msk [vmem:[#allocation6 + $0x128] sm:$0xff] %vm1183_vm4, %v2299_v27  ;;  %v2206_v27 = vld [vmem:[#allocation2 + $0x4c0] sm:$0xff] }
 0x3ff   :  { %2378 = vrot.lane.b32.xlu2 %v2198_v1, %s3128_s13 }
 0x401   :  { %2380 = vrot.lane.b32.xlu0 %v2199_v15, %s3128_s13  ;;  %v2313_v48 = vpop.permute.xlu2 %2312 }
 0x402   :  { %2388 = vrot.lane.b32.xlu1 %v2203_v36, %s3128_s13  ;;  %2485 = vst.msk [vmem:[#allocation6 + $0x1d0] sm:$0xff] %vm1183_vm4, %v2313_v48  ;;  %v2204_v48 = vld [vmem:[#allocation2 + $0x4a0] sm:$0xff] }
 0x403   :  { %v2297_v2 = vpop.permute.xlu0 %2296 }
 0x404   :  { %2477 = vst.msk [vmem:[#allocation6 + $0x110] sm:$0xff] %vm1183_vm4, %v2297_v2  ;;  %v2305_v4 = vpop.permute.xlu1 %2304  ;;  %v2921_v2 = vld [vmem:[#allocation2 + $0x92] sm:$0xff] }
 0x405   :  { %2481 = vst.msk [vmem:[#allocation6 + $0x170] sm:$0xff] %vm1183_vm4, %v2305_v4  ;;  %v2205_v4 = vld [vmem:[#allocation2 + $0x4b0] sm:$0xff] }
 0x406   :  { %2985 = vst.msk [vmem:[#allocation6 + $0xb8] sm:$0xff] %vm25_vm0, %v2921_v2 }
 0x407   :  { %2384 = vrot.lane.b32.xlu2 %v2201_v18, %s3128_s13 }
 0x409   :  { %2386 = vrot.lane.b32.xlu0 %v2202_v23, %s3128_s13  ;;  %v2319_v1 = vpop.permute.xlu2 %2318 }
 0x40a   :  { %2394 = vrot.lane.b32.xlu1 %v2206_v27, %s3128_s13  ;;  %2488 = vst.msk [vmem:[#allocation6 + $0x218] sm:$0xff] %vm1183_vm4, %v2319_v1  ;;  %v2207_v1 = vld [vmem:[#allocation2 + $0x4d0] sm:$0xff] }
 0x40b   :  { %v2303_v15 = vpop.permute.xlu0 %2302 }
 0x40c   :  { %2480 = vst.msk [vmem:[#allocation6 + $0x158] sm:$0xff] %vm1183_vm4, %v2303_v15  ;;  %v2311_v36 = vpop.permute.xlu1 %2310  ;;  %v2208_v15 = vld [vmem:[#allocation2 + $0x4e0] sm:$0xff] }
 0x40d   :  { %2484 = vst.msk [vmem:[#allocation6 + $0x1b8] sm:$0xff] %vm1183_vm4, %v2311_v36 }
 0x40f   :  { %2390 = vrot.lane.b32.xlu2 %v2204_v48, %s3128_s13 }
 0x411   :  { %2392 = vrot.lane.b32.xlu0 %v2205_v4, %s3128_s13  ;;  %v2325_v18 = vpop.permute.xlu2 %2324 }
 0x412   :  { %2400 = vrot.lane.b32.xlu1 %v2209_v54, %s3128_s13  ;;  %2491 = vst.msk [vmem:[#allocation6 + $0x260] sm:$0xff] %vm1183_vm4, %v2325_v18  ;;  %v2537_v18 = vld [vmem:[#allocation2 + $0x91] sm:$0xff] }
 0x413   :  { %v2309_v23 = vpop.permute.xlu0 %2308 }
 0x414   :  { %2483 = vst.msk [vmem:[#allocation6 + $0x1a0] sm:$0xff] %vm1183_vm4, %v2309_v23  ;;  %v2317_v27 = vpop.permute.xlu1 %2316  ;;  %v2929_v23 = vld [vmem:[#allocation2 + $0x132] sm:$0xff] }
 0x415   :  { %2487 = vst.msk [vmem:[#allocation6 + $0x200] sm:$0xff] %vm1183_vm4, %v2317_v27  ;;  %v2937_v27 = vld [vmem:[#allocation2 + $0x1d2] sm:$0xff] }
 0x416   :  { %2993 = vst.msk [vmem:[#allocation6 + $0x178] sm:$0xff] %vm25_vm0, %v2929_v23  ;;  %v2585_v23 = vld [vmem:[#allocation2 + $0x451] sm:$0xff] }
 0x417   :  { %2396 = vrot.lane.b32.xlu2 %v2207_v1, %s3128_s13  ;;  %3001 = vst.msk [vmem:[#allocation6 + $0x238] sm:$0xff] %vm25_vm0, %v2937_v27  ;;  %v2977_v27 = vld [vmem:[#allocation2 + $0x4f2] sm:$0xff] }
 0x418   :  { %3041 = vst.msk [vmem:[#allocation6 + $0x5f8] sm:$0xff] %vm25_vm0, %v2977_v27 }
 0x419   :  { %2398 = vrot.lane.b32.xlu0 %v2208_v15, %s3128_s13  ;;  %v2331_v36 = vpop.permute.xlu2 %2330  ;;  %v2545_v15 = vld [vmem:[#allocation2 + $0x131] sm:$0xff] }
 0x41a   :  { %2662 = vrot.lane.b32.xlu1 %v4309_v59, %s3129_s14  ;;  %2494 = vst.msk [vmem:[#allocation6 + $0x2a8] sm:$0xff] %vm1183_vm4, %v2331_v36  ;;  %v2945_v36 = vld [vmem:[#allocation2 + $0x272] sm:$0xff] }
 0x41b   :  { %v2315_v54 = vpop.permute.xlu0 %2314  ;;  %3009 = vst.msk [vmem:[#allocation6 + $0x2f8] sm:$0xff] %vm25_vm0, %v2945_v36 }
 0x41c   :  { %2486 = vst.msk [vmem:[#allocation6 + $0x1e8] sm:$0xff] %vm1183_vm4, %v2315_v54  ;;  %v2323_v48 = vpop.permute.xlu1 %2322  ;;  %v2553_v54 = vld [vmem:[#allocation2 + $0x1d1] sm:$0xff] }
 0x41d   :  { %2490 = vst.msk [vmem:[#allocation6 + $0x248] sm:$0xff] %vm1183_vm4, %v2323_v48 }
 0x41f   :  { %2658 = vrot.lane.b32.xlu2 %v4291_v46, %s3129_s14 }
 0x421   :  { %2660 = vrot.lane.b32.xlu0 %v4285_v41, %s3129_s14  ;;  %v2337_v2 = vpop.permute.xlu2 %2336 }
 0x422   :  { %2668 = vrot.lane.b32.xlu1 %v4324_v43, %s3129_s14  ;;  %2497 = vst.msk [vmem:[#allocation6 + $0x2f0] sm:$0xff] %vm1183_vm4, %v2337_v2 }
 0x423   :  { %v2321_v59 = vpop.permute.xlu0 %2320 }
 0x424   :  { %2489 = vst.msk [vmem:[#allocation6 + $0x230] sm:$0xff] %vm1183_vm4, %v2321_v59  ;;  %v2329_v4 = vpop.permute.xlu1 %2328  ;;  %v2561_v59 = vld [vmem:[#allocation2 + $0x271] sm:$0xff] }
 0x425   :  { %2493 = vst.msk [vmem:[#allocation6 + $0x290] sm:$0xff] %vm1183_vm4, %v2329_v4  ;;  %v2953_v4 = vld [vmem:[#allocation2 + $0x312] sm:$0xff] }
 0x426   :  { %3017 = vst.msk [vmem:[#allocation6 + $0x3b8] sm:$0xff] %vm25_vm0, %v2953_v4 }
 0x427   :  { %2664 = vrot.lane.b32.xlu2 %v4306_v56, %s3129_s14 }
 0x429   :  { %2666 = vrot.lane.b32.xlu0 %v4300_v52, %s3129_s14  ;;  %v2343_v46 = vpop.permute.xlu2 %2342 }
 0x42a   :  { %2674 = vrot.lane.b32.xlu1 %v4343_v63, %s3129_s14  ;;  %2500 = vst.msk [vmem:[#allocation6 + $0x338] sm:$0xff] %vm1183_vm4, %v2343_v46  ;;  %v2961_v46 = vld [vmem:[#allocation2 + $0x3b2] sm:$0xff] }
 0x42b   :  { %v2327_v41 = vpop.permute.xlu0 %2326  ;;  %3025 = vst.msk [vmem:[#allocation6 + $0x478] sm:$0xff] %vm25_vm0, %v2961_v46 }
 0x42c   :  { %2492 = vst.msk [vmem:[#allocation6 + $0x278] sm:$0xff] %vm1183_vm4, %v2327_v41  ;;  %v2335_v43 = vpop.permute.xlu1 %2334 }
 0x42d   :  { %2496 = vst.msk [vmem:[#allocation6 + $0x2d8] sm:$0xff] %vm1183_vm4, %v2335_v43  ;;  %v2569_v43 = vld [vmem:[#allocation2 + $0x311] sm:$0xff] }
 0x42f   :  { %2670 = vrot.lane.b32.xlu2 %v4321_v5, %s3129_s14 }
 0x431   :  { %2672 = vrot.lane.b32.xlu0 %v2537_v18, %s3129_s14  ;;  %v2349_v56 = vpop.permute.xlu2 %2348  ;;  %v2969_v18 = vld [vmem:[#allocation2 + $0x452] sm:$0xff] }
 0x432   :  { %2680 = vrot.lane.b32.xlu1 %v4363_v25, %s3129_s14  ;;  %2503 = vst.msk [vmem:[#allocation6 + $0x380] sm:$0xff] %vm1183_vm4, %v2349_v56  ;;  %v2577_v56 = vld [vmem:[#allocation2 + $0x3b1] sm:$0xff] }
 0x433   :  { %v2333_v52 = vpop.permute.xlu0 %2332  ;;  %3033 = vst.msk [vmem:[#allocation6 + $0x538] sm:$0xff] %vm25_vm0, %v2969_v18 }
 0x434   :  { %2495 = vst.msk [vmem:[#allocation6 + $0x2c0] sm:$0xff] %vm1183_vm4, %v2333_v52  ;;  %v2341_v63 = vpop.permute.xlu1 %2340 }
 0x435   :  { %2499 = vst.msk [vmem:[#allocation6 + $0x320] sm:$0xff] %vm1183_vm4, %v2341_v63 }
 0x437   :  { %2676 = vrot.lane.b32.xlu2 %v4340_v9, %s3129_s14 }
 0x439   :  { %2678 = vrot.lane.b32.xlu0 %v4334_v12, %s3129_s14  ;;  %v2355_v5 = vpop.permute.xlu2 %2354 }
 0x43a   :  { %2686 = vrot.lane.b32.xlu1 %v4379_v3, %s3129_s14  ;;  %2506 = vst.msk [vmem:[#allocation6 + $0x3c8] sm:$0xff] %vm1183_vm4, %v2355_v5 }
 0x43b   :  { %v2339_v25 = vpop.permute.xlu0 %2338 }
 0x43c   :  { %2498 = vst.msk [vmem:[#allocation6 + $0x308] sm:$0xff] %vm1183_vm4, %v2339_v25  ;;  %v2347_v1 = vpop.permute.xlu1 %2346  ;;  %v4959_v25 = vld [vmem:[#allocation10_spill] sm:$0xff] }
 0x43d   :  { %2502 = vst.msk [vmem:[#allocation6 + $0x368] sm:$0xff] %vm1183_vm4, %v2347_v1 }
 0x43f   :  { %2682 = vrot.lane.b32.xlu2 %v4360_v17, %s3129_s14 }
 0x441   :  { %2684 = vrot.lane.b32.xlu0 %v4354_v28, %s3129_s14  ;;  %v2361_v9 = vpop.permute.xlu2 %2360 }
 0x442   :  { %2692 = vrot.lane.b32.xlu1 %v4396_v38, %s3129_s14  ;;  %2509 = vst.msk [vmem:[#allocation6 + $0x410] sm:$0xff] %vm1183_vm4, %v2361_v9  ;;  %v2593_v9 = vld [vmem:[#allocation2 + $0x4f1] sm:$0xff] }
 0x443   :  { %v2345_v12 = vpop.permute.xlu0 %2344 }
 0x444   :  { %2501 = vst.msk [vmem:[#allocation6 + $0x350] sm:$0xff] %vm1183_vm4, %v2345_v12  ;;  %v2353_v3 = vpop.permute.xlu1 %2352 }
 0x445   :  { %2505 = vst.msk [vmem:[#allocation6 + $0x3b0] sm:$0xff] %vm1183_vm4, %v2353_v3 }
 0x447   :  { %2688 = vrot.lane.b32.xlu2 %v2545_v15, %s3129_s14 }
 0x449   :  { %2690 = vrot.lane.b32.xlu0 %v4372_v34, %s3129_s14  ;;  %v2367_v17 = vpop.permute.xlu2 %2366 }
 0x44a   :  { %2698 = vrot.lane.b32.xlu1 %v4418_v49, %s3129_s14  ;;  %2512 = vst.msk [vmem:[#allocation6 + $0x458] sm:$0xff] %vm1183_vm4, %v2367_v17 }
 0x44b   :  { %v2351_v28 = vpop.permute.xlu0 %2350 }
 0x44c   :  { %2504 = vst.msk [vmem:[#allocation6 + $0x398] sm:$0xff] %vm1183_vm4, %v2351_v28  ;;  %v2359_v38 = vpop.permute.xlu1 %2358 }
 0x44d   :  { %2508 = vst.msk [vmem:[#allocation6 + $0x3f8] sm:$0xff] %vm1183_vm4, %v2359_v38 }
 0x44f   :  { %2694 = vrot.lane.b32.xlu2 %v4393_v37, %s3129_s14 }
 0x451   :  { %2696 = vrot.lane.b32.xlu0 %v4387_v16, %s3129_s14  ;;  %v2373_v34 = vpop.permute.xlu2 %2372 }
 0x452   :  { %2704 = vrot.lane.b32.xlu1 %v2553_v54, %s3129_s14  ;;  %2515 = vst.msk [vmem:[#allocation6 + $0x4a0] sm:$0xff] %vm1183_vm4, %v2373_v34 }
 0x453   :  { %v2357_v49 = vpop.permute.xlu0 %2356 }
 0x454   :  { %2507 = vst.msk [vmem:[#allocation6 + $0x3e0] sm:$0xff] %vm1183_vm4, %v2357_v49  ;;  %v2365_v48 = vpop.permute.xlu1 %2364 }
 0x455   :  { %2511 = vst.msk [vmem:[#allocation6 + $0x440] sm:$0xff] %vm1183_vm4, %v2365_v48 }
 0x457   :  { %2700 = vrot.lane.b32.xlu2 %v4415_v24, %s3129_s14 }
 0x459   :  { %2702 = vrot.lane.b32.xlu0 %v4409_v40, %s3129_s14  ;;  %v2379_v37 = vpop.permute.xlu2 %2378 }
 0x45a   :  { %2710 = vrot.lane.b32.xlu1 %v4451_v19, %s3129_s14  ;;  %2518 = vst.msk [vmem:[#allocation6 + $0x4e8] sm:$0xff] %vm1183_vm4, %v2379_v37 }
 0x45b   :  { %v2363_v16 = vpop.permute.xlu0 %2362 }
 0x45c   :  { %2510 = vst.msk [vmem:[#allocation6 + $0x428] sm:$0xff] %vm1183_vm4, %v2363_v16  ;;  %v2371_v2 = vpop.permute.xlu1 %2370 }
 0x45d   :  { %2514 = vst.msk [vmem:[#allocation6 + $0x488] sm:$0xff] %vm1183_vm4, %v2371_v2 }
 0x45f   :  { %2706 = vrot.lane.b32.xlu2 %v4433_v60, %s3129_s14 }
 0x461   :  { %2708 = vrot.lane.b32.xlu0 %v4427_v57, %s3129_s14  ;;  %v2385_v24 = vpop.permute.xlu2 %2384 }
 0x462   :  { %2716 = vrot.lane.b32.xlu1 %v4466_v29, %s3129_s14  ;;  %2521 = vst.msk [vmem:[#allocation6 + $0x530] sm:$0xff] %vm1183_vm4, %v2385_v24 }
 0x463   :  { %v2369_v40 = vpop.permute.xlu0 %2368 }
 0x464   :  { %2513 = vst.msk [vmem:[#allocation6 + $0x470] sm:$0xff] %vm1183_vm4, %v2369_v40  ;;  %v2377_v19 = vpop.permute.xlu1 %2376 }
 0x465   :  { %2517 = vst.msk [vmem:[#allocation6 + $0x4d0] sm:$0xff] %vm1183_vm4, %v2377_v19 }
 0x467   :  { %2712 = vrot.lane.b32.xlu2 %v4448_v14, %s3129_s14 }
 0x469   :  { %2714 = vrot.lane.b32.xlu0 %v4442_v0, %s3129_s14  ;;  %v2391_v60 = vpop.permute.xlu2 %2390 }
 0x46a   :  { %2722 = vrot.lane.b32.xlu1 %v4485_v33, %s3129_s14  ;;  %2524 = vst.msk [vmem:[#allocation6 + $0x578] sm:$0xff] %vm1183_vm4, %v2391_v60 }
 0x46b   :  { %v2375_v57 = vpop.permute.xlu0 %2374 }
 0x46c   :  { %2516 = vst.msk [vmem:[#allocation6 + $0x4b8] sm:$0xff] %vm1183_vm4, %v2375_v57  ;;  %v2383_v29 = vpop.permute.xlu1 %2382 }
 0x46d   :  { %2520 = vst.msk [vmem:[#allocation6 + $0x518] sm:$0xff] %vm1183_vm4, %v2383_v29 }
 0x46f   :  { %2718 = vrot.lane.b32.xlu2 %v4463_v35, %s3129_s14 }
 0x471   :  { %2720 = vrot.lane.b32.xlu0 %v2561_v59, %s3129_s14  ;;  %v2397_v14 = vpop.permute.xlu2 %2396 }
 0x472   :  { %2728 = vrot.lane.b32.xlu1 %v4503_v50, %s3129_s14  ;;  %2527 = vst.msk [vmem:[#allocation6 + $0x5c0] sm:$0xff] %vm1183_vm4, %v2397_v14 }
 0x473   :  { %v2381_v0 = vpop.permute.xlu0 %2380 }
 0x474   :  { %2519 = vst.msk [vmem:[#allocation6 + $0x500] sm:$0xff] %vm1183_vm4, %v2381_v0  ;;  %v2389_v33 = vpop.permute.xlu1 %2388 }
 0x475   :  { %2523 = vst.msk [vmem:[#allocation6 + $0x560] sm:$0xff] %vm1183_vm4, %v2389_v33 }
 0x477   :  { %2724 = vrot.lane.b32.xlu2 %v4482_v31, %s3129_s14 }
 0x479   :  { %2726 = vrot.lane.b32.xlu0 %v4476_v42, %s3129_s14  ;;  %v2659_v35 = vpop.permute.xlu2 %2658 }
 0x47a   :  { %2734 = vrot.lane.b32.xlu1 %v4519_v10, %s3129_s14  ;;  %2850 = vst.msk [vmem:[#allocation6 + $0x8] sm:$0xff] %vm1568_vm5, %v2659_v35 }
 0x47b   :  { %v2387_v50 = vpop.permute.xlu0 %2386 }
 0x47c   :  { %2522 = vst.msk [vmem:[#allocation6 + $0x548] sm:$0xff] %vm1183_vm4, %v2387_v50  ;;  %v2395_v41 = vpop.permute.xlu1 %2394 }
 0x47d   :  { %2526 = vst.msk [vmem:[#allocation6 + $0x5a8] sm:$0xff] %vm1183_vm4, %v2395_v41 }
 0x47f   :  { %2730 = vrot.lane.b32.xlu2 %v4500_v45, %s3129_s14 }
 0x481   :  { %2732 = vrot.lane.b32.xlu0 %v4494_v13, %s3129_s14  ;;  %v2665_v31 = vpop.permute.xlu2 %2664 }
 0x482   :  { %2740 = vrot.lane.b32.xlu1 %v4536_v26, %s3129_s14  ;;  %2853 = vst.msk [vmem:[#allocation6 + $0x50] sm:$0xff] %vm1568_vm5, %v2665_v31 }
 0x483   :  { %v2393_v42 = vpop.permute.xlu0 %2392 }
 0x484   :  { %2525 = vst.msk [vmem:[#allocation6 + $0x590] sm:$0xff] %vm1183_vm4, %v2393_v42  ;;  %v2401_v10 = vpop.permute.xlu1 %2400 }
 0x485   :  { %2529 = vst.msk [vmem:[#allocation6 + $0x5f0] sm:$0xff] %vm1183_vm4, %v2401_v10 }
 0x487   :  { %2736 = vrot.lane.b32.xlu2 %v2569_v43, %s3129_s14 }
 0x489   :  { %2738 = vrot.lane.b32.xlu0 %v4512_v62, %s3129_s14  ;;  %v2671_v45 = vpop.permute.xlu2 %2670 }
 0x48a   :  { %2746 = vrot.lane.b32.xlu1 %v4554_v39, %s3129_s14  ;;  %2856 = vst.msk [vmem:[#allocation6 + $0x98] sm:$0xff] %vm1568_vm5, %v2671_v45 }
 0x48b   :  { %v2399_v13 = vpop.permute.xlu0 %2398 }
 0x48c   :  { %2528 = vst.msk [vmem:[#allocation6 + $0x5d8] sm:$0xff] %vm1183_vm4, %v2399_v13  ;;  %v2663_v26 = vpop.permute.xlu1 %2662 }
 0x48d   :  { %2852 = vst.msk [vmem:[#allocation6 + $0x38] sm:$0xff] %vm1568_vm5, %v2663_v26 }
 0x48f   :  { %2742 = vrot.lane.b32.xlu2 %v4533_v6, %s3129_s14 }
 0x491   :  { %2744 = vrot.lane.b32.xlu0 %v4527_v21, %s3129_s14  ;;  %v2677_v62 = vpop.permute.xlu2 %2676 }
 0x492   :  { %2752 = vrot.lane.b32.xlu1 %v2577_v56, %s3129_s14  ;;  %2859 = vst.msk [vmem:[#allocation6 + $0xe0] sm:$0xff] %vm1568_vm5, %v2677_v62 }
 0x493   :  { %v2661_v39 = vpop.permute.xlu0 %2660 }
 0x494   :  { %2851 = vst.msk [vmem:[#allocation6 + $0x20] sm:$0xff] %vm1568_vm5, %v2661_v39  ;;  %v2669_v52 = vpop.permute.xlu1 %2668 }
 0x495   :  { %2855 = vst.msk [vmem:[#allocation6 + $0x80] sm:$0xff] %vm1568_vm5, %v2669_v52 }
 0x497   :  { %2748 = vrot.lane.b32.xlu2 %v4551_v58, %s3129_s14 }
 0x499   :  { %2750 = vrot.lane.b32.xlu0 %v4545_v47, %s3129_s14  ;;  %v2683_v6 = vpop.permute.xlu2 %2682 }
 0x49a   :  { %2758 = vrot.lane.b32.xlu1 %v4587_v32, %s3129_s14  ;;  %2862 = vst.msk [vmem:[#allocation6 + $0x128] sm:$0xff] %vm1568_vm5, %v2683_v6 }
 0x49b   :  { %v2667_v21 = vpop.permute.xlu0 %2666 }
 0x49c   :  { %2854 = vst.msk [vmem:[#allocation6 + $0x68] sm:$0xff] %vm1568_vm5, %v2667_v21  ;;  %v2675_v63 = vpop.permute.xlu1 %2674 }
 0x49d   :  { %2858 = vst.msk [vmem:[#allocation6 + $0xc8] sm:$0xff] %vm1568_vm5, %v2675_v63 }
 0x49f   :  { %2754 = vrot.lane.b32.xlu2 %v4569_v44, %s3129_s14 }
 0x4a1   :  { %2756 = vrot.lane.b32.xlu0 %v4563_v51, %s3129_s14  ;;  %v2689_v58 = vpop.permute.xlu2 %2688 }
 0x4a2   :  { %2764 = vrot.lane.b32.xlu1 %v4602_v53, %s3129_s14  ;;  %2865 = vst.msk [vmem:[#allocation6 + $0x170] sm:$0xff] %vm1568_vm5, %v2689_v58 }
 0x4a3   :  { %v2673_v47 = vpop.permute.xlu0 %2672 }
 0x4a4   :  { %2857 = vst.msk [vmem:[#allocation6 + $0xb0] sm:$0xff] %vm1568_vm5, %v2673_v47  ;;  %v2681_v32 = vpop.permute.xlu1 %2680 }
 0x4a5   :  { %2861 = vst.msk [vmem:[#allocation6 + $0x110] sm:$0xff] %vm1568_vm5, %v2681_v32 }
 0x4a7   :  { %2760 = vrot.lane.b32.xlu2 %v4584_v8, %s3129_s14 }
 0x4a9   :  { %2762 = vrot.lane.b32.xlu0 %v4578_v20, %s3129_s14  ;;  %v2695_v44 = vpop.permute.xlu2 %2694 }
 0x4aa   :  { %2770 = vrot.lane.b32.xlu1 %v4620_v61, %s3129_s14  ;;  %2868 = vst.msk [vmem:[#allocation6 + $0x1b8] sm:$0xff] %vm1568_vm5, %v2695_v44 }
 0x4ab   :  { %v2679_v51 = vpop.permute.xlu0 %2678 }
 0x4ac   :  { %2860 = vst.msk [vmem:[#allocation6 + $0xf8] sm:$0xff] %vm1568_vm5, %v2679_v51  ;;  %v2687_v53 = vpop.permute.xlu1 %2686 }
 0x4ad   :  { %2864 = vst.msk [vmem:[#allocation6 + $0x158] sm:$0xff] %vm1568_vm5, %v2687_v53 }
 0x4af   :  { %2766 = vrot.lane.b32.xlu2 %v4599_v30, %s3129_s14 }
 0x4b1   :  { %2768 = vrot.lane.b32.xlu0 %v2585_v23, %s3129_s14  ;;  %v2701_v8 = vpop.permute.xlu2 %2700 }
 0x4b2   :  { %2776 = vrot.lane.b32.xlu1 %v4638_v7, %s3129_s14  ;;  %2871 = vst.msk [vmem:[#allocation6 + $0x200] sm:$0xff] %vm1568_vm5, %v2701_v8 }
 0x4b3   :  { %v2685_v20 = vpop.permute.xlu0 %2684 }
 0x4b4   :  { %2863 = vst.msk [vmem:[#allocation6 + $0x140] sm:$0xff] %vm1568_vm5, %v2685_v20  ;;  %v2693_v61 = vpop.permute.xlu1 %2692 }
 0x4b5   :  { %2867 = vst.msk [vmem:[#allocation6 + $0x1a0] sm:$0xff] %vm1568_vm5, %v2693_v61 }
 0x4b7   :  { %2772 = vrot.lane.b32.xlu2 %v4617_v22, %s3129_s14  ;;  %v4960_v22 = vld [vmem:[#allocation9_spill] sm:$0xff] }
 0x4b9   :  { %2774 = vrot.lane.b32.xlu0 %v4611_v11, %s3129_s14  ;;  %v2707_v30 = vpop.permute.xlu2 %2706 }
 0x4ba   :  { %2782 = vrot.lane.b32.xlu1 %v4647_v55, %s3129_s14  ;;  %2874 = vst.msk [vmem:[#allocation6 + $0x248] sm:$0xff] %vm1568_vm5, %v2707_v30 }
 0x4bb   :  { %v2691_v7 = vpop.permute.xlu0 %2690 }
 0x4bc   :  { %2866 = vst.msk [vmem:[#allocation6 + $0x188] sm:$0xff] %vm1568_vm5, %v2691_v7  ;;  %v2699_v5 = vpop.permute.xlu1 %2698 }
 0x4bd   :  { %2870 = vst.msk [vmem:[#allocation6 + $0x1e8] sm:$0xff] %vm1568_vm5, %v2699_v5 }
 0x4bf   :  { %2778 = vrot.lane.b32.xlu2 %v4959_v25, %s3129_s14 }
 0x4c1   :  { %2780 = vrot.lane.b32.xlu0 %v4960_v22, %s3129_s14  ;;  %v2713_v1 = vpop.permute.xlu2 %2712 }
 0x4c2   :  { %2877 = vst.msk [vmem:[#allocation6 + $0x290] sm:$0xff] %vm1568_vm5, %v2713_v1 }
 0x4c3   :  { %v2697_v11 = vpop.permute.xlu0 %2696 }
 0x4c4   :  { %2869 = vst.msk [vmem:[#allocation6 + $0x1d0] sm:$0xff] %vm1568_vm5, %v2697_v11  ;;  %v2705_v55 = vpop.permute.xlu1 %2704 }
 0x4c5   :  { %2873 = vst.msk [vmem:[#allocation6 + $0x230] sm:$0xff] %vm1568_vm5, %v2705_v55 }
 0x4c7   :  { %2784 = vrot.lane.b32.xlu2 %v2593_v9, %s3129_s14 }
 0x4c9   :  { %v2719_v12 = vpop.permute.xlu2 %2718 }
 0x4ca   :  { %2880 = vst.msk [vmem:[#allocation6 + $0x2d8] sm:$0xff] %vm1568_vm5, %v2719_v12 }
 0x4cb   :  { %v2703_v3 = vpop.permute.xlu0 %2702 }
 0x4cc   :  { %2872 = vst.msk [vmem:[#allocation6 + $0x218] sm:$0xff] %vm1568_vm5, %v2703_v3  ;;  %v2711_v15 = vpop.permute.xlu1 %2710 }
 0x4cd   :  { %2876 = vst.msk [vmem:[#allocation6 + $0x278] sm:$0xff] %vm1568_vm5, %v2711_v15 }
 0x4d1   :  { %v2725_v17 = vpop.permute.xlu2 %2724 }
 0x4d2   :  { %2883 = vst.msk [vmem:[#allocation6 + $0x320] sm:$0xff] %vm1568_vm5, %v2725_v17 }
 0x4d3   :  { %v2709_v28 = vpop.permute.xlu0 %2708 }
 0x4d4   :  { %2875 = vst.msk [vmem:[#allocation6 + $0x260] sm:$0xff] %vm1568_vm5, %v2709_v28  ;;  %v2717_v38 = vpop.permute.xlu1 %2716 }
 0x4d5   :  { %2879 = vst.msk [vmem:[#allocation6 + $0x2c0] sm:$0xff] %vm1568_vm5, %v2717_v38 }
 0x4d9   :  { %v2731_v36 = vpop.permute.xlu2 %2730 }
 0x4da   :  { %2886 = vst.msk [vmem:[#allocation6 + $0x368] sm:$0xff] %vm1568_vm5, %v2731_v36 }
 0x4db   :  { %v2715_v54 = vpop.permute.xlu0 %2714 }
 0x4dc   :  { %2878 = vst.msk [vmem:[#allocation6 + $0x2a8] sm:$0xff] %vm1568_vm5, %v2715_v54  ;;  %v2723_v34 = vpop.permute.xlu1 %2722 }
 0x4dd   :  { %2882 = vst.msk [vmem:[#allocation6 + $0x308] sm:$0xff] %vm1568_vm5, %v2723_v34 }
 0x4e1   :  { %v2737_v49 = vpop.permute.xlu2 %2736 }
 0x4e2   :  { %2889 = vst.msk [vmem:[#allocation6 + $0x3b0] sm:$0xff] %vm1568_vm5, %v2737_v49 }
 0x4e3   :  { %v2721_v48 = vpop.permute.xlu0 %2720 }
 0x4e4   :  { %2881 = vst.msk [vmem:[#allocation6 + $0x2f0] sm:$0xff] %vm1568_vm5, %v2721_v48  ;;  %v2729_v37 = vpop.permute.xlu1 %2728 }
 0x4e5   :  { %2885 = vst.msk [vmem:[#allocation6 + $0x350] sm:$0xff] %vm1568_vm5, %v2729_v37 }
 0x4e9   :  { %v2743_v16 = vpop.permute.xlu2 %2742 }
 0x4ea   :  { %2892 = vst.msk [vmem:[#allocation6 + $0x3f8] sm:$0xff] %vm1568_vm5, %v2743_v16 }
 0x4eb   :  { %v2727_v2 = vpop.permute.xlu0 %2726 }
 0x4ec   :  { %2884 = vst.msk [vmem:[#allocation6 + $0x338] sm:$0xff] %vm1568_vm5, %v2727_v2  ;;  %v2735_v24 = vpop.permute.xlu1 %2734 }
 0x4ed   :  { %2888 = vst.msk [vmem:[#allocation6 + $0x398] sm:$0xff] %vm1568_vm5, %v2735_v24 }
 0x4f1   :  { %v2749_v40 = vpop.permute.xlu2 %2748 }
 0x4f2   :  { %2895 = vst.msk [vmem:[#allocation6 + $0x440] sm:$0xff] %vm1568_vm5, %v2749_v40 }
 0x4f3   :  { %v2733_v19 = vpop.permute.xlu0 %2732 }
 0x4f4   :  { %2887 = vst.msk [vmem:[#allocation6 + $0x380] sm:$0xff] %vm1568_vm5, %v2733_v19  ;;  %v2741_v60 = vpop.permute.xlu1 %2740 }
 0x4f5   :  { %2891 = vst.msk [vmem:[#allocation6 + $0x3e0] sm:$0xff] %vm1568_vm5, %v2741_v60 }
 0x4f9   :  { %v2755_v57 = vpop.permute.xlu2 %2754 }
 0x4fa   :  { %2898 = vst.msk [vmem:[#allocation6 + $0x488] sm:$0xff] %vm1568_vm5, %v2755_v57 }
 0x4fb   :  { %v2739_v29 = vpop.permute.xlu0 %2738 }
 0x4fc   :  { %2890 = vst.msk [vmem:[#allocation6 + $0x3c8] sm:$0xff] %vm1568_vm5, %v2739_v29  ;;  %v2747_v59 = vpop.permute.xlu1 %2746 }
 0x4fd   :  { %2894 = vst.msk [vmem:[#allocation6 + $0x428] sm:$0xff] %vm1568_vm5, %v2747_v59 }
 0x501   :  { %v2761_v14 = vpop.permute.xlu2 %2760 }
 0x502   :  { %2901 = vst.msk [vmem:[#allocation6 + $0x4d0] sm:$0xff] %vm1568_vm5, %v2761_v14 }
 0x503   :  { %v2745_v0 = vpop.permute.xlu0 %2744 }
 0x504   :  { %2893 = vst.msk [vmem:[#allocation6 + $0x410] sm:$0xff] %vm1568_vm5, %v2745_v0  ;;  %v2753_v33 = vpop.permute.xlu1 %2752 }
 0x505   :  { %2897 = vst.msk [vmem:[#allocation6 + $0x470] sm:$0xff] %vm1568_vm5, %v2753_v33 }
 0x509   :  { %v2767_v4 = vpop.permute.xlu2 %2766 }
 0x50a   :  { %2904 = vst.msk [vmem:[#allocation6 + $0x518] sm:$0xff] %vm1568_vm5, %v2767_v4 }
 0x50b   :  { %v2751_v46 = vpop.permute.xlu0 %2750 }
 0x50c   :  { %2896 = vst.msk [vmem:[#allocation6 + $0x458] sm:$0xff] %vm1568_vm5, %v2751_v46  ;;  %v2759_v35 = vpop.permute.xlu1 %2758 }
 0x50d   :  { %2900 = vst.msk [vmem:[#allocation6 + $0x4b8] sm:$0xff] %vm1568_vm5, %v2759_v35 }
 0x511   :  { %v2773_v50 = vpop.permute.xlu2 %2772 }
 0x512   :  { %2907 = vst.msk [vmem:[#allocation6 + $0x560] sm:$0xff] %vm1568_vm5, %v2773_v50 }
 0x513   :  { %v2757_v41 = vpop.permute.xlu0 %2756 }
 0x514   :  { %2899 = vst.msk [vmem:[#allocation6 + $0x4a0] sm:$0xff] %vm1568_vm5, %v2757_v41  ;;  %v2765_v31 = vpop.permute.xlu1 %2764 }
 0x515   :  { %2903 = vst.msk [vmem:[#allocation6 + $0x500] sm:$0xff] %vm1568_vm5, %v2765_v31 }
 0x519   :  { %v2779_v42 = vpop.permute.xlu2 %2778 }
 0x51a   :  { %2910 = vst.msk [vmem:[#allocation6 + $0x5a8] sm:$0xff] %vm1568_vm5, %v2779_v42 }
 0x51b   :  { %v2763_v10 = vpop.permute.xlu0 %2762 }
 0x51c   :  { %2902 = vst.msk [vmem:[#allocation6 + $0x4e8] sm:$0xff] %vm1568_vm5, %v2763_v10  ;;  %v2771_v43 = vpop.permute.xlu1 %2770 }
 0x51d   :  { %2906 = vst.msk [vmem:[#allocation6 + $0x548] sm:$0xff] %vm1568_vm5, %v2771_v43 }
 0x521   :  { %v2785_v45 = vpop.permute.xlu2 %2784 }
 0x522   :  { %2913 = vst.msk [vmem:[#allocation6 + $0x5f0] sm:$0xff] %vm1568_vm5, %v2785_v45 }
 0x523   :  { %v2769_v13 = vpop.permute.xlu0 %2768 }
 0x524   :  { %2905 = vst.msk [vmem:[#allocation6 + $0x530] sm:$0xff] %vm1568_vm5, %v2769_v13  ;;  %v2777_v26 = vpop.permute.xlu1 %2776 }
 0x525   :  { %2909 = vst.msk [vmem:[#allocation6 + $0x590] sm:$0xff] %vm1568_vm5, %v2777_v26 }
 0x52b   :  { %v2775_v18 = vpop.permute.xlu0 %2774 }
 0x52c   :  { %2908 = vst.msk [vmem:[#allocation6 + $0x578] sm:$0xff] %vm1568_vm5, %v2775_v18  ;;  %v2783_v56 = vpop.permute.xlu1 %2782 }
 0x52d   :  { %2912 = vst.msk [vmem:[#allocation6 + $0x5d8] sm:$0xff] %vm1568_vm5, %v2783_v56 }
 0x533   :  { %v2781_v62 = vpop.permute.xlu0 %2780 }
 0x534   :  { %2911 = vst.msk [vmem:[#allocation6 + $0x5c0] sm:$0xff] %vm1568_vm5, %v2781_v62 }
 0x535   :  { %3054 = dma.vmem_to_hbm [thread:$0]  %s3047_s16, 24576, %s3049_s19, [#allocation5], %s3131_s20, %s3131_s20, %s3132_s21  }
 0x536   :  { %3121 = dma.done.wait [#allocation5], 24576  }
 0x537   :  { %3122 = vsyncadd [#allocation5], 4294942720 }
 0x538   :  { %3059 = vsyncpa [#allocation4], 1 }
 0x539   :  { %3060 = vsyncpa [#allocation5], 1 }

</bundles_post_ra>
